<compile_context>
chip_gen: v5e
topology: v5e:2x2
jax: 0.10.0
libtpu: 0.0.40
codegen_flags: <defaults>
</compile_context>

<pallas_src>
import jax
import jax.numpy as jnp
from jax import lax
from jax.experimental import pallas as pl
from jax.experimental.pallas import tpu as pltpu


def _spatial_gate_kernel(w_ref, b_ref, x_ref, out_ref, pmax_ref, pmean_ref, sbuf_ref):
    """One grid step = TB batch images, full C / H / W.

    w_ref    (98,)            SMEM  7x7x2 conv weights (BN scale folded), order (cin, dy, dx)
    b_ref    (1,)             SMEM  folded BN bias
    x_ref    (TB, C, H, W)    VMEM  input block (H on sublanes, W on lanes)
    out_ref  (TB, C, H, W)    VMEM
    pmax_ref / pmean_ref (TB, H+6, W+6) VMEM  zero-halo padded pooled maps
    sbuf_ref (TB, H+6, W)     VMEM  column-shifted staging buffer (one dx at a time)
    """
    TB, C, H, W = x_ref.shape

    # --- zero ONLY the 3-wide halo strips.  Done every grid step (scratch is
    #     per-TensorCore under megacore sharding, so this must not be gated on
    #     program_id == 0); the interior is fully overwritten right below. ---
    zr = jnp.zeros((TB, 3, W + 6), jnp.float32)
    zc = jnp.zeros((TB, H + 6, 3), jnp.float32)
    for ref in (pmax_ref, pmean_ref):
        ref[:, 0:3, :] = zr
        ref[:, H + 3:H + 6, :] = zr
        ref[:, :, 0:3] = zc
        ref[:, :, W + 3:W + 6] = zc

    # --- ChannelPool: per-pixel max / mean over channels (leading-dim VPU
    #     reduce), stored sublane-packed into the padded buffers at (3, 3). ---
    xf = x_ref[...].astype(jnp.float32)                       # (TB, C, H, W)
    pmax_ref[:, 3:H + 3, 3:W + 3] = jnp.max(xf, axis=1)
    pmean_ref[:, 3:H + 3, 3:W + 3] = jnp.sum(xf, axis=1) * (1.0 / C)

    # --- 7x7 conv (2 in -> 1 out, pad 3) as fully packed VPU MACs.
    #     Hoist the lane (dx) shift: one misaligned column-slice load per
    #     (cin, dx) into sbuf; the 7 dy taps are then lane-aligned row slices.
    #     Out-of-image taps read the zero halo, so no masks are needed. ---
    acc = jnp.full((TB, H, W), b_ref[0], dtype=jnp.float32)   # start from BN bias
    for ci, pref in enumerate((pmax_ref, pmean_ref)):         # cin 0 = max, 1 = mean
        for dx in range(7):
            sbuf_ref[...] = pref[:, :, dx:dx + W]             # hoisted dx shift
            for dy in range(7):
                acc = acc + sbuf_ref[:, dy:dy + H, :] * w_ref[ci * 49 + dy * 7 + dx]

    # --- sigmoid (EUP exp) + channel-broadcast gating -------------------------
    scale = 1.0 / (1.0 + jnp.exp(-acc))                       # (TB, H, W)
    out_ref[...] = (x_ref[...].astype(jnp.float32)
                    * scale[:, None, :, :]).astype(out_ref.dtype)


def spatial_gate(x_nchw, conv_weight, bn_gamma, bn_beta, bn_mean, bn_var,
                 bn_eps=1e-5):
    """Pallas implementation of SpatialGate.forward (BN in inference mode).

    Args:
      x_nchw:      (N, C, H, W) float32
      conv_weight: (1, 2, 7, 7) float32   ConvBNReLU conv weight (no bias)
      bn_gamma, bn_beta, bn_mean, bn_var: (1,) float32  BatchNorm2d(1) params
    Returns:
      (N, C, H, W) float32
    """
    N, C, H, W = x_nchw.shape

    # Fold BN (inference) into the conv:  a*conv(x) + b.
    a = bn_gamma.astype(jnp.float32) / jnp.sqrt(bn_var.astype(jnp.float32) + bn_eps)
    w_folded = (conv_weight[0].astype(jnp.float32) * a[0]).reshape(-1)            # (98,)
    b_folded = (bn_beta.astype(jnp.float32)
                - bn_mean.astype(jnp.float32) * a).reshape(-1)                    # (1,)

    # --- pick TB (batch images per block) from a VMEM budget: amortizes the
    #     per-grid-step overhead for small maps, falls back to TB=1 for big
    #     ones so the batch axis still feeds both v7x cores. ---
    lanes_w = ((W + 127) // 128) * 128
    rows_h = ((H + 7) // 8) * 8
    img_bytes = C * rows_h * lanes_w * 4                       # one image block, f32 VMEM
    budget = 8 << 20
    tb = 1
    for cand in range(1, N + 1):
        if N % cand == 0 and 4 * cand * img_bytes <= budget:   # in+out, double-buffered
            tb = cand
    grid = (N // tb,)

    # Explicit scoped-VMEM limit (v5e default is 16 MiB, v6e/v7x 32 MiB).
    pad_rows = ((H + 6 + 7) // 8) * 8
    pad_lanes = ((W + 6 + 127) // 128) * 128
    scratch_bytes = tb * 4 * (2 * pad_rows * pad_lanes + pad_rows * lanes_w)
    needed = 4 * tb * img_bytes + scratch_bytes
    vmem_limit = int(min(max(2 * needed + (8 << 20), 32 << 20), 48 << 20))

    out = pl.pallas_call(
        _spatial_gate_kernel,
        out_shape=jax.ShapeDtypeStruct((N, C, H, W), x_nchw.dtype),
        grid_spec=pltpu.PrefetchScalarGridSpec(
            num_scalar_prefetch=0,
            grid=grid,
            in_specs=[
                pl.BlockSpec(memory_space=pltpu.MemorySpace.SMEM),     # folded conv w
                pl.BlockSpec(memory_space=pltpu.MemorySpace.SMEM),     # folded BN bias
                pl.BlockSpec((tb, C, H, W), lambda n: (n, 0, 0, 0)),   # x
            ],
            out_specs=pl.BlockSpec((tb, C, H, W), lambda n: (n, 0, 0, 0)),
            scratch_shapes=[
                pltpu.VMEM((tb, H + 6, W + 6), jnp.float32),           # padded max map
                pltpu.VMEM((tb, H + 6, W + 6), jnp.float32),           # padded mean map
                pltpu.VMEM((tb, H + 6, W), jnp.float32),               # dx-shifted staging
            ],
        ),
        compiler_params=pltpu.CompilerParams(
            dimension_semantics=("parallel",),
            vmem_limit_bytes=vmem_limit,
        ),
    )(w_folded, b_folded, x_nchw)

    return out


def _reference(x, conv_weight, bn_gamma, bn_beta, bn_mean, bn_var, bn_eps=1e-5):
    """Pure-JAX reference mirroring the PyTorch forward (eval-mode BN)."""
    cmax = jnp.max(x, axis=1, keepdims=True)
    cmean = jnp.mean(x, axis=1, keepdims=True)
    pooled = jnp.concatenate([cmax, cmean], axis=1)                  # (N, 2, H, W)
    y = lax.conv_general_dilated(
        pooled, conv_weight, window_strides=(1, 1),
        padding=((3, 3), (3, 3)),
        dimension_numbers=("NCHW", "OIHW", "NCHW"))
    g = bn_gamma.reshape(1, -1, 1, 1)
    b = bn_beta.reshape(1, -1, 1, 1)
    m = bn_mean.reshape(1, -1, 1, 1)
    v = bn_var.reshape(1, -1, 1, 1)
    y = (y - m) / jnp.sqrt(v + bn_eps) * g + b
    return x * jax.nn.sigmoid(y)


if __name__ == "__main__":
    N, C, H, W = 2, 4, 16, 16

    key = jax.random.PRNGKey(0)
    kx, kw, kg, kb, km, kv = jax.random.split(key, 6)
    x = jax.random.normal(kx, (N, C, H, W), dtype=jnp.float32)
    conv_w = jax.random.normal(kw, (1, 2, 7, 7), dtype=jnp.float32) * 0.1
    bn_gamma = 1.0 + 0.1 * jax.random.normal(kg, (1,), dtype=jnp.float32)
    bn_beta = 0.1 * jax.random.normal(kb, (1,), dtype=jnp.float32)
    bn_mean = 0.1 * jax.random.normal(km, (1,), dtype=jnp.float32)
    bn_var = jax.nn.softplus(jax.random.normal(kv, (1,), dtype=jnp.float32)) + 0.5

    out = spatial_gate(x, conv_w, bn_gamma, bn_beta, bn_mean, bn_var)
    out = jax.block_until_ready(out)

    ref = jax.block_until_ready(
        _reference(x, conv_w, bn_gamma, bn_beta, bn_mean, bn_var))

    assert out.shape == (N, C, H, W)
    max_err = jnp.max(jnp.abs(out - ref))
    assert jnp.allclose(out, ref, atol=1e-4, rtol=1e-4), f"max abs err = {max_err}"

    print("KERNEL_OK")
</pallas_src>

<mosaic_0001>
module attributes {stable_mosaic.version = 11 : i64} {
  func.func @_spatial_gate_kernel(%arg0: i32, %arg1: memref<98xf32, #tpu.memory_space<smem>>, %arg2: memref<1xf32, #tpu.memory_space<smem>>, %arg3: memref<2x4x16x16xf32, #tpu.memory_space<vmem>>, %arg4: memref<2x4x16x16xf32, #tpu.memory_space<vmem>>, %arg5: memref<2x22x22xf32, #tpu.memory_space<vmem>>, %arg6: memref<2x22x22xf32, #tpu.memory_space<vmem>>, %arg7: memref<2x22x16xf32, #tpu.memory_space<vmem>>) attributes {dimension_semantics = [#tpu.dimension_semantics<parallel>], iteration_bounds = array<i64: 1>, scalar_prefetch = 0 : i64, scratch_operands = 3 : i64, tpu.core_type = #tpu.core_type<tc>, window_params = [{transform_indices = @transform_0, window_bounds = array<i64: 98>}, {transform_indices = @transform_1, window_bounds = array<i64: 1>}, {transform_indices = @transform_2, window_bounds = array<i64: 2, 4, 16, 16>}, {transform_indices = @transform_3, window_bounds = array<i64: 2, 4, 16, 16>}]} {
    %cst = arith.constant 0.000000e+00 : f32
    %0 = vector.broadcast %cst : f32 to vector<2x3x22xf32>
    %cst_0 = arith.constant 0.000000e+00 : f32
    %1 = vector.broadcast %cst_0 : f32 to vector<2x22x3xf32>
    %c0 = arith.constant 0 : index
    %c0_1 = arith.constant 0 : index
    %c0_2 = arith.constant 0 : index
    %2 = vector.load %arg5[%c0, %c0_1, %c0_2] : memref<2x22x22xf32, #tpu.memory_space<vmem>>, vector<2x3x22xf32>
    tpu.vector_store %arg5[%c0, %c0_1, %c0_2], %0 {strides = array<i32>} : memref<2x22x22xf32, #tpu.memory_space<vmem>>, vector<2x3x22xf32>,
    %c0_3 = arith.constant 0 : index
    %c19 = arith.constant 19 : index
    %c0_4 = arith.constant 0 : index
    %3 = vector.load %arg5[%c0_3, %c19, %c0_4] : memref<2x22x22xf32, #tpu.memory_space<vmem>>, vector<2x3x22xf32>
    tpu.vector_store %arg5[%c0_3, %c19, %c0_4], %0 {strides = array<i32>} : memref<2x22x22xf32, #tpu.memory_space<vmem>>, vector<2x3x22xf32>,
    %c0_5 = arith.constant 0 : index
    %c0_6 = arith.constant 0 : index
    %c0_7 = arith.constant 0 : index
    %4 = vector.load %arg5[%c0_5, %c0_6, %c0_7] : memref<2x22x22xf32, #tpu.memory_space<vmem>>, vector<2x22x3xf32>
    tpu.vector_store %arg5[%c0_5, %c0_6, %c0_7], %1 {strides = array<i32>} : memref<2x22x22xf32, #tpu.memory_space<vmem>>, vector<2x22x3xf32>,
    %c0_8 = arith.constant 0 : index
    %c0_9 = arith.constant 0 : index
    %c19_10 = arith.constant 19 : index
    %5 = vector.load %arg5[%c0_8, %c0_9, %c19_10] : memref<2x22x22xf32, #tpu.memory_space<vmem>>, vector<2x22x3xf32>
    tpu.vector_store %arg5[%c0_8, %c0_9, %c19_10], %1 {strides = array<i32>} : memref<2x22x22xf32, #tpu.memory_space<vmem>>, vector<2x22x3xf32>,
    %c0_11 = arith.constant 0 : index
    %c0_12 = arith.constant 0 : index
    %c0_13 = arith.constant 0 : index
    %6 = vector.load %arg6[%c0_11, %c0_12, %c0_13] : memref<2x22x22xf32, #tpu.memory_space<vmem>>, vector<2x3x22xf32>
    tpu.vector_store %arg6[%c0_11, %c0_12, %c0_13], %0 {strides = array<i32>} : memref<2x22x22xf32, #tpu.memory_space<vmem>>, vector<2x3x22xf32>,
    %c0_14 = arith.constant 0 : index
    %c19_15 = arith.constant 19 : index
    %c0_16 = arith.constant 0 : index
    %7 = vector.load %arg6[%c0_14, %c19_15, %c0_16] : memref<2x22x22xf32, #tpu.memory_space<vmem>>, vector<2x3x22xf32>
    tpu.vector_store %arg6[%c0_14, %c19_15, %c0_16], %0 {strides = array<i32>} : memref<2x22x22xf32, #tpu.memory_space<vmem>>, vector<2x3x22xf32>,
    %c0_17 = arith.constant 0 : index
    %c0_18 = arith.constant 0 : index
    %c0_19 = arith.constant 0 : index
    %8 = vector.load %arg6[%c0_17, %c0_18, %c0_19] : memref<2x22x22xf32, #tpu.memory_space<vmem>>, vector<2x22x3xf32>
    tpu.vector_store %arg6[%c0_17, %c0_18, %c0_19], %1 {strides = array<i32>} : memref<2x22x22xf32, #tpu.memory_space<vmem>>, vector<2x22x3xf32>,
    %c0_20 = arith.constant 0 : index
    %c0_21 = arith.constant 0 : index
    %c19_22 = arith.constant 19 : index
    %9 = vector.load %arg6[%c0_20, %c0_21, %c19_22] : memref<2x22x22xf32, #tpu.memory_space<vmem>>, vector<2x22x3xf32>
    tpu.vector_store %arg6[%c0_20, %c0_21, %c19_22], %1 {strides = array<i32>} : memref<2x22x22xf32, #tpu.memory_space<vmem>>, vector<2x22x3xf32>,
    %c0_23 = arith.constant 0 : index
    %c0_24 = arith.constant 0 : index
    %c0_25 = arith.constant 0 : index
    %c0_26 = arith.constant 0 : index
    %10 = vector.load %arg3[%c0_23, %c0_24, %c0_25, %c0_26] : memref<2x4x16x16xf32, #tpu.memory_space<vmem>>, vector<2x4x16x16xf32>
    %cst_27 = arith.constant dense<0xFF800000> : vector<2x16x16xf32>
    %11 = vector.multi_reduction <maximumf>, %10, %cst_27 [1] : vector<2x4x16x16xf32> to vector<2x16x16xf32>
    %c0_28 = arith.constant 0 : index
    %c3 = arith.constant 3 : index
    %c3_29 = arith.constant 3 : index
    %12 = vector.load %arg5[%c0_28, %c3, %c3_29] : memref<2x22x22xf32, #tpu.memory_space<vmem>>, vector<2x16x16xf32>
    tpu.vector_store %arg5[%c0_28, %c3, %c3_29], %11 {strides = array<i32>} : memref<2x22x22xf32, #tpu.memory_space<vmem>>, vector<2x16x16xf32>,
    %cst_30 = arith.constant dense<0.000000e+00> : vector<2x16x16xf32>
    %13 = vector.multi_reduction <add>, %10, %cst_30 [1] : vector<2x4x16x16xf32> to vector<2x16x16xf32>
    %cst_31 = arith.constant 2.500000e-01 : f32
    %14 = vector.broadcast %cst_31 : f32 to vector<2x16x16xf32>
    %15 = arith.mulf %13, %14 : vector<2x16x16xf32>
    %c0_32 = arith.constant 0 : index
    %c3_33 = arith.constant 3 : index
    %c3_34 = arith.constant 3 : index
    %16 = vector.load %arg6[%c0_32, %c3_33, %c3_34] : memref<2x22x22xf32, #tpu.memory_space<vmem>>, vector<2x16x16xf32>
    tpu.vector_store %arg6[%c0_32, %c3_33, %c3_34], %15 {strides = array<i32>} : memref<2x22x22xf32, #tpu.memory_space<vmem>>, vector<2x16x16xf32>,
    %c0_35 = arith.constant 0 : index
    %17 = memref.load %arg2[%c0_35] : memref<1xf32, #tpu.memory_space<smem>>
    %18 = vector.broadcast %17 : f32 to vector<2x16x16xf32>
    %c0_36 = arith.constant 0 : index
    %c0_37 = arith.constant 0 : index
    %c0_38 = arith.constant 0 : index
    %19 = vector.load %arg5[%c0_36, %c0_37, %c0_38] : memref<2x22x22xf32, #tpu.memory_space<vmem>>, vector<2x22x16xf32>
    %c0_39 = arith.constant 0 : index
    %c0_40 = arith.constant 0 : index
    %c0_41 = arith.constant 0 : index
    %20 = vector.load %arg7[%c0_39, %c0_40, %c0_41] : memref<2x22x16xf32, #tpu.memory_space<vmem>>, vector<2x22x16xf32>
    tpu.vector_store %arg7[%c0_39, %c0_40, %c0_41], %19 {strides = array<i32>} : memref<2x22x16xf32, #tpu.memory_space<vmem>>, vector<2x22x16xf32>,
    %c0_42 = arith.constant 0 : index
    %c0_43 = arith.constant 0 : index
    %c0_44 = arith.constant 0 : index
    %21 = vector.load %arg7[%c0_42, %c0_43, %c0_44] : memref<2x22x16xf32, #tpu.memory_space<vmem>>, vector<2x16x16xf32>
    %c0_45 = arith.constant 0 : index
    %22 = memref.load %arg1[%c0_45] : memref<98xf32, #tpu.memory_space<smem>>
    %23 = vector.broadcast %22 : f32 to vector<2x16x16xf32>
    %24 = arith.mulf %21, %23 : vector<2x16x16xf32>
    %25 = arith.addf %18, %24 : vector<2x16x16xf32>
    %c0_46 = arith.constant 0 : index
    %c1 = arith.constant 1 : index
    %c0_47 = arith.constant 0 : index
    %26 = vector.load %arg7[%c0_46, %c1, %c0_47] : memref<2x22x16xf32, #tpu.memory_space<vmem>>, vector<2x16x16xf32>
    %c7 = arith.constant 7 : index
    %27 = memref.load %arg1[%c7] : memref<98xf32, #tpu.memory_space<smem>>
    %28 = vector.broadcast %27 : f32 to vector<2x16x16xf32>
    %29 = arith.mulf %26, %28 : vector<2x16x16xf32>
    %30 = arith.addf %25, %29 : vector<2x16x16xf32>
    %c0_48 = arith.constant 0 : index
    %c2 = arith.constant 2 : index
    %c0_49 = arith.constant 0 : index
    %31 = vector.load %arg7[%c0_48, %c2, %c0_49] : memref<2x22x16xf32, #tpu.memory_space<vmem>>, vector<2x16x16xf32>
    %c14 = arith.constant 14 : index
    %32 = memref.load %arg1[%c14] : memref<98xf32, #tpu.memory_space<smem>>
    %33 = vector.broadcast %32 : f32 to vector<2x16x16xf32>
    %34 = arith.mulf %31, %33 : vector<2x16x16xf32>
    %35 = arith.addf %30, %34 : vector<2x16x16xf32>
    %c0_50 = arith.constant 0 : index
    %c3_51 = arith.constant 3 : index
    %c0_52 = arith.constant 0 : index
    %36 = vector.load %arg7[%c0_50, %c3_51, %c0_52] : memref<2x22x16xf32, #tpu.memory_space<vmem>>, vector<2x16x16xf32>
    %c21 = arith.constant 21 : index
    %37 = memref.load %arg1[%c21] : memref<98xf32, #tpu.memory_space<smem>>
    %38 = vector.broadcast %37 : f32 to vector<2x16x16xf32>
    %39 = arith.mulf %36, %38 : vector<2x16x16xf32>
    %40 = arith.addf %35, %39 : vector<2x16x16xf32>
    %c0_53 = arith.constant 0 : index
    %c4 = arith.constant 4 : index
    %c0_54 = arith.constant 0 : index
    %41 = vector.load %arg7[%c0_53, %c4, %c0_54] : memref<2x22x16xf32, #tpu.memory_space<vmem>>, vector<2x16x16xf32>
    %c28 = arith.constant 28 : index
    %42 = memref.load %arg1[%c28] : memref<98xf32, #tpu.memory_space<smem>>
    %43 = vector.broadcast %42 : f32 to vector<2x16x16xf32>
    %44 = arith.mulf %41, %43 : vector<2x16x16xf32>
    %45 = arith.addf %40, %44 : vector<2x16x16xf32>
    %c0_55 = arith.constant 0 : index
    %c5 = arith.constant 5 : index
    %c0_56 = arith.constant 0 : index
    %46 = vector.load %arg7[%c0_55, %c5, %c0_56] : memref<2x22x16xf32, #tpu.memory_space<vmem>>, vector<2x16x16xf32>
    %c35 = arith.constant 35 : index
    %47 = memref.load %arg1[%c35] : memref<98xf32, #tpu.memory_space<smem>>
    %48 = vector.broadcast %47 : f32 to vector<2x16x16xf32>
    %49 = arith.mulf %46, %48 : vector<2x16x16xf32>
    %50 = arith.addf %45, %49 : vector<2x16x16xf32>
    %c0_57 = arith.constant 0 : index
    %c6 = arith.constant 6 : index
    %c0_58 = arith.constant 0 : index
    %51 = vector.load %arg7[%c0_57, %c6, %c0_58] : memref<2x22x16xf32, #tpu.memory_space<vmem>>, vector<2x16x16xf32>
    %c42 = arith.constant 42 : index
    %52 = memref.load %arg1[%c42] : memref<98xf32, #tpu.memory_space<smem>>
    %53 = vector.broadcast %52 : f32 to vector<2x16x16xf32>
    %54 = arith.mulf %51, %53 : vector<2x16x16xf32>
    %55 = arith.addf %50, %54 : vector<2x16x16xf32>
    %c0_59 = arith.constant 0 : index
    %c0_60 = arith.constant 0 : index
    %c1_61 = arith.constant 1 : index
    %56 = vector.load %arg5[%c0_59, %c0_60, %c1_61] : memref<2x22x22xf32, #tpu.memory_space<vmem>>, vector<2x22x16xf32>
    %c0_62 = arith.constant 0 : index
    %c0_63 = arith.constant 0 : index
    %c0_64 = arith.constant 0 : index
    %57 = vector.load %arg7[%c0_62, %c0_63, %c0_64] : memref<2x22x16xf32, #tpu.memory_space<vmem>>, vector<2x22x16xf32>
    tpu.vector_store %arg7[%c0_62, %c0_63, %c0_64], %56 {strides = array<i32>} : memref<2x22x16xf32, #tpu.memory_space<vmem>>, vector<2x22x16xf32>,
    %c0_65 = arith.constant 0 : index
    %c0_66 = arith.constant 0 : index
    %c0_67 = arith.constant 0 : index
    %58 = vector.load %arg7[%c0_65, %c0_66, %c0_67] : memref<2x22x16xf32, #tpu.memory_space<vmem>>, vector<2x16x16xf32>
    %c1_68 = arith.constant 1 : index
    %59 = memref.load %arg1[%c1_68] : memref<98xf32, #tpu.memory_space<smem>>
    %60 = vector.broadcast %59 : f32 to vector<2x16x16xf32>
    %61 = arith.mulf %58, %60 : vector<2x16x16xf32>
    %62 = arith.addf %55, %61 : vector<2x16x16xf32>
    %c0_69 = arith.constant 0 : index
    %c1_70 = arith.constant 1 : index
    %c0_71 = arith.constant 0 : index
    %63 = vector.load %arg7[%c0_69, %c1_70, %c0_71] : memref<2x22x16xf32, #tpu.memory_space<vmem>>, vector<2x16x16xf32>
    %c8 = arith.constant 8 : index
    %64 = memref.load %arg1[%c8] : memref<98xf32, #tpu.memory_space<smem>>
    %65 = vector.broadcast %64 : f32 to vector<2x16x16xf32>
    %66 = arith.mulf %63, %65 : vector<2x16x16xf32>
    %67 = arith.addf %62, %66 : vector<2x16x16xf32>
    %c0_72 = arith.constant 0 : index
    %c2_73 = arith.constant 2 : index
    %c0_74 = arith.constant 0 : index
    %68 = vector.load %arg7[%c0_72, %c2_73, %c0_74] : memref<2x22x16xf32, #tpu.memory_space<vmem>>, vector<2x16x16xf32>
    %c15 = arith.constant 15 : index
    %69 = memref.load %arg1[%c15] : memref<98xf32, #tpu.memory_space<smem>>
    %70 = vector.broadcast %69 : f32 to vector<2x16x16xf32>
    %71 = arith.mulf %68, %70 : vector<2x16x16xf32>
    %72 = arith.addf %67, %71 : vector<2x16x16xf32>
    %c0_75 = arith.constant 0 : index
    %c3_76 = arith.constant 3 : index
    %c0_77 = arith.constant 0 : index
    %73 = vector.load %arg7[%c0_75, %c3_76, %c0_77] : memref<2x22x16xf32, #tpu.memory_space<vmem>>, vector<2x16x16xf32>
    %c22 = arith.constant 22 : index
    %74 = memref.load %arg1[%c22] : memref<98xf32, #tpu.memory_space<smem>>
    %75 = vector.broadcast %74 : f32 to vector<2x16x16xf32>
    %76 = arith.mulf %73, %75 : vector<2x16x16xf32>
    %77 = arith.addf %72, %76 : vector<2x16x16xf32>
    %c0_78 = arith.constant 0 : index
    %c4_79 = arith.constant 4 : index
    %c0_80 = arith.constant 0 : index
    %78 = vector.load %arg7[%c0_78, %c4_79, %c0_80] : memref<2x22x16xf32, #tpu.memory_space<vmem>>, vector<2x16x16xf32>
    %c29 = arith.constant 29 : index
    %79 = memref.load %arg1[%c29] : memref<98xf32, #tpu.memory_space<smem>>
    %80 = vector.broadcast %79 : f32 to vector<2x16x16xf32>
    %81 = arith.mulf %78, %80 : vector<2x16x16xf32>
    %82 = arith.addf %77, %81 : vector<2x16x16xf32>
    %c0_81 = arith.constant 0 : index
    %c5_82 = arith.constant 5 : index
    %c0_83 = arith.constant 0 : index
    %83 = vector.load %arg7[%c0_81, %c5_82, %c0_83] : memref<2x22x16xf32, #tpu.memory_space<vmem>>, vector<2x16x16xf32>
    %c36 = arith.constant 36 : index
    %84 = memref.load %arg1[%c36] : memref<98xf32, #tpu.memory_space<smem>>
    %85 = vector.broadcast %84 : f32 to vector<2x16x16xf32>
    %86 = arith.mulf %83, %85 : vector<2x16x16xf32>
    %87 = arith.addf %82, %86 : vector<2x16x16xf32>
    %c0_84 = arith.constant 0 : index
    %c6_85 = arith.constant 6 : index
    %c0_86 = arith.constant 0 : index
    %88 = vector.load %arg7[%c0_84, %c6_85, %c0_86] : memref<2x22x16xf32, #tpu.memory_space<vmem>>, vector<2x16x16xf32>
    %c43 = arith.constant 43 : index
    %89 = memref.load %arg1[%c43] : memref<98xf32, #tpu.memory_space<smem>>
    %90 = vector.broadcast %89 : f32 to vector<2x16x16xf32>
    %91 = arith.mulf %88, %90 : vector<2x16x16xf32>
    %92 = arith.addf %87, %91 : vector<2x16x16xf32>
    %c0_87 = arith.constant 0 : index
    %c0_88 = arith.constant 0 : index
    %c2_89 = arith.constant 2 : index
    %93 = vector.load %arg5[%c0_87, %c0_88, %c2_89] : memref<2x22x22xf32, #tpu.memory_space<vmem>>, vector<2x22x16xf32>
    %c0_90 = arith.constant 0 : index
    %c0_91 = arith.constant 0 : index
    %c0_92 = arith.constant 0 : index
    %94 = vector.load %arg7[%c0_90, %c0_91, %c0_92] : memref<2x22x16xf32, #tpu.memory_space<vmem>>, vector<2x22x16xf32>
    tpu.vector_store %arg7[%c0_90, %c0_91, %c0_92], %93 {strides = array<i32>} : memref<2x22x16xf32, #tpu.memory_space<vmem>>, vector<2x22x16xf32>,
    %c0_93 = arith.constant 0 : index
    %c0_94 = arith.constant 0 : index
    %c0_95 = arith.constant 0 : index
    %95 = vector.load %arg7[%c0_93, %c0_94, %c0_95] : memref<2x22x16xf32, #tpu.memory_space<vmem>>, vector<2x16x16xf32>
    %c2_96 = arith.constant 2 : index
    %96 = memref.load %arg1[%c2_96] : memref<98xf32, #tpu.memory_space<smem>>
    %97 = vector.broadcast %96 : f32 to vector<2x16x16xf32>
    %98 = arith.mulf %95, %97 : vector<2x16x16xf32>
    %99 = arith.addf %92, %98 : vector<2x16x16xf32>
    %c0_97 = arith.constant 0 : index
    %c1_98 = arith.constant 1 : index
    %c0_99 = arith.constant 0 : index
    %100 = vector.load %arg7[%c0_97, %c1_98, %c0_99] : memref<2x22x16xf32, #tpu.memory_space<vmem>>, vector<2x16x16xf32>
    %c9 = arith.constant 9 : index
    %101 = memref.load %arg1[%c9] : memref<98xf32, #tpu.memory_space<smem>>
    %102 = vector.broadcast %101 : f32 to vector<2x16x16xf32>
    %103 = arith.mulf %100, %102 : vector<2x16x16xf32>
    %104 = arith.addf %99, %103 : vector<2x16x16xf32>
    %c0_100 = arith.constant 0 : index
    %c2_101 = arith.constant 2 : index
    %c0_102 = arith.constant 0 : index
    %105 = vector.load %arg7[%c0_100, %c2_101, %c0_102] : memref<2x22x16xf32, #tpu.memory_space<vmem>>, vector<2x16x16xf32>
    %c16 = arith.constant 16 : index
    %106 = memref.load %arg1[%c16] : memref<98xf32, #tpu.memory_space<smem>>
    %107 = vector.broadcast %106 : f32 to vector<2x16x16xf32>
    %108 = arith.mulf %105, %107 : vector<2x16x16xf32>
    %109 = arith.addf %104, %108 : vector<2x16x16xf32>
    %c0_103 = arith.constant 0 : index
    %c3_104 = arith.constant 3 : index
    %c0_105 = arith.constant 0 : index
    %110 = vector.load %arg7[%c0_103, %c3_104, %c0_105] : memref<2x22x16xf32, #tpu.memory_space<vmem>>, vector<2x16x16xf32>
    %c23 = arith.constant 23 : index
    %111 = memref.load %arg1[%c23] : memref<98xf32, #tpu.memory_space<smem>>
    %112 = vector.broadcast %111 : f32 to vector<2x16x16xf32>
    %113 = arith.mulf %110, %112 : vector<2x16x16xf32>
    %114 = arith.addf %109, %113 : vector<2x16x16xf32>
    %c0_106 = arith.constant 0 : index
    %c4_107 = arith.constant 4 : index
    %c0_108 = arith.constant 0 : index
    %115 = vector.load %arg7[%c0_106, %c4_107, %c0_108] : memref<2x22x16xf32, #tpu.memory_space<vmem>>, vector<2x16x16xf32>
    %c30 = arith.constant 30 : index
    %116 = memref.load %arg1[%c30] : memref<98xf32, #tpu.memory_space<smem>>
    %117 = vector.broadcast %116 : f32 to vector<2x16x16xf32>
    %118 = arith.mulf %115, %117 : vector<2x16x16xf32>
    %119 = arith.addf %114, %118 : vector<2x16x16xf32>
    %c0_109 = arith.constant 0 : index
    %c5_110 = arith.constant 5 : index
    %c0_111 = arith.constant 0 : index
    %120 = vector.load %arg7[%c0_109, %c5_110, %c0_111] : memref<2x22x16xf32, #tpu.memory_space<vmem>>, vector<2x16x16xf32>
    %c37 = arith.constant 37 : index
    %121 = memref.load %arg1[%c37] : memref<98xf32, #tpu.memory_space<smem>>
    %122 = vector.broadcast %121 : f32 to vector<2x16x16xf32>
    %123 = arith.mulf %120, %122 : vector<2x16x16xf32>
    %124 = arith.addf %119, %123 : vector<2x16x16xf32>
    %c0_112 = arith.constant 0 : index
    %c6_113 = arith.constant 6 : index
    %c0_114 = arith.constant 0 : index
    %125 = vector.load %arg7[%c0_112, %c6_113, %c0_114] : memref<2x22x16xf32, #tpu.memory_space<vmem>>, vector<2x16x16xf32>
    %c44 = arith.constant 44 : index
    %126 = memref.load %arg1[%c44] : memref<98xf32, #tpu.memory_space<smem>>
    %127 = vector.broadcast %126 : f32 to vector<2x16x16xf32>
    %128 = arith.mulf %125, %127 : vector<2x16x16xf32>
    %129 = arith.addf %124, %128 : vector<2x16x16xf32>
    %c0_115 = arith.constant 0 : index
    %c0_116 = arith.constant 0 : index
    %c3_117 = arith.constant 3 : index
    %130 = vector.load %arg5[%c0_115, %c0_116, %c3_117] : memref<2x22x22xf32, #tpu.memory_space<vmem>>, vector<2x22x16xf32>
    %c0_118 = arith.constant 0 : index
    %c0_119 = arith.constant 0 : index
    %c0_120 = arith.constant 0 : index
    %131 = vector.load %arg7[%c0_118, %c0_119, %c0_120] : memref<2x22x16xf32, #tpu.memory_space<vmem>>, vector<2x22x16xf32>
    tpu.vector_store %arg7[%c0_118, %c0_119, %c0_120], %130 {strides = array<i32>} : memref<2x22x16xf32, #tpu.memory_space<vmem>>, vector<2x22x16xf32>,
    %c0_121 = arith.constant 0 : index
    %c0_122 = arith.constant 0 : index
    %c0_123 = arith.constant 0 : index
    %132 = vector.load %arg7[%c0_121, %c0_122, %c0_123] : memref<2x22x16xf32, #tpu.memory_space<vmem>>, vector<2x16x16xf32>
    %c3_124 = arith.constant 3 : index
    %133 = memref.load %arg1[%c3_124] : memref<98xf32, #tpu.memory_space<smem>>
    %134 = vector.broadcast %133 : f32 to vector<2x16x16xf32>
    %135 = arith.mulf %132, %134 : vector<2x16x16xf32>
    %136 = arith.addf %129, %135 : vector<2x16x16xf32>
    %c0_125 = arith.constant 0 : index
    %c1_126 = arith.constant 1 : index
    %c0_127 = arith.constant 0 : index
    %137 = vector.load %arg7[%c0_125, %c1_126, %c0_127] : memref<2x22x16xf32, #tpu.memory_space<vmem>>, vector<2x16x16xf32>
    %c10 = arith.constant 10 : index
    %138 = memref.load %arg1[%c10] : memref<98xf32, #tpu.memory_space<smem>>
    %139 = vector.broadcast %138 : f32 to vector<2x16x16xf32>
    %140 = arith.mulf %137, %139 : vector<2x16x16xf32>
    %141 = arith.addf %136, %140 : vector<2x16x16xf32>
    %c0_128 = arith.constant 0 : index
    %c2_129 = arith.constant 2 : index
    %c0_130 = arith.constant 0 : index
    %142 = vector.load %arg7[%c0_128, %c2_129, %c0_130] : memref<2x22x16xf32, #tpu.memory_space<vmem>>, vector<2x16x16xf32>
    %c17 = arith.constant 17 : index
    %143 = memref.load %arg1[%c17] : memref<98xf32, #tpu.memory_space<smem>>
    %144 = vector.broadcast %143 : f32 to vector<2x16x16xf32>
    %145 = arith.mulf %142, %144 : vector<2x16x16xf32>
    %146 = arith.addf %141, %145 : vector<2x16x16xf32>
    %c0_131 = arith.constant 0 : index
    %c3_132 = arith.constant 3 : index
    %c0_133 = arith.constant 0 : index
    %147 = vector.load %arg7[%c0_131, %c3_132, %c0_133] : memref<2x22x16xf32, #tpu.memory_space<vmem>>, vector<2x16x16xf32>
    %c24 = arith.constant 24 : index
    %148 = memref.load %arg1[%c24] : memref<98xf32, #tpu.memory_space<smem>>
    %149 = vector.broadcast %148 : f32 to vector<2x16x16xf32>
    %150 = arith.mulf %147, %149 : vector<2x16x16xf32>
    %151 = arith.addf %146, %150 : vector<2x16x16xf32>
    %c0_134 = arith.constant 0 : index
    %c4_135 = arith.constant 4 : index
    %c0_136 = arith.constant 0 : index
    %152 = vector.load %arg7[%c0_134, %c4_135, %c0_136] : memref<2x22x16xf32, #tpu.memory_space<vmem>>, vector<2x16x16xf32>
    %c31 = arith.constant 31 : index
    %153 = memref.load %arg1[%c31] : memref<98xf32, #tpu.memory_space<smem>>
    %154 = vector.broadcast %153 : f32 to vector<2x16x16xf32>
    %155 = arith.mulf %152, %154 : vector<2x16x16xf32>
    %156 = arith.addf %151, %155 : vector<2x16x16xf32>
    %c0_137 = arith.constant 0 : index
    %c5_138 = arith.constant 5 : index
    %c0_139 = arith.constant 0 : index
    %157 = vector.load %arg7[%c0_137, %c5_138, %c0_139] : memref<2x22x16xf32, #tpu.memory_space<vmem>>, vector<2x16x16xf32>
    %c38 = arith.constant 38 : index
    %158 = memref.load %arg1[%c38] : memref<98xf32, #tpu.memory_space<smem>>
    %159 = vector.broadcast %158 : f32 to vector<2x16x16xf32>
    %160 = arith.mulf %157, %159 : vector<2x16x16xf32>
    %161 = arith.addf %156, %160 : vector<2x16x16xf32>
    %c0_140 = arith.constant 0 : index
    %c6_141 = arith.constant 6 : index
    %c0_142 = arith.constant 0 : index
    %162 = vector.load %arg7[%c0_140, %c6_141, %c0_142] : memref<2x22x16xf32, #tpu.memory_space<vmem>>, vector<2x16x16xf32>
    %c45 = arith.constant 45 : index
    %163 = memref.load %arg1[%c45] : memref<98xf32, #tpu.memory_space<smem>>
    %164 = vector.broadcast %163 : f32 to vector<2x16x16xf32>
    %165 = arith.mulf %162, %164 : vector<2x16x16xf32>
    %166 = arith.addf %161, %165 : vector<2x16x16xf32>
    %c0_143 = arith.constant 0 : index
    %c0_144 = arith.constant 0 : index
    %c4_145 = arith.constant 4 : index
    %167 = vector.load %arg5[%c0_143, %c0_144, %c4_145] : memref<2x22x22xf32, #tpu.memory_space<vmem>>, vector<2x22x16xf32>
    %c0_146 = arith.constant 0 : index
    %c0_147 = arith.constant 0 : index
    %c0_148 = arith.constant 0 : index
    %168 = vector.load %arg7[%c0_146, %c0_147, %c0_148] : memref<2x22x16xf32, #tpu.memory_space<vmem>>, vector<2x22x16xf32>
    tpu.vector_store %arg7[%c0_146, %c0_147, %c0_148], %167 {strides = array<i32>} : memref<2x22x16xf32, #tpu.memory_space<vmem>>, vector<2x22x16xf32>,
    %c0_149 = arith.constant 0 : index
    %c0_150 = arith.constant 0 : index
    %c0_151 = arith.constant 0 : index
    %169 = vector.load %arg7[%c0_149, %c0_150, %c0_151] : memref<2x22x16xf32, #tpu.memory_space<vmem>>, vector<2x16x16xf32>
    %c4_152 = arith.constant 4 : index
    %170 = memref.load %arg1[%c4_152] : memref<98xf32, #tpu.memory_space<smem>>
    %171 = vector.broadcast %170 : f32 to vector<2x16x16xf32>
    %172 = arith.mulf %169, %171 : vector<2x16x16xf32>
    %173 = arith.addf %166, %172 : vector<2x16x16xf32>
    %c0_153 = arith.constant 0 : index
    %c1_154 = arith.constant 1 : index
    %c0_155 = arith.constant 0 : index
    %174 = vector.load %arg7[%c0_153, %c1_154, %c0_155] : memref<2x22x16xf32, #tpu.memory_space<vmem>>, vector<2x16x16xf32>
    %c11 = arith.constant 11 : index
    %175 = memref.load %arg1[%c11] : memref<98xf32, #tpu.memory_space<smem>>
    %176 = vector.broadcast %175 : f32 to vector<2x16x16xf32>
    %177 = arith.mulf %174, %176 : vector<2x16x16xf32>
    %178 = arith.addf %173, %177 : vector<2x16x16xf32>
    %c0_156 = arith.constant 0 : index
    %c2_157 = arith.constant 2 : index
    %c0_158 = arith.constant 0 : index
    %179 = vector.load %arg7[%c0_156, %c2_157, %c0_158] : memref<2x22x16xf32, #tpu.memory_space<vmem>>, vector<2x16x16xf32>
    %c18 = arith.constant 18 : index
    %180 = memref.load %arg1[%c18] : memref<98xf32, #tpu.memory_space<smem>>
    %181 = vector.broadcast %180 : f32 to vector<2x16x16xf32>
    %182 = arith.mulf %179, %181 : vector<2x16x16xf32>
    %183 = arith.addf %178, %182 : vector<2x16x16xf32>
    %c0_159 = arith.constant 0 : index
    %c3_160 = arith.constant 3 : index
    %c0_161 = arith.constant 0 : index
    %184 = vector.load %arg7[%c0_159, %c3_160, %c0_161] : memref<2x22x16xf32, #tpu.memory_space<vmem>>, vector<2x16x16xf32>
    %c25 = arith.constant 25 : index
    %185 = memref.load %arg1[%c25] : memref<98xf32, #tpu.memory_space<smem>>
    %186 = vector.broadcast %185 : f32 to vector<2x16x16xf32>
    %187 = arith.mulf %184, %186 : vector<2x16x16xf32>
    %188 = arith.addf %183, %187 : vector<2x16x16xf32>
    %c0_162 = arith.constant 0 : index
    %c4_163 = arith.constant 4 : index
    %c0_164 = arith.constant 0 : index
    %189 = vector.load %arg7[%c0_162, %c4_163, %c0_164] : memref<2x22x16xf32, #tpu.memory_space<vmem>>, vector<2x16x16xf32>
    %c32 = arith.constant 32 : index
    %190 = memref.load %arg1[%c32] : memref<98xf32, #tpu.memory_space<smem>>
    %191 = vector.broadcast %190 : f32 to vector<2x16x16xf32>
    %192 = arith.mulf %189, %191 : vector<2x16x16xf32>
    %193 = arith.addf %188, %192 : vector<2x16x16xf32>
    %c0_165 = arith.constant 0 : index
    %c5_166 = arith.constant 5 : index
    %c0_167 = arith.constant 0 : index
    %194 = vector.load %arg7[%c0_165, %c5_166, %c0_167] : memref<2x22x16xf32, #tpu.memory_space<vmem>>, vector<2x16x16xf32>
    %c39 = arith.constant 39 : index
    %195 = memref.load %arg1[%c39] : memref<98xf32, #tpu.memory_space<smem>>
    %196 = vector.broadcast %195 : f32 to vector<2x16x16xf32>
    %197 = arith.mulf %194, %196 : vector<2x16x16xf32>
    %198 = arith.addf %193, %197 : vector<2x16x16xf32>
    %c0_168 = arith.constant 0 : index
    %c6_169 = arith.constant 6 : index
    %c0_170 = arith.constant 0 : index
    %199 = vector.load %arg7[%c0_168, %c6_169, %c0_170] : memref<2x22x16xf32, #tpu.memory_space<vmem>>, vector<2x16x16xf32>
    %c46 = arith.constant 46 : index
    %200 = memref.load %arg1[%c46] : memref<98xf32, #tpu.memory_space<smem>>
    %201 = vector.broadcast %200 : f32 to vector<2x16x16xf32>
    %202 = arith.mulf %199, %201 : vector<2x16x16xf32>
    %203 = arith.addf %198, %202 : vector<2x16x16xf32>
    %c0_171 = arith.constant 0 : index
    %c0_172 = arith.constant 0 : index
    %c5_173 = arith.constant 5 : index
    %204 = vector.load %arg5[%c0_171, %c0_172, %c5_173] : memref<2x22x22xf32, #tpu.memory_space<vmem>>, vector<2x22x16xf32>
    %c0_174 = arith.constant 0 : index
    %c0_175 = arith.constant 0 : index
    %c0_176 = arith.constant 0 : index
    %205 = vector.load %arg7[%c0_174, %c0_175, %c0_176] : memref<2x22x16xf32, #tpu.memory_space<vmem>>, vector<2x22x16xf32>
    tpu.vector_store %arg7[%c0_174, %c0_175, %c0_176], %204 {strides = array<i32>} : memref<2x22x16xf32, #tpu.memory_space<vmem>>, vector<2x22x16xf32>,
    %c0_177 = arith.constant 0 : index
    %c0_178 = arith.constant 0 : index
    %c0_179 = arith.constant 0 : index
    %206 = vector.load %arg7[%c0_177, %c0_178, %c0_179] : memref<2x22x16xf32, #tpu.memory_space<vmem>>, vector<2x16x16xf32>
    %c5_180 = arith.constant 5 : index
    %207 = memref.load %arg1[%c5_180] : memref<98xf32, #tpu.memory_space<smem>>
    %208 = vector.broadcast %207 : f32 to vector<2x16x16xf32>
    %209 = arith.mulf %206, %208 : vector<2x16x16xf32>
    %210 = arith.addf %203, %209 : vector<2x16x16xf32>
    %c0_181 = arith.constant 0 : index
    %c1_182 = arith.constant 1 : index
    %c0_183 = arith.constant 0 : index
    %211 = vector.load %arg7[%c0_181, %c1_182, %c0_183] : memref<2x22x16xf32, #tpu.memory_space<vmem>>, vector<2x16x16xf32>
    %c12 = arith.constant 12 : index
    %212 = memref.load %arg1[%c12] : memref<98xf32, #tpu.memory_space<smem>>
    %213 = vector.broadcast %212 : f32 to vector<2x16x16xf32>
    %214 = arith.mulf %211, %213 : vector<2x16x16xf32>
    %215 = arith.addf %210, %214 : vector<2x16x16xf32>
    %c0_184 = arith.constant 0 : index
    %c2_185 = arith.constant 2 : index
    %c0_186 = arith.constant 0 : index
    %216 = vector.load %arg7[%c0_184, %c2_185, %c0_186] : memref<2x22x16xf32, #tpu.memory_space<vmem>>, vector<2x16x16xf32>
    %c19_187 = arith.constant 19 : index
    %217 = memref.load %arg1[%c19_187] : memref<98xf32, #tpu.memory_space<smem>>
    %218 = vector.broadcast %217 : f32 to vector<2x16x16xf32>
    %219 = arith.mulf %216, %218 : vector<2x16x16xf32>
    %220 = arith.addf %215, %219 : vector<2x16x16xf32>
    %c0_188 = arith.constant 0 : index
    %c3_189 = arith.constant 3 : index
    %c0_190 = arith.constant 0 : index
    %221 = vector.load %arg7[%c0_188, %c3_189, %c0_190] : memref<2x22x16xf32, #tpu.memory_space<vmem>>, vector<2x16x16xf32>
    %c26 = arith.constant 26 : index
    %222 = memref.load %arg1[%c26] : memref<98xf32, #tpu.memory_space<smem>>
    %223 = vector.broadcast %222 : f32 to vector<2x16x16xf32>
    %224 = arith.mulf %221, %223 : vector<2x16x16xf32>
    %225 = arith.addf %220, %224 : vector<2x16x16xf32>
    %c0_191 = arith.constant 0 : index
    %c4_192 = arith.constant 4 : index
    %c0_193 = arith.constant 0 : index
    %226 = vector.load %arg7[%c0_191, %c4_192, %c0_193] : memref<2x22x16xf32, #tpu.memory_space<vmem>>, vector<2x16x16xf32>
    %c33 = arith.constant 33 : index
    %227 = memref.load %arg1[%c33] : memref<98xf32, #tpu.memory_space<smem>>
    %228 = vector.broadcast %227 : f32 to vector<2x16x16xf32>
    %229 = arith.mulf %226, %228 : vector<2x16x16xf32>
    %230 = arith.addf %225, %229 : vector<2x16x16xf32>
    %c0_194 = arith.constant 0 : index
    %c5_195 = arith.constant 5 : index
    %c0_196 = arith.constant 0 : index
    %231 = vector.load %arg7[%c0_194, %c5_195, %c0_196] : memref<2x22x16xf32, #tpu.memory_space<vmem>>, vector<2x16x16xf32>
    %c40 = arith.constant 40 : index
    %232 = memref.load %arg1[%c40] : memref<98xf32, #tpu.memory_space<smem>>
    %233 = vector.broadcast %232 : f32 to vector<2x16x16xf32>
    %234 = arith.mulf %231, %233 : vector<2x16x16xf32>
    %235 = arith.addf %230, %234 : vector<2x16x16xf32>
    %c0_197 = arith.constant 0 : index
    %c6_198 = arith.constant 6 : index
    %c0_199 = arith.constant 0 : index
    %236 = vector.load %arg7[%c0_197, %c6_198, %c0_199] : memref<2x22x16xf32, #tpu.memory_space<vmem>>, vector<2x16x16xf32>
    %c47 = arith.constant 47 : index
    %237 = memref.load %arg1[%c47] : memref<98xf32, #tpu.memory_space<smem>>
    %238 = vector.broadcast %237 : f32 to vector<2x16x16xf32>
    %239 = arith.mulf %236, %238 : vector<2x16x16xf32>
    %240 = arith.addf %235, %239 : vector<2x16x16xf32>
    %c0_200 = arith.constant 0 : index
    %c0_201 = arith.constant 0 : index
    %c6_202 = arith.constant 6 : index
    %241 = vector.load %arg5[%c0_200, %c0_201, %c6_202] : memref<2x22x22xf32, #tpu.memory_space<vmem>>, vector<2x22x16xf32>
    %c0_203 = arith.constant 0 : index
    %c0_204 = arith.constant 0 : index
    %c0_205 = arith.constant 0 : index
    %242 = vector.load %arg7[%c0_203, %c0_204, %c0_205] : memref<2x22x16xf32, #tpu.memory_space<vmem>>, vector<2x22x16xf32>
    tpu.vector_store %arg7[%c0_203, %c0_204, %c0_205], %241 {strides = array<i32>} : memref<2x22x16xf32, #tpu.memory_space<vmem>>, vector<2x22x16xf32>,
    %c0_206 = arith.constant 0 : index
    %c0_207 = arith.constant 0 : index
    %c0_208 = arith.constant 0 : index
    %243 = vector.load %arg7[%c0_206, %c0_207, %c0_208] : memref<2x22x16xf32, #tpu.memory_space<vmem>>, vector<2x16x16xf32>
    %c6_209 = arith.constant 6 : index
    %244 = memref.load %arg1[%c6_209] : memref<98xf32, #tpu.memory_space<smem>>
    %245 = vector.broadcast %244 : f32 to vector<2x16x16xf32>
    %246 = arith.mulf %243, %245 : vector<2x16x16xf32>
    %247 = arith.addf %240, %246 : vector<2x16x16xf32>
    %c0_210 = arith.constant 0 : index
    %c1_211 = arith.constant 1 : index
    %c0_212 = arith.constant 0 : index
    %248 = vector.load %arg7[%c0_210, %c1_211, %c0_212] : memref<2x22x16xf32, #tpu.memory_space<vmem>>, vector<2x16x16xf32>
    %c13 = arith.constant 13 : index
    %249 = memref.load %arg1[%c13] : memref<98xf32, #tpu.memory_space<smem>>
    %250 = vector.broadcast %249 : f32 to vector<2x16x16xf32>
    %251 = arith.mulf %248, %250 : vector<2x16x16xf32>
    %252 = arith.addf %247, %251 : vector<2x16x16xf32>
    %c0_213 = arith.constant 0 : index
    %c2_214 = arith.constant 2 : index
    %c0_215 = arith.constant 0 : index
    %253 = vector.load %arg7[%c0_213, %c2_214, %c0_215] : memref<2x22x16xf32, #tpu.memory_space<vmem>>, vector<2x16x16xf32>
    %c20 = arith.constant 20 : index
    %254 = memref.load %arg1[%c20] : memref<98xf32, #tpu.memory_space<smem>>
    %255 = vector.broadcast %254 : f32 to vector<2x16x16xf32>
    %256 = arith.mulf %253, %255 : vector<2x16x16xf32>
    %257 = arith.addf %252, %256 : vector<2x16x16xf32>
    %c0_216 = arith.constant 0 : index
    %c3_217 = arith.constant 3 : index
    %c0_218 = arith.constant 0 : index
    %258 = vector.load %arg7[%c0_216, %c3_217, %c0_218] : memref<2x22x16xf32, #tpu.memory_space<vmem>>, vector<2x16x16xf32>
    %c27 = arith.constant 27 : index
    %259 = memref.load %arg1[%c27] : memref<98xf32, #tpu.memory_space<smem>>
    %260 = vector.broadcast %259 : f32 to vector<2x16x16xf32>
    %261 = arith.mulf %258, %260 : vector<2x16x16xf32>
    %262 = arith.addf %257, %261 : vector<2x16x16xf32>
    %c0_219 = arith.constant 0 : index
    %c4_220 = arith.constant 4 : index
    %c0_221 = arith.constant 0 : index
    %263 = vector.load %arg7[%c0_219, %c4_220, %c0_221] : memref<2x22x16xf32, #tpu.memory_space<vmem>>, vector<2x16x16xf32>
    %c34 = arith.constant 34 : index
    %264 = memref.load %arg1[%c34] : memref<98xf32, #tpu.memory_space<smem>>
    %265 = vector.broadcast %264 : f32 to vector<2x16x16xf32>
    %266 = arith.mulf %263, %265 : vector<2x16x16xf32>
    %267 = arith.addf %262, %266 : vector<2x16x16xf32>
    %c0_222 = arith.constant 0 : index
    %c5_223 = arith.constant 5 : index
    %c0_224 = arith.constant 0 : index
    %268 = vector.load %arg7[%c0_222, %c5_223, %c0_224] : memref<2x22x16xf32, #tpu.memory_space<vmem>>, vector<2x16x16xf32>
    %c41 = arith.constant 41 : index
    %269 = memref.load %arg1[%c41] : memref<98xf32, #tpu.memory_space<smem>>
    %270 = vector.broadcast %269 : f32 to vector<2x16x16xf32>
    %271 = arith.mulf %268, %270 : vector<2x16x16xf32>
    %272 = arith.addf %267, %271 : vector<2x16x16xf32>
    %c0_225 = arith.constant 0 : index
    %c6_226 = arith.constant 6 : index
    %c0_227 = arith.constant 0 : index
    %273 = vector.load %arg7[%c0_225, %c6_226, %c0_227] : memref<2x22x16xf32, #tpu.memory_space<vmem>>, vector<2x16x16xf32>
    %c48 = arith.constant 48 : index
    %274 = memref.load %arg1[%c48] : memref<98xf32, #tpu.memory_space<smem>>
    %275 = vector.broadcast %274 : f32 to vector<2x16x16xf32>
    %276 = arith.mulf %273, %275 : vector<2x16x16xf32>
    %277 = arith.addf %272, %276 : vector<2x16x16xf32>
    %c0_228 = arith.constant 0 : index
    %c0_229 = arith.constant 0 : index
    %c0_230 = arith.constant 0 : index
    %278 = vector.load %arg6[%c0_228, %c0_229, %c0_230] : memref<2x22x22xf32, #tpu.memory_space<vmem>>, vector<2x22x16xf32>
    %c0_231 = arith.constant 0 : index
    %c0_232 = arith.constant 0 : index
    %c0_233 = arith.constant 0 : index
    %279 = vector.load %arg7[%c0_231, %c0_232, %c0_233] : memref<2x22x16xf32, #tpu.memory_space<vmem>>, vector<2x22x16xf32>
    tpu.vector_store %arg7[%c0_231, %c0_232, %c0_233], %278 {strides = array<i32>} : memref<2x22x16xf32, #tpu.memory_space<vmem>>, vector<2x22x16xf32>,
    %c0_234 = arith.constant 0 : index
    %c0_235 = arith.constant 0 : index
    %c0_236 = arith.constant 0 : index
    %280 = vector.load %arg7[%c0_234, %c0_235, %c0_236] : memref<2x22x16xf32, #tpu.memory_space<vmem>>, vector<2x16x16xf32>
    %c49 = arith.constant 49 : index
    %281 = memref.load %arg1[%c49] : memref<98xf32, #tpu.memory_space<smem>>
    %282 = vector.broadcast %281 : f32 to vector<2x16x16xf32>
    %283 = arith.mulf %280, %282 : vector<2x16x16xf32>
    %284 = arith.addf %277, %283 : vector<2x16x16xf32>
    %c0_237 = arith.constant 0 : index
    %c1_238 = arith.constant 1 : index
    %c0_239 = arith.constant 0 : index
    %285 = vector.load %arg7[%c0_237, %c1_238, %c0_239] : memref<2x22x16xf32, #tpu.memory_space<vmem>>, vector<2x16x16xf32>
    %c56 = arith.constant 56 : index
    %286 = memref.load %arg1[%c56] : memref<98xf32, #tpu.memory_space<smem>>
    %287 = vector.broadcast %286 : f32 to vector<2x16x16xf32>
    %288 = arith.mulf %285, %287 : vector<2x16x16xf32>
    %289 = arith.addf %284, %288 : vector<2x16x16xf32>
    %c0_240 = arith.constant 0 : index
    %c2_241 = arith.constant 2 : index
    %c0_242 = arith.constant 0 : index
    %290 = vector.load %arg7[%c0_240, %c2_241, %c0_242] : memref<2x22x16xf32, #tpu.memory_space<vmem>>, vector<2x16x16xf32>
    %c63 = arith.constant 63 : index
    %291 = memref.load %arg1[%c63] : memref<98xf32, #tpu.memory_space<smem>>
    %292 = vector.broadcast %291 : f32 to vector<2x16x16xf32>
    %293 = arith.mulf %290, %292 : vector<2x16x16xf32>
    %294 = arith.addf %289, %293 : vector<2x16x16xf32>
    %c0_243 = arith.constant 0 : index
    %c3_244 = arith.constant 3 : index
    %c0_245 = arith.constant 0 : index
    %295 = vector.load %arg7[%c0_243, %c3_244, %c0_245] : memref<2x22x16xf32, #tpu.memory_space<vmem>>, vector<2x16x16xf32>
    %c70 = arith.constant 70 : index
    %296 = memref.load %arg1[%c70] : memref<98xf32, #tpu.memory_space<smem>>
    %297 = vector.broadcast %296 : f32 to vector<2x16x16xf32>
    %298 = arith.mulf %295, %297 : vector<2x16x16xf32>
    %299 = arith.addf %294, %298 : vector<2x16x16xf32>
    %c0_246 = arith.constant 0 : index
    %c4_247 = arith.constant 4 : index
    %c0_248 = arith.constant 0 : index
    %300 = vector.load %arg7[%c0_246, %c4_247, %c0_248] : memref<2x22x16xf32, #tpu.memory_space<vmem>>, vector<2x16x16xf32>
    %c77 = arith.constant 77 : index
    %301 = memref.load %arg1[%c77] : memref<98xf32, #tpu.memory_space<smem>>
    %302 = vector.broadcast %301 : f32 to vector<2x16x16xf32>
    %303 = arith.mulf %300, %302 : vector<2x16x16xf32>
    %304 = arith.addf %299, %303 : vector<2x16x16xf32>
    %c0_249 = arith.constant 0 : index
    %c5_250 = arith.constant 5 : index
    %c0_251 = arith.constant 0 : index
    %305 = vector.load %arg7[%c0_249, %c5_250, %c0_251] : memref<2x22x16xf32, #tpu.memory_space<vmem>>, vector<2x16x16xf32>
    %c84 = arith.constant 84 : index
    %306 = memref.load %arg1[%c84] : memref<98xf32, #tpu.memory_space<smem>>
    %307 = vector.broadcast %306 : f32 to vector<2x16x16xf32>
    %308 = arith.mulf %305, %307 : vector<2x16x16xf32>
    %309 = arith.addf %304, %308 : vector<2x16x16xf32>
    %c0_252 = arith.constant 0 : index
    %c6_253 = arith.constant 6 : index
    %c0_254 = arith.constant 0 : index
    %310 = vector.load %arg7[%c0_252, %c6_253, %c0_254] : memref<2x22x16xf32, #tpu.memory_space<vmem>>, vector<2x16x16xf32>
    %c91 = arith.constant 91 : index
    %311 = memref.load %arg1[%c91] : memref<98xf32, #tpu.memory_space<smem>>
    %312 = vector.broadcast %311 : f32 to vector<2x16x16xf32>
    %313 = arith.mulf %310, %312 : vector<2x16x16xf32>
    %314 = arith.addf %309, %313 : vector<2x16x16xf32>
    %c0_255 = arith.constant 0 : index
    %c0_256 = arith.constant 0 : index
    %c1_257 = arith.constant 1 : index
    %315 = vector.load %arg6[%c0_255, %c0_256, %c1_257] : memref<2x22x22xf32, #tpu.memory_space<vmem>>, vector<2x22x16xf32>
    %c0_258 = arith.constant 0 : index
    %c0_259 = arith.constant 0 : index
    %c0_260 = arith.constant 0 : index
    %316 = vector.load %arg7[%c0_258, %c0_259, %c0_260] : memref<2x22x16xf32, #tpu.memory_space<vmem>>, vector<2x22x16xf32>
    tpu.vector_store %arg7[%c0_258, %c0_259, %c0_260], %315 {strides = array<i32>} : memref<2x22x16xf32, #tpu.memory_space<vmem>>, vector<2x22x16xf32>,
    %c0_261 = arith.constant 0 : index
    %c0_262 = arith.constant 0 : index
    %c0_263 = arith.constant 0 : index
    %317 = vector.load %arg7[%c0_261, %c0_262, %c0_263] : memref<2x22x16xf32, #tpu.memory_space<vmem>>, vector<2x16x16xf32>
    %c50 = arith.constant 50 : index
    %318 = memref.load %arg1[%c50] : memref<98xf32, #tpu.memory_space<smem>>
    %319 = vector.broadcast %318 : f32 to vector<2x16x16xf32>
    %320 = arith.mulf %317, %319 : vector<2x16x16xf32>
    %321 = arith.addf %314, %320 : vector<2x16x16xf32>
    %c0_264 = arith.constant 0 : index
    %c1_265 = arith.constant 1 : index
    %c0_266 = arith.constant 0 : index
    %322 = vector.load %arg7[%c0_264, %c1_265, %c0_266] : memref<2x22x16xf32, #tpu.memory_space<vmem>>, vector<2x16x16xf32>
    %c57 = arith.constant 57 : index
    %323 = memref.load %arg1[%c57] : memref<98xf32, #tpu.memory_space<smem>>
    %324 = vector.broadcast %323 : f32 to vector<2x16x16xf32>
    %325 = arith.mulf %322, %324 : vector<2x16x16xf32>
    %326 = arith.addf %321, %325 : vector<2x16x16xf32>
    %c0_267 = arith.constant 0 : index
    %c2_268 = arith.constant 2 : index
    %c0_269 = arith.constant 0 : index
    %327 = vector.load %arg7[%c0_267, %c2_268, %c0_269] : memref<2x22x16xf32, #tpu.memory_space<vmem>>, vector<2x16x16xf32>
    %c64 = arith.constant 64 : index
    %328 = memref.load %arg1[%c64] : memref<98xf32, #tpu.memory_space<smem>>
    %329 = vector.broadcast %328 : f32 to vector<2x16x16xf32>
    %330 = arith.mulf %327, %329 : vector<2x16x16xf32>
    %331 = arith.addf %326, %330 : vector<2x16x16xf32>
    %c0_270 = arith.constant 0 : index
    %c3_271 = arith.constant 3 : index
    %c0_272 = arith.constant 0 : index
    %332 = vector.load %arg7[%c0_270, %c3_271, %c0_272] : memref<2x22x16xf32, #tpu.memory_space<vmem>>, vector<2x16x16xf32>
    %c71 = arith.constant 71 : index
    %333 = memref.load %arg1[%c71] : memref<98xf32, #tpu.memory_space<smem>>
    %334 = vector.broadcast %333 : f32 to vector<2x16x16xf32>
    %335 = arith.mulf %332, %334 : vector<2x16x16xf32>
    %336 = arith.addf %331, %335 : vector<2x16x16xf32>
    %c0_273 = arith.constant 0 : index
    %c4_274 = arith.constant 4 : index
    %c0_275 = arith.constant 0 : index
    %337 = vector.load %arg7[%c0_273, %c4_274, %c0_275] : memref<2x22x16xf32, #tpu.memory_space<vmem>>, vector<2x16x16xf32>
    %c78 = arith.constant 78 : index
    %338 = memref.load %arg1[%c78] : memref<98xf32, #tpu.memory_space<smem>>
    %339 = vector.broadcast %338 : f32 to vector<2x16x16xf32>
    %340 = arith.mulf %337, %339 : vector<2x16x16xf32>
    %341 = arith.addf %336, %340 : vector<2x16x16xf32>
    %c0_276 = arith.constant 0 : index
    %c5_277 = arith.constant 5 : index
    %c0_278 = arith.constant 0 : index
    %342 = vector.load %arg7[%c0_276, %c5_277, %c0_278] : memref<2x22x16xf32, #tpu.memory_space<vmem>>, vector<2x16x16xf32>
    %c85 = arith.constant 85 : index
    %343 = memref.load %arg1[%c85] : memref<98xf32, #tpu.memory_space<smem>>
    %344 = vector.broadcast %343 : f32 to vector<2x16x16xf32>
    %345 = arith.mulf %342, %344 : vector<2x16x16xf32>
    %346 = arith.addf %341, %345 : vector<2x16x16xf32>
    %c0_279 = arith.constant 0 : index
    %c6_280 = arith.constant 6 : index
    %c0_281 = arith.constant 0 : index
    %347 = vector.load %arg7[%c0_279, %c6_280, %c0_281] : memref<2x22x16xf32, #tpu.memory_space<vmem>>, vector<2x16x16xf32>
    %c92 = arith.constant 92 : index
    %348 = memref.load %arg1[%c92] : memref<98xf32, #tpu.memory_space<smem>>
    %349 = vector.broadcast %348 : f32 to vector<2x16x16xf32>
    %350 = arith.mulf %347, %349 : vector<2x16x16xf32>
    %351 = arith.addf %346, %350 : vector<2x16x16xf32>
    %c0_282 = arith.constant 0 : index
    %c0_283 = arith.constant 0 : index
    %c2_284 = arith.constant 2 : index
    %352 = vector.load %arg6[%c0_282, %c0_283, %c2_284] : memref<2x22x22xf32, #tpu.memory_space<vmem>>, vector<2x22x16xf32>
    %c0_285 = arith.constant 0 : index
    %c0_286 = arith.constant 0 : index
    %c0_287 = arith.constant 0 : index
    %353 = vector.load %arg7[%c0_285, %c0_286, %c0_287] : memref<2x22x16xf32, #tpu.memory_space<vmem>>, vector<2x22x16xf32>
    tpu.vector_store %arg7[%c0_285, %c0_286, %c0_287], %352 {strides = array<i32>} : memref<2x22x16xf32, #tpu.memory_space<vmem>>, vector<2x22x16xf32>,
    %c0_288 = arith.constant 0 : index
    %c0_289 = arith.constant 0 : index
    %c0_290 = arith.constant 0 : index
    %354 = vector.load %arg7[%c0_288, %c0_289, %c0_290] : memref<2x22x16xf32, #tpu.memory_space<vmem>>, vector<2x16x16xf32>
    %c51 = arith.constant 51 : index
    %355 = memref.load %arg1[%c51] : memref<98xf32, #tpu.memory_space<smem>>
    %356 = vector.broadcast %355 : f32 to vector<2x16x16xf32>
    %357 = arith.mulf %354, %356 : vector<2x16x16xf32>
    %358 = arith.addf %351, %357 : vector<2x16x16xf32>
    %c0_291 = arith.constant 0 : index
    %c1_292 = arith.constant 1 : index
    %c0_293 = arith.constant 0 : index
    %359 = vector.load %arg7[%c0_291, %c1_292, %c0_293] : memref<2x22x16xf32, #tpu.memory_space<vmem>>, vector<2x16x16xf32>
    %c58 = arith.constant 58 : index
    %360 = memref.load %arg1[%c58] : memref<98xf32, #tpu.memory_space<smem>>
    %361 = vector.broadcast %360 : f32 to vector<2x16x16xf32>
    %362 = arith.mulf %359, %361 : vector<2x16x16xf32>
    %363 = arith.addf %358, %362 : vector<2x16x16xf32>
    %c0_294 = arith.constant 0 : index
    %c2_295 = arith.constant 2 : index
    %c0_296 = arith.constant 0 : index
    %364 = vector.load %arg7[%c0_294, %c2_295, %c0_296] : memref<2x22x16xf32, #tpu.memory_space<vmem>>, vector<2x16x16xf32>
    %c65 = arith.constant 65 : index
    %365 = memref.load %arg1[%c65] : memref<98xf32, #tpu.memory_space<smem>>
    %366 = vector.broadcast %365 : f32 to vector<2x16x16xf32>
    %367 = arith.mulf %364, %366 : vector<2x16x16xf32>
    %368 = arith.addf %363, %367 : vector<2x16x16xf32>
    %c0_297 = arith.constant 0 : index
    %c3_298 = arith.constant 3 : index
    %c0_299 = arith.constant 0 : index
    %369 = vector.load %arg7[%c0_297, %c3_298, %c0_299] : memref<2x22x16xf32, #tpu.memory_space<vmem>>, vector<2x16x16xf32>
    %c72 = arith.constant 72 : index
    %370 = memref.load %arg1[%c72] : memref<98xf32, #tpu.memory_space<smem>>
    %371 = vector.broadcast %370 : f32 to vector<2x16x16xf32>
    %372 = arith.mulf %369, %371 : vector<2x16x16xf32>
    %373 = arith.addf %368, %372 : vector<2x16x16xf32>
    %c0_300 = arith.constant 0 : index
    %c4_301 = arith.constant 4 : index
    %c0_302 = arith.constant 0 : index
    %374 = vector.load %arg7[%c0_300, %c4_301, %c0_302] : memref<2x22x16xf32, #tpu.memory_space<vmem>>, vector<2x16x16xf32>
    %c79 = arith.constant 79 : index
    %375 = memref.load %arg1[%c79] : memref<98xf32, #tpu.memory_space<smem>>
    %376 = vector.broadcast %375 : f32 to vector<2x16x16xf32>
    %377 = arith.mulf %374, %376 : vector<2x16x16xf32>
    %378 = arith.addf %373, %377 : vector<2x16x16xf32>
    %c0_303 = arith.constant 0 : index
    %c5_304 = arith.constant 5 : index
    %c0_305 = arith.constant 0 : index
    %379 = vector.load %arg7[%c0_303, %c5_304, %c0_305] : memref<2x22x16xf32, #tpu.memory_space<vmem>>, vector<2x16x16xf32>
    %c86 = arith.constant 86 : index
    %380 = memref.load %arg1[%c86] : memref<98xf32, #tpu.memory_space<smem>>
    %381 = vector.broadcast %380 : f32 to vector<2x16x16xf32>
    %382 = arith.mulf %379, %381 : vector<2x16x16xf32>
    %383 = arith.addf %378, %382 : vector<2x16x16xf32>
    %c0_306 = arith.constant 0 : index
    %c6_307 = arith.constant 6 : index
    %c0_308 = arith.constant 0 : index
    %384 = vector.load %arg7[%c0_306, %c6_307, %c0_308] : memref<2x22x16xf32, #tpu.memory_space<vmem>>, vector<2x16x16xf32>
    %c93 = arith.constant 93 : index
    %385 = memref.load %arg1[%c93] : memref<98xf32, #tpu.memory_space<smem>>
    %386 = vector.broadcast %385 : f32 to vector<2x16x16xf32>
    %387 = arith.mulf %384, %386 : vector<2x16x16xf32>
    %388 = arith.addf %383, %387 : vector<2x16x16xf32>
    %c0_309 = arith.constant 0 : index
    %c0_310 = arith.constant 0 : index
    %c3_311 = arith.constant 3 : index
    %389 = vector.load %arg6[%c0_309, %c0_310, %c3_311] : memref<2x22x22xf32, #tpu.memory_space<vmem>>, vector<2x22x16xf32>
    %c0_312 = arith.constant 0 : index
    %c0_313 = arith.constant 0 : index
    %c0_314 = arith.constant 0 : index
    %390 = vector.load %arg7[%c0_312, %c0_313, %c0_314] : memref<2x22x16xf32, #tpu.memory_space<vmem>>, vector<2x22x16xf32>
    tpu.vector_store %arg7[%c0_312, %c0_313, %c0_314], %389 {strides = array<i32>} : memref<2x22x16xf32, #tpu.memory_space<vmem>>, vector<2x22x16xf32>,
    %c0_315 = arith.constant 0 : index
    %c0_316 = arith.constant 0 : index
    %c0_317 = arith.constant 0 : index
    %391 = vector.load %arg7[%c0_315, %c0_316, %c0_317] : memref<2x22x16xf32, #tpu.memory_space<vmem>>, vector<2x16x16xf32>
    %c52 = arith.constant 52 : index
    %392 = memref.load %arg1[%c52] : memref<98xf32, #tpu.memory_space<smem>>
    %393 = vector.broadcast %392 : f32 to vector<2x16x16xf32>
    %394 = arith.mulf %391, %393 : vector<2x16x16xf32>
    %395 = arith.addf %388, %394 : vector<2x16x16xf32>
    %c0_318 = arith.constant 0 : index
    %c1_319 = arith.constant 1 : index
    %c0_320 = arith.constant 0 : index
    %396 = vector.load %arg7[%c0_318, %c1_319, %c0_320] : memref<2x22x16xf32, #tpu.memory_space<vmem>>, vector<2x16x16xf32>
    %c59 = arith.constant 59 : index
    %397 = memref.load %arg1[%c59] : memref<98xf32, #tpu.memory_space<smem>>
    %398 = vector.broadcast %397 : f32 to vector<2x16x16xf32>
    %399 = arith.mulf %396, %398 : vector<2x16x16xf32>
    %400 = arith.addf %395, %399 : vector<2x16x16xf32>
    %c0_321 = arith.constant 0 : index
    %c2_322 = arith.constant 2 : index
    %c0_323 = arith.constant 0 : index
    %401 = vector.load %arg7[%c0_321, %c2_322, %c0_323] : memref<2x22x16xf32, #tpu.memory_space<vmem>>, vector<2x16x16xf32>
    %c66 = arith.constant 66 : index
    %402 = memref.load %arg1[%c66] : memref<98xf32, #tpu.memory_space<smem>>
    %403 = vector.broadcast %402 : f32 to vector<2x16x16xf32>
    %404 = arith.mulf %401, %403 : vector<2x16x16xf32>
    %405 = arith.addf %400, %404 : vector<2x16x16xf32>
    %c0_324 = arith.constant 0 : index
    %c3_325 = arith.constant 3 : index
    %c0_326 = arith.constant 0 : index
    %406 = vector.load %arg7[%c0_324, %c3_325, %c0_326] : memref<2x22x16xf32, #tpu.memory_space<vmem>>, vector<2x16x16xf32>
    %c73 = arith.constant 73 : index
    %407 = memref.load %arg1[%c73] : memref<98xf32, #tpu.memory_space<smem>>
    %408 = vector.broadcast %407 : f32 to vector<2x16x16xf32>
    %409 = arith.mulf %406, %408 : vector<2x16x16xf32>
    %410 = arith.addf %405, %409 : vector<2x16x16xf32>
    %c0_327 = arith.constant 0 : index
    %c4_328 = arith.constant 4 : index
    %c0_329 = arith.constant 0 : index
    %411 = vector.load %arg7[%c0_327, %c4_328, %c0_329] : memref<2x22x16xf32, #tpu.memory_space<vmem>>, vector<2x16x16xf32>
    %c80 = arith.constant 80 : index
    %412 = memref.load %arg1[%c80] : memref<98xf32, #tpu.memory_space<smem>>
    %413 = vector.broadcast %412 : f32 to vector<2x16x16xf32>
    %414 = arith.mulf %411, %413 : vector<2x16x16xf32>
    %415 = arith.addf %410, %414 : vector<2x16x16xf32>
    %c0_330 = arith.constant 0 : index
    %c5_331 = arith.constant 5 : index
    %c0_332 = arith.constant 0 : index
    %416 = vector.load %arg7[%c0_330, %c5_331, %c0_332] : memref<2x22x16xf32, #tpu.memory_space<vmem>>, vector<2x16x16xf32>
    %c87 = arith.constant 87 : index
    %417 = memref.load %arg1[%c87] : memref<98xf32, #tpu.memory_space<smem>>
    %418 = vector.broadcast %417 : f32 to vector<2x16x16xf32>
    %419 = arith.mulf %416, %418 : vector<2x16x16xf32>
    %420 = arith.addf %415, %419 : vector<2x16x16xf32>
    %c0_333 = arith.constant 0 : index
    %c6_334 = arith.constant 6 : index
    %c0_335 = arith.constant 0 : index
    %421 = vector.load %arg7[%c0_333, %c6_334, %c0_335] : memref<2x22x16xf32, #tpu.memory_space<vmem>>, vector<2x16x16xf32>
    %c94 = arith.constant 94 : index
    %422 = memref.load %arg1[%c94] : memref<98xf32, #tpu.memory_space<smem>>
    %423 = vector.broadcast %422 : f32 to vector<2x16x16xf32>
    %424 = arith.mulf %421, %423 : vector<2x16x16xf32>
    %425 = arith.addf %420, %424 : vector<2x16x16xf32>
    %c0_336 = arith.constant 0 : index
    %c0_337 = arith.constant 0 : index
    %c4_338 = arith.constant 4 : index
    %426 = vector.load %arg6[%c0_336, %c0_337, %c4_338] : memref<2x22x22xf32, #tpu.memory_space<vmem>>, vector<2x22x16xf32>
    %c0_339 = arith.constant 0 : index
    %c0_340 = arith.constant 0 : index
    %c0_341 = arith.constant 0 : index
    %427 = vector.load %arg7[%c0_339, %c0_340, %c0_341] : memref<2x22x16xf32, #tpu.memory_space<vmem>>, vector<2x22x16xf32>
    tpu.vector_store %arg7[%c0_339, %c0_340, %c0_341], %426 {strides = array<i32>} : memref<2x22x16xf32, #tpu.memory_space<vmem>>, vector<2x22x16xf32>,
    %c0_342 = arith.constant 0 : index
    %c0_343 = arith.constant 0 : index
    %c0_344 = arith.constant 0 : index
    %428 = vector.load %arg7[%c0_342, %c0_343, %c0_344] : memref<2x22x16xf32, #tpu.memory_space<vmem>>, vector<2x16x16xf32>
    %c53 = arith.constant 53 : index
    %429 = memref.load %arg1[%c53] : memref<98xf32, #tpu.memory_space<smem>>
    %430 = vector.broadcast %429 : f32 to vector<2x16x16xf32>
    %431 = arith.mulf %428, %430 : vector<2x16x16xf32>
    %432 = arith.addf %425, %431 : vector<2x16x16xf32>
    %c0_345 = arith.constant 0 : index
    %c1_346 = arith.constant 1 : index
    %c0_347 = arith.constant 0 : index
    %433 = vector.load %arg7[%c0_345, %c1_346, %c0_347] : memref<2x22x16xf32, #tpu.memory_space<vmem>>, vector<2x16x16xf32>
    %c60 = arith.constant 60 : index
    %434 = memref.load %arg1[%c60] : memref<98xf32, #tpu.memory_space<smem>>
    %435 = vector.broadcast %434 : f32 to vector<2x16x16xf32>
    %436 = arith.mulf %433, %435 : vector<2x16x16xf32>
    %437 = arith.addf %432, %436 : vector<2x16x16xf32>
    %c0_348 = arith.constant 0 : index
    %c2_349 = arith.constant 2 : index
    %c0_350 = arith.constant 0 : index
    %438 = vector.load %arg7[%c0_348, %c2_349, %c0_350] : memref<2x22x16xf32, #tpu.memory_space<vmem>>, vector<2x16x16xf32>
    %c67 = arith.constant 67 : index
    %439 = memref.load %arg1[%c67] : memref<98xf32, #tpu.memory_space<smem>>
    %440 = vector.broadcast %439 : f32 to vector<2x16x16xf32>
    %441 = arith.mulf %438, %440 : vector<2x16x16xf32>
    %442 = arith.addf %437, %441 : vector<2x16x16xf32>
    %c0_351 = arith.constant 0 : index
    %c3_352 = arith.constant 3 : index
    %c0_353 = arith.constant 0 : index
    %443 = vector.load %arg7[%c0_351, %c3_352, %c0_353] : memref<2x22x16xf32, #tpu.memory_space<vmem>>, vector<2x16x16xf32>
    %c74 = arith.constant 74 : index
    %444 = memref.load %arg1[%c74] : memref<98xf32, #tpu.memory_space<smem>>
    %445 = vector.broadcast %444 : f32 to vector<2x16x16xf32>
    %446 = arith.mulf %443, %445 : vector<2x16x16xf32>
    %447 = arith.addf %442, %446 : vector<2x16x16xf32>
    %c0_354 = arith.constant 0 : index
    %c4_355 = arith.constant 4 : index
    %c0_356 = arith.constant 0 : index
    %448 = vector.load %arg7[%c0_354, %c4_355, %c0_356] : memref<2x22x16xf32, #tpu.memory_space<vmem>>, vector<2x16x16xf32>
    %c81 = arith.constant 81 : index
    %449 = memref.load %arg1[%c81] : memref<98xf32, #tpu.memory_space<smem>>
    %450 = vector.broadcast %449 : f32 to vector<2x16x16xf32>
    %451 = arith.mulf %448, %450 : vector<2x16x16xf32>
    %452 = arith.addf %447, %451 : vector<2x16x16xf32>
    %c0_357 = arith.constant 0 : index
    %c5_358 = arith.constant 5 : index
    %c0_359 = arith.constant 0 : index
    %453 = vector.load %arg7[%c0_357, %c5_358, %c0_359] : memref<2x22x16xf32, #tpu.memory_space<vmem>>, vector<2x16x16xf32>
    %c88 = arith.constant 88 : index
    %454 = memref.load %arg1[%c88] : memref<98xf32, #tpu.memory_space<smem>>
    %455 = vector.broadcast %454 : f32 to vector<2x16x16xf32>
    %456 = arith.mulf %453, %455 : vector<2x16x16xf32>
    %457 = arith.addf %452, %456 : vector<2x16x16xf32>
    %c0_360 = arith.constant 0 : index
    %c6_361 = arith.constant 6 : index
    %c0_362 = arith.constant 0 : index
    %458 = vector.load %arg7[%c0_360, %c6_361, %c0_362] : memref<2x22x16xf32, #tpu.memory_space<vmem>>, vector<2x16x16xf32>
    %c95 = arith.constant 95 : index
    %459 = memref.load %arg1[%c95] : memref<98xf32, #tpu.memory_space<smem>>
    %460 = vector.broadcast %459 : f32 to vector<2x16x16xf32>
    %461 = arith.mulf %458, %460 : vector<2x16x16xf32>
    %462 = arith.addf %457, %461 : vector<2x16x16xf32>
    %c0_363 = arith.constant 0 : index
    %c0_364 = arith.constant 0 : index
    %c5_365 = arith.constant 5 : index
    %463 = vector.load %arg6[%c0_363, %c0_364, %c5_365] : memref<2x22x22xf32, #tpu.memory_space<vmem>>, vector<2x22x16xf32>
    %c0_366 = arith.constant 0 : index
    %c0_367 = arith.constant 0 : index
    %c0_368 = arith.constant 0 : index
    %464 = vector.load %arg7[%c0_366, %c0_367, %c0_368] : memref<2x22x16xf32, #tpu.memory_space<vmem>>, vector<2x22x16xf32>
    tpu.vector_store %arg7[%c0_366, %c0_367, %c0_368], %463 {strides = array<i32>} : memref<2x22x16xf32, #tpu.memory_space<vmem>>, vector<2x22x16xf32>,
    %c0_369 = arith.constant 0 : index
    %c0_370 = arith.constant 0 : index
    %c0_371 = arith.constant 0 : index
    %465 = vector.load %arg7[%c0_369, %c0_370, %c0_371] : memref<2x22x16xf32, #tpu.memory_space<vmem>>, vector<2x16x16xf32>
    %c54 = arith.constant 54 : index
    %466 = memref.load %arg1[%c54] : memref<98xf32, #tpu.memory_space<smem>>
    %467 = vector.broadcast %466 : f32 to vector<2x16x16xf32>
    %468 = arith.mulf %465, %467 : vector<2x16x16xf32>
    %469 = arith.addf %462, %468 : vector<2x16x16xf32>
    %c0_372 = arith.constant 0 : index
    %c1_373 = arith.constant 1 : index
    %c0_374 = arith.constant 0 : index
    %470 = vector.load %arg7[%c0_372, %c1_373, %c0_374] : memref<2x22x16xf32, #tpu.memory_space<vmem>>, vector<2x16x16xf32>
    %c61 = arith.constant 61 : index
    %471 = memref.load %arg1[%c61] : memref<98xf32, #tpu.memory_space<smem>>
    %472 = vector.broadcast %471 : f32 to vector<2x16x16xf32>
    %473 = arith.mulf %470, %472 : vector<2x16x16xf32>
    %474 = arith.addf %469, %473 : vector<2x16x16xf32>
    %c0_375 = arith.constant 0 : index
    %c2_376 = arith.constant 2 : index
    %c0_377 = arith.constant 0 : index
    %475 = vector.load %arg7[%c0_375, %c2_376, %c0_377] : memref<2x22x16xf32, #tpu.memory_space<vmem>>, vector<2x16x16xf32>
    %c68 = arith.constant 68 : index
    %476 = memref.load %arg1[%c68] : memref<98xf32, #tpu.memory_space<smem>>
    %477 = vector.broadcast %476 : f32 to vector<2x16x16xf32>
    %478 = arith.mulf %475, %477 : vector<2x16x16xf32>
    %479 = arith.addf %474, %478 : vector<2x16x16xf32>
    %c0_378 = arith.constant 0 : index
    %c3_379 = arith.constant 3 : index
    %c0_380 = arith.constant 0 : index
    %480 = vector.load %arg7[%c0_378, %c3_379, %c0_380] : memref<2x22x16xf32, #tpu.memory_space<vmem>>, vector<2x16x16xf32>
    %c75 = arith.constant 75 : index
    %481 = memref.load %arg1[%c75] : memref<98xf32, #tpu.memory_space<smem>>
    %482 = vector.broadcast %481 : f32 to vector<2x16x16xf32>
    %483 = arith.mulf %480, %482 : vector<2x16x16xf32>
    %484 = arith.addf %479, %483 : vector<2x16x16xf32>
    %c0_381 = arith.constant 0 : index
    %c4_382 = arith.constant 4 : index
    %c0_383 = arith.constant 0 : index
    %485 = vector.load %arg7[%c0_381, %c4_382, %c0_383] : memref<2x22x16xf32, #tpu.memory_space<vmem>>, vector<2x16x16xf32>
    %c82 = arith.constant 82 : index
    %486 = memref.load %arg1[%c82] : memref<98xf32, #tpu.memory_space<smem>>
    %487 = vector.broadcast %486 : f32 to vector<2x16x16xf32>
    %488 = arith.mulf %485, %487 : vector<2x16x16xf32>
    %489 = arith.addf %484, %488 : vector<2x16x16xf32>
    %c0_384 = arith.constant 0 : index
    %c5_385 = arith.constant 5 : index
    %c0_386 = arith.constant 0 : index
    %490 = vector.load %arg7[%c0_384, %c5_385, %c0_386] : memref<2x22x16xf32, #tpu.memory_space<vmem>>, vector<2x16x16xf32>
    %c89 = arith.constant 89 : index
    %491 = memref.load %arg1[%c89] : memref<98xf32, #tpu.memory_space<smem>>
    %492 = vector.broadcast %491 : f32 to vector<2x16x16xf32>
    %493 = arith.mulf %490, %492 : vector<2x16x16xf32>
    %494 = arith.addf %489, %493 : vector<2x16x16xf32>
    %c0_387 = arith.constant 0 : index
    %c6_388 = arith.constant 6 : index
    %c0_389 = arith.constant 0 : index
    %495 = vector.load %arg7[%c0_387, %c6_388, %c0_389] : memref<2x22x16xf32, #tpu.memory_space<vmem>>, vector<2x16x16xf32>
    %c96 = arith.constant 96 : index
    %496 = memref.load %arg1[%c96] : memref<98xf32, #tpu.memory_space<smem>>
    %497 = vector.broadcast %496 : f32 to vector<2x16x16xf32>
    %498 = arith.mulf %495, %497 : vector<2x16x16xf32>
    %499 = arith.addf %494, %498 : vector<2x16x16xf32>
    %c0_390 = arith.constant 0 : index
    %c0_391 = arith.constant 0 : index
    %c6_392 = arith.constant 6 : index
    %500 = vector.load %arg6[%c0_390, %c0_391, %c6_392] : memref<2x22x22xf32, #tpu.memory_space<vmem>>, vector<2x22x16xf32>
    %c0_393 = arith.constant 0 : index
    %c0_394 = arith.constant 0 : index
    %c0_395 = arith.constant 0 : index
    %501 = vector.load %arg7[%c0_393, %c0_394, %c0_395] : memref<2x22x16xf32, #tpu.memory_space<vmem>>, vector<2x22x16xf32>
    tpu.vector_store %arg7[%c0_393, %c0_394, %c0_395], %500 {strides = array<i32>} : memref<2x22x16xf32, #tpu.memory_space<vmem>>, vector<2x22x16xf32>,
    %c0_396 = arith.constant 0 : index
    %c0_397 = arith.constant 0 : index
    %c0_398 = arith.constant 0 : index
    %502 = vector.load %arg7[%c0_396, %c0_397, %c0_398] : memref<2x22x16xf32, #tpu.memory_space<vmem>>, vector<2x16x16xf32>
    %c55 = arith.constant 55 : index
    %503 = memref.load %arg1[%c55] : memref<98xf32, #tpu.memory_space<smem>>
    %504 = vector.broadcast %503 : f32 to vector<2x16x16xf32>
    %505 = arith.mulf %502, %504 : vector<2x16x16xf32>
    %506 = arith.addf %499, %505 : vector<2x16x16xf32>
    %c0_399 = arith.constant 0 : index
    %c1_400 = arith.constant 1 : index
    %c0_401 = arith.constant 0 : index
    %507 = vector.load %arg7[%c0_399, %c1_400, %c0_401] : memref<2x22x16xf32, #tpu.memory_space<vmem>>, vector<2x16x16xf32>
    %c62 = arith.constant 62 : index
    %508 = memref.load %arg1[%c62] : memref<98xf32, #tpu.memory_space<smem>>
    %509 = vector.broadcast %508 : f32 to vector<2x16x16xf32>
    %510 = arith.mulf %507, %509 : vector<2x16x16xf32>
    %511 = arith.addf %506, %510 : vector<2x16x16xf32>
    %c0_402 = arith.constant 0 : index
    %c2_403 = arith.constant 2 : index
    %c0_404 = arith.constant 0 : index
    %512 = vector.load %arg7[%c0_402, %c2_403, %c0_404] : memref<2x22x16xf32, #tpu.memory_space<vmem>>, vector<2x16x16xf32>
    %c69 = arith.constant 69 : index
    %513 = memref.load %arg1[%c69] : memref<98xf32, #tpu.memory_space<smem>>
    %514 = vector.broadcast %513 : f32 to vector<2x16x16xf32>
    %515 = arith.mulf %512, %514 : vector<2x16x16xf32>
    %516 = arith.addf %511, %515 : vector<2x16x16xf32>
    %c0_405 = arith.constant 0 : index
    %c3_406 = arith.constant 3 : index
    %c0_407 = arith.constant 0 : index
    %517 = vector.load %arg7[%c0_405, %c3_406, %c0_407] : memref<2x22x16xf32, #tpu.memory_space<vmem>>, vector<2x16x16xf32>
    %c76 = arith.constant 76 : index
    %518 = memref.load %arg1[%c76] : memref<98xf32, #tpu.memory_space<smem>>
    %519 = vector.broadcast %518 : f32 to vector<2x16x16xf32>
    %520 = arith.mulf %517, %519 : vector<2x16x16xf32>
    %521 = arith.addf %516, %520 : vector<2x16x16xf32>
    %c0_408 = arith.constant 0 : index
    %c4_409 = arith.constant 4 : index
    %c0_410 = arith.constant 0 : index
    %522 = vector.load %arg7[%c0_408, %c4_409, %c0_410] : memref<2x22x16xf32, #tpu.memory_space<vmem>>, vector<2x16x16xf32>
    %c83 = arith.constant 83 : index
    %523 = memref.load %arg1[%c83] : memref<98xf32, #tpu.memory_space<smem>>
    %524 = vector.broadcast %523 : f32 to vector<2x16x16xf32>
    %525 = arith.mulf %522, %524 : vector<2x16x16xf32>
    %526 = arith.addf %521, %525 : vector<2x16x16xf32>
    %c0_411 = arith.constant 0 : index
    %c5_412 = arith.constant 5 : index
    %c0_413 = arith.constant 0 : index
    %527 = vector.load %arg7[%c0_411, %c5_412, %c0_413] : memref<2x22x16xf32, #tpu.memory_space<vmem>>, vector<2x16x16xf32>
    %c90 = arith.constant 90 : index
    %528 = memref.load %arg1[%c90] : memref<98xf32, #tpu.memory_space<smem>>
    %529 = vector.broadcast %528 : f32 to vector<2x16x16xf32>
    %530 = arith.mulf %527, %529 : vector<2x16x16xf32>
    %531 = arith.addf %526, %530 : vector<2x16x16xf32>
    %c0_414 = arith.constant 0 : index
    %c6_415 = arith.constant 6 : index
    %c0_416 = arith.constant 0 : index
    %532 = vector.load %arg7[%c0_414, %c6_415, %c0_416] : memref<2x22x16xf32, #tpu.memory_space<vmem>>, vector<2x16x16xf32>
    %c97 = arith.constant 97 : index
    %533 = memref.load %arg1[%c97] : memref<98xf32, #tpu.memory_space<smem>>
    %534 = vector.broadcast %533 : f32 to vector<2x16x16xf32>
    %535 = arith.mulf %532, %534 : vector<2x16x16xf32>
    %536 = arith.addf %531, %535 : vector<2x16x16xf32>
    %cst_417 = arith.constant 0.000000e+00 : f32
    %537 = vector.broadcast %cst_417 : f32 to vector<2x16x16xf32>
    %538 = arith.subf %537, %536 : vector<2x16x16xf32>
    %539 = math.exp %538 : vector<2x16x16xf32>
    %cst_418 = arith.constant 1.000000e+00 : f32
    %540 = vector.broadcast %cst_418 : f32 to vector<2x16x16xf32>
    %541 = arith.addf %540, %539 : vector<2x16x16xf32>
    %cst_419 = arith.constant 1.000000e+00 : f32
    %542 = vector.broadcast %cst_419 : f32 to vector<2x16x16xf32>
    %543 = arith.divf %542, %541 : vector<2x16x16xf32>
    %c0_420 = arith.constant 0 : index
    %c0_421 = arith.constant 0 : index
    %c0_422 = arith.constant 0 : index
    %c0_423 = arith.constant 0 : index
    %544 = vector.load %arg3[%c0_420, %c0_421, %c0_422, %c0_423] : memref<2x4x16x16xf32, #tpu.memory_space<vmem>>, vector<2x4x16x16xf32>
    %545 = vector.shape_cast %543 : vector<2x16x16xf32> to vector<2x1x16x16xf32>
    %546 = vector.broadcast %545 : vector<2x1x16x16xf32> to vector<2x4x16x16xf32>
    %547 = arith.mulf %544, %546 : vector<2x4x16x16xf32>
    %c0_424 = arith.constant 0 : index
    %c0_425 = arith.constant 0 : index
    %c0_426 = arith.constant 0 : index
    %c0_427 = arith.constant 0 : index
    %548 = vector.load %arg4[%c0_424, %c0_425, %c0_426, %c0_427] : memref<2x4x16x16xf32, #tpu.memory_space<vmem>>, vector<2x4x16x16xf32>
    tpu.vector_store %arg4[%c0_424, %c0_425, %c0_426, %c0_427], %547 {strides = array<i32>} : memref<2x4x16x16xf32, #tpu.memory_space<vmem>>, vector<2x4x16x16xf32>,
    return
  }
  func.func @transform_0(%arg0: i32) -> i32 {
    %c0_i32 = arith.constant 0 : i32
    %c0_i32_0 = arith.constant 0 : i32
    return %c0_i32 : i32
  }
  func.func @transform_1(%arg0: i32) -> i32 {
    %c0_i32 = arith.constant 0 : i32
    %c0_i32_0 = arith.constant 0 : i32
    return %c0_i32 : i32
  }
  func.func @transform_2(%arg0: i32) -> (i32, i32, i32, i32) {
    %c0_i32 = arith.constant 0 : i32
    %c0_i32_0 = arith.constant 0 : i32
    %c0_i32_1 = arith.constant 0 : i32
    %c0_i32_2 = arith.constant 0 : i32
    return %arg0, %c0_i32, %c0_i32_0, %c0_i32_1 : i32, i32, i32, i32
  }
  func.func @transform_3(%arg0: i32) -> (i32, i32, i32, i32) {
    %c0_i32 = arith.constant 0 : i32
    %c0_i32_0 = arith.constant 0 : i32
    %c0_i32_1 = arith.constant 0 : i32
    %c0_i32_2 = arith.constant 0 : i32
    return %arg0, %c0_i32, %c0_i32_0, %c0_i32_1 : i32, i32, i32, i32
  }
}

</mosaic_0001>

<bundles_post_ra>
// kernel: tpu_custom_call.1
= control target key start
LH: loop header
LB: loop body
LE: loop exit
PB: predicated region body
PF: predicated region fallthrough
CT: control target
= control target key end

     0   :  { %9 = vsyncpa [#allocation9], 0  ;;  %s3722_s0 = inlined_call_operand.vmem [shape: f32[98], index: 0, kind: input, shape index: {}]   ;;  %s3723_s1 = inlined_call_operand.<no memory space> [shape: f32[1], index: 1, kind: input, shape index: {}]   ;;  %s3724_s2 = inlined_call_operand.hbm [shape: f32[2,4,16,16], index: 2, kind: input, shape index: {}]   ;;  %s3725_s3 = inlined_call_operand.hbm [shape: f32[2,4,16,16], index: 3, kind: output, shape index: {}]  }
   0x1   :  { %10 = vsyncpa [#allocation7], 0 }
   0x2   :  { %11 = vsyncpa [#allocation8], 0  ;;  %s17_s14 = sshll.u32 %s3722_s0, 4  ;;  %s27_s17 = sshll.u32 %s3724_s2, 4  ;;  %s18_s14 = int_to_ptr.vmem [resolvable:$true] %s17_s14  ;;  %s28_s17 = int_to_ptr.hbm [resolvable:$true] %s27_s17 }
   0x3   :  { %s2367_s18 = smov [#allocation6]   ;;  %s2368_s19 = smov [#allocation10]  }
   0x4   :  { %20 = dma.vmem_to_smem %s18_s14, 16, %s2367_s18, [#allocation9]  }
   0x5   :  { %s29_s20 = sshll.u32 %s2368_s19, 4  ;;  %s2369_s21 = smov 128   ;;  %s30_s20 = int_to_ptr.vmem [resolvable:$true] %s29_s20 }
   0x6   :  { %s2370_s22 = smov 8  }
   0x7   :  { %35 = dma.hbm_to_vmem [thread:$0]  %s28_s17, 2048, %s30_s20, [#allocation7], %s2369_s21, %s2369_s21, %s2370_s22  }
   0x8   :  { %2361 = dma.done.wait [#allocation9], 16  }
   0x9   :  { %2362 = vsyncadd [#allocation9], 4294967280 }
   0xa   :  { %2363 = dma.done.wait [#allocation7], 2048  }
   0xb   :  { %2364 = vsyncadd [#allocation7], 4294965248 }
   0xc   :  { %44 = sfence }
   0xd   :  { %v90_v0 = vld [vmem:[#allocation10 + $0x40] sm:$0xff]  ;;  %v92_v1 = vld [vmem:[#allocation10 + $0x50] sm:$0xff]  ;;  %vm98_vm0 = vcmask 130048   ;;  %v91_v16 = vld [vmem:[#allocation10 + $0x48] sm:$0xff]  ;;  %s2371_s0 = smov 3   ;;  %vm45_vm1 = vcmask 174080  }
   0xe   :  { %v94_v2 = vld [vmem:[#allocation10 + $0x60] sm:$0xff]  ;;  %v96_v3 = vld [vmem:[#allocation10 + $0x70] sm:$0xff]  ;;  %v113_v4 = vsel %vm98_vm0, %v90_v0, -inf  ;;  %v114_v5 = vsel %vm98_vm0, %v92_v1, -inf  ;;  %v93_v17 = vld [vmem:[#allocation10 + $0x58] sm:$0xff]  ;;  %v162_v19 = vsel %vm98_vm0, %v90_v0, 0.0 }
   0xf   :  { %v116_v6 = vsel %vm98_vm0, %v94_v2, -inf  ;;  %v82_v7 = vld [vmem:[#allocation10] sm:$0xff]  ;;  %v115_v8 = vmax.f32 %v113_v4, %v114_v5  ;;  %v84_v9 = vld [vmem:[#allocation10 + $0x10] sm:$0xff]  ;;  %v118_v12 = vsel %vm98_vm0, %v96_v3, -inf  ;;  %v95_v21 = vld [vmem:[#allocation10 + $0x68] sm:$0xff]  ;;  %v120_v26 = vsel %vm98_vm0, %v91_v16, -inf }
  0x10   :  { %v86_v10 = vld [vmem:[#allocation10 + $0x20] sm:$0xff]  ;;  %v88_v11 = vld [vmem:[#allocation10 + $0x30] sm:$0xff]  ;;  %v99_v13 = vsel %vm98_vm0, %v82_v7, -inf  ;;  %v100_v14 = vsel %vm98_vm0, %v84_v9, -inf  ;;  %v83_v22 = vld [vmem:[#allocation10 + $0x8] sm:$0xff]  ;;  %v148_v24 = vsel %vm98_vm0, %v82_v7, 0.0 }
  0x11   :  { %v102_v15 = vsel %vm98_vm0, %v86_v10, -inf  ;;  %v117_v18 = vmax.f32 %v115_v8, %v116_v6  ;;  %v101_v20 = vmax.f32 %v99_v13, %v100_v14  ;;  %v104_v23 = vsel %vm98_vm0, %v88_v11, -inf  ;;  %v85_v27 = vld [vmem:[#allocation10 + $0x18] sm:$0xff]  ;;  %v87_v28 = vld [vmem:[#allocation10 + $0x28] sm:$0xff]  ;;  %s2373_s2 = smov 127   ;;  %s2374_s23 = smov 126  }
  0x12   :  { %v149_v25 = vsel %vm98_vm0, %v84_v9, 0.0  ;;  %v97_v31 = vld [vmem:[#allocation10 + $0x78] sm:$0xff]  ;;  %v121_v32 = vsel %vm98_vm0, %v93_v17, -inf  ;;  %v123_v33 = vsel %vm98_vm0, %v95_v21, -inf  ;;  %v163_v34 = vsel %vm98_vm0, %v92_v1, 0.0  ;;  %s2375_s24 = smov 125  }
  0x13   :  { %v119_v29 = vmax.f32 %v117_v18, %v118_v12  ;;  %v103_v30 = vmax.f32 %v101_v20, %v102_v15  ;;  %v122_v35 = vmax.f32 %v120_v26, %v121_v32  ;;  %v106_v36 = vsel %vm98_vm0, %v83_v22, -inf  ;;  %v89_v39 = vld [vmem:[#allocation10 + $0x38] sm:$0xff]  ;;  %s2376_s25 = smov 124   ;;  %s2377_s26 = smov 123  }
  0x14   :  { %v107_v37 = vsel %vm98_vm0, %v85_v27, -inf  ;;  %v109_v41 = vsel %vm98_vm0, %v87_v28, -inf  ;;  %v151_v42 = vsel %vm98_vm0, %v86_v10, 0.0  ;;  %v125_v44 = vsel %vm98_vm0, %v97_v31, -inf  ;;  %s219_s27 = sld [smem:[#allocation6]]  ;;  %s2378_s29 = smov 122  }
  0x15   :  { %135 = vrot.lane.b32.xlu1 %v119_v29, %s2371_s0  ;;  %v105_v38 = vmax.f32 %v103_v30, %v104_v23  ;;  %v108_v40 = vmax.f32 %v106_v36, %v107_v37  ;;  %v124_v43 = vmax.f32 %v122_v35, %v123_v33  ;;  %v150_v45 = vadd.f32 %v149_v25, %v148_v24  ;;  %s2175_s28 = sld [smem:[#allocation6 + $0x7]] }
  0x16   :  { %v164_v47 = vadd.f32 %v163_v34, %v162_v19  ;;  %v165_v48 = vsel %vm98_vm0, %v94_v2, 0.0  ;;  %v111_v49 = vsel %vm98_vm0, %v89_v39, -inf  ;;  %v153_v52 = vsel %vm98_vm0, %v88_v11, 0.0  ;;  %s2176_s30 = sld [smem:[#allocation6 + $0xe]] }
  0x17   :  { %131 = vrot.lane.b32.xlu0 %v105_v38, %s2371_s0  ;;  %v110_v46 = vmax.f32 %v108_v40, %v109_v41  ;;  %v126_v50 = vmax.f32 %v124_v43, %v125_v44  ;;  %v152_v51 = vadd.f32 %v151_v42, %v150_v45  ;;  %v169_v53 = vsel %vm98_vm0, %v91_v16, 0.0  ;;  %s2177_s6 = sld [smem:[#allocation6 + $0x15]] }
  0x18   :  { %v170_v54 = vsel %vm98_vm0, %v93_v17, 0.0  ;;  %v166_v56 = vadd.f32 %v165_v48, %v164_v47  ;;  %v167_v57 = vsel %vm98_vm0, %v96_v3, 0.0  ;;  %v172_v60 = vsel %vm98_vm0, %v95_v21, 0.0  ;;  %s2179_s7 = sld [smem:[#allocation6 + $0x23]] }
  0x19   :  { %v112_v55 = vmax.f32 %v110_v46, %v111_v49  ;;  %v154_v58 = vadd.f32 %v153_v52, %v152_v51  ;;  %v171_v59 = vadd.f32 %v170_v54, %v169_v53  ;;  %v174_v0 = vsel %vm98_vm0, %v97_v31, 0.0  ;;  %s2181_s8 = sld [smem:[#allocation6 + $0x1]] }
  0x1a   :  { %v168_v61 = vadd.f32 %v167_v57, %v166_v56  ;;  %v155_v4 = vsel %vm98_vm0, %v83_v22, 0.0  ;;  %v156_v5 = vsel %vm98_vm0, %v85_v27, 0.0  ;;  %v158_v7 = vsel %vm98_vm0, %v87_v28, 0.0  ;;  %s2583_s9 = sld [smem:[#allocation6 + $0x2a]] }
  0x1b   :  { %v176_v62 = vmul.f32 0.25, %v154_v58  ;;  %v173_v63 = vadd.f32 %v172_v60, %v171_v59  ;;  %v157_v6 = vadd.f32 %v156_v5, %v155_v4  ;;  %v160_v9 = vsel %vm98_vm0, %v89_v39, 0.0  ;;  %s2586_s10 = sld [smem:[#allocation6 + $0x8]] }
  0x1c   :  { %v178_v1 = vmul.f32 0.25, %v168_v61  ;;  %v2372_v11 = vmov 0.0   ;;  %vm50_vm2 = vcmask 23552   ;;  %vm58_vm3 = vcmask 179352   ;;  %s2600_s11 = sld [smem:[#allocation6 + $0xf]] }
  0x1d   :  { %137 = vrot.lane.b32.xlu1 %v126_v50, %s2371_s0  ;;  %v175_v2 = vadd.f32 %v174_v0, %v173_v63  ;;  %v159_v8 = vadd.f32 %v158_v7, %v157_v6  ;;  %47 = vst.msk [vmem:[#allocation2 + $0x18] sm:$0x7] %vm45_vm1, %v2372_v11  ;;  %vm53_vm4 = vcmask 21504   ;;  %vm61_vm5 = vcmask 177304   ;;  %s2615_s12 = sld [smem:[#allocation6 + $0x16]] }
  0x1e   :  { %55 = vst.msk [vmem:[#allocation2 + $0x18] sm:$0xff] %vm50_vm2, %v2372_v11  ;;  %vm143_vm6 = vcmask 154648   ;;  %vm210_vm7 = vcmask 128000   ;;  %v220_v39 = vstv %s219_s27  ;;  %v2544_v44 = vstv %s2175_s28  ;;  %s2636_s13 = sld [smem:[#allocation6 + $0x1d]] }
  0x1f   :  { %133 = vrot.lane.b32.xlu0 %v112_v55, %s2371_s0  ;;  %v179_v3 = vmul.f32 0.25, %v175_v2  ;;  %v161_v10 = vadd.f32 %v160_v9, %v159_v8  ;;  %56 = vst.msk [vmem:[#allocation2 + $0x20] sm:$0xff] %vm50_vm2, %v2372_v11  ;;  %v2551_v47 = vstv %s3723_s1  ;;  %v2566_v61 = vstv %s2176_s30  ;;  %s2178_s1 = sld [smem:[#allocation6 + $0x1c]] }
  0x20   :  { %63 = vst.msk [vmem:[#allocation2 + $0x18] sm:$0xff] %vm58_vm3, %v2372_v11  ;;  %s2649_s14 = sld [smem:[#allocation6 + $0x24]] }
  0x21   :  { %v177_v12 = vmul.f32 0.25, %v161_v10  ;;  %64 = vst.msk [vmem:[#allocation2 + $0x20] sm:$0xff] %vm58_vm3, %v2372_v11  ;;  %s2659_s15 = sld [smem:[#allocation6 + $0x2b]] }
  0x22   :  { %46 = vst.msk [vmem:[#allocation2] sm:$0x7] %vm45_vm1, %v2372_v11  ;;  %s2665_s16 = sld [smem:[#allocation6 + $0x2]] }
  0x23   :  { %186 = vrot.lane.b32.xlu2 %v177_v12, %s2371_s0  ;;  %48 = vst.msk [vmem:[#allocation2 + $0x13] sm:$0x7] %vm45_vm1, %v2372_v11  ;;  %s2682_s17 = sld [smem:[#allocation6 + $0x9]] }
  0x24   :  { %49 = vst.msk [vmem:[#allocation2 + $0x2b] sm:$0x7] %vm45_vm1, %v2372_v11  ;;  %s2689_s18 = sld [smem:[#allocation6 + $0x10]] }
  0x25   :  { %184 = vrot.lane.b32.xlu1 %v176_v62, %s2371_s0  ;;  %52 = vst.msk [vmem:[#allocation2 + $0x8] sm:$0xff] %vm50_vm2, %v2372_v11  ;;  %s2702_s19 = sld [smem:[#allocation6 + $0x17]] }
  0x26   :  { %66 = vst.msk [vmem:[#allocation3] sm:$0x7] %vm45_vm1, %v2372_v11  ;;  %s2719_s20 = sld [smem:[#allocation6 + $0x1e]] }
  0x27   :  { %188 = vrot.lane.b32.xlu0 %v178_v1, %s2371_s0  ;;  %67 = vst.msk [vmem:[#allocation3 + $0x18] sm:$0x7] %vm45_vm1, %v2372_v11  ;;  %s2782_s27 = sld [smem:[#allocation6 + $0xa]] }
  0x28   :  { %68 = vst.msk [vmem:[#allocation3 + $0x13] sm:$0x7] %vm45_vm1, %v2372_v11  ;;  %s2793_s28 = sld [smem:[#allocation6 + $0x11]] }
  0x29   :  { %69 = vst.msk [vmem:[#allocation3 + $0x2b] sm:$0x7] %vm45_vm1, %v2372_v11  ;;  %s2807_s30 = sld [smem:[#allocation6 + $0x1f]] }
  0x2a   :  { %71 = vst.msk [vmem:[#allocation3 + $0x8] sm:$0xff] %vm50_vm2, %v2372_v11  ;;  %s2827_s4 = sld [smem:[#allocation6 + $0x26]] }
  0x2b   :  { %74 = vst.msk [vmem:[#allocation3 + $0x20] sm:$0xff] %vm50_vm2, %v2372_v11  ;;  %s2832_s5 = sld [smem:[#allocation6 + $0x2d]] }
  0x2c   :  { %51 = vst.msk [vmem:[#allocation2] sm:$0xff] %vm50_vm2, %v2372_v11 }
  0x2d   :  { %190 = vrot.lane.b32.xlu1 %v179_v3, %s2371_s0  ;;  %59 = vst.msk [vmem:[#allocation2] sm:$0xff] %vm58_vm3, %v2372_v11  ;;  %v2574_v3 = vstv %s2177_s6  ;;  %s2738_s0 = sld [smem:[#allocation6 + $0x25]] }
  0x2e   :  { %60 = vst.msk [vmem:[#allocation2 + $0x8] sm:$0xff] %vm58_vm3, %v2372_v11  ;;  %s2855_s6 = sld [smem:[#allocation6 + $0x4]] }
  0x2f   :  { %70 = vst.msk [vmem:[#allocation3] sm:$0xff] %vm50_vm2, %v2372_v11 }
  0x30   :  { %73 = vst.msk [vmem:[#allocation3 + $0x18] sm:$0xff] %vm50_vm2, %v2372_v11 }
  0x31   :  { %77 = vst.msk [vmem:[#allocation3 + $0x8] sm:$0xff] %vm58_vm3, %v2372_v11 }
  0x32   :  { %80 = vst.msk [vmem:[#allocation3 + $0x20] sm:$0xff] %vm58_vm3, %v2372_v11 }
  0x33   :  { %76 = vst.msk [vmem:[#allocation3] sm:$0xff] %vm58_vm3, %v2372_v11 }
  0x34   :  { %79 = vst.msk [vmem:[#allocation3 + $0x18] sm:$0xff] %vm58_vm3, %v2372_v11 }
  0x35   :  { %57 = vst.msk [vmem:[#allocation2 + $0x28] sm:$0x3f] %vm53_vm4, %v2372_v11 }
  0x36   :  { %65 = vst.msk [vmem:[#allocation2 + $0x28] sm:$0x3f] %vm61_vm5, %v2372_v11 }
  0x37   :  { %54 = vst.msk [vmem:[#allocation2 + $0x10] sm:$0x3f] %vm53_vm4, %v2372_v11 }
  0x38   :  { %72 = vst.msk [vmem:[#allocation3 + $0x10] sm:$0x3f] %vm53_vm4, %v2372_v11 }
  0x39   :  { %75 = vst.msk [vmem:[#allocation3 + $0x28] sm:$0x3f] %vm53_vm4, %v2372_v11 }
  0x3a   :  { %62 = vst.msk [vmem:[#allocation2 + $0x10] sm:$0x3f] %vm61_vm5, %v2372_v11 }
  0x3b   :  { %78 = vst.msk [vmem:[#allocation3 + $0x10] sm:$0x3f] %vm61_vm5, %v2372_v11 }
  0x3c   :  { %81 = vst.msk [vmem:[#allocation3 + $0x28] sm:$0x3f] %vm61_vm5, %v2372_v11 }
  0x7d   :  { %v187_v31 = vpop.permute.xlu2 %186 }
  0x7e   :  { %197 = vst.msk [vmem:[#allocation3 + $0xb] sm:$0xff] %vm143_vm6, %v187_v31 }
  0x87   :  { %v136_v13 = vpop.permute.xlu1 %135 }
  0x88   :  { %146 = vst.msk [vmem:[#allocation2 + $0x1b] sm:$0xff] %vm143_vm6, %v136_v13 }
  0x89   :  { %v132_v14 = vpop.permute.xlu0 %131 }
  0x8a   :  { %144 = vst.msk [vmem:[#allocation2 + $0x3] sm:$0xff] %vm143_vm6, %v132_v14  ;;  %v2580_v14 = vstv %s2178_s1  ;;  %s2866_s1 = sld [smem:[#allocation6 + $0xb]] }
  0x8f   :  { %v2475_v15 = vld [vmem:[#allocation2 + $0x18] sm:$0xff]  ;;  %v138_v16 = vpop.permute.xlu1 %137 }
  0x90   :  { %212 = vst.msk [vmem:[#allocation4 + $0x18] sm:$0xff] %vm98_vm0, %v2475_v15  ;;  %331 = vrot.lane.b32.xlu0 %v2475_v15, %s2373_s2 }
  0x91   :  { %v2481_v17 = vld [vmem:[#allocation2] sm:$0xff]  ;;  %147 = vst.msk [vmem:[#allocation2 + $0x23] sm:$0xff] %vm143_vm6, %v138_v16  ;;  %v134_v18 = vpop.permute.xlu0 %133 }
  0x92   :  { %208 = vst.msk [vmem:[#allocation4] sm:$0xff] %vm98_vm0, %v2481_v17  ;;  %325 = vrot.lane.b32.xlu2 %v2481_v17, %s2373_s2 }
  0x93   :  { %145 = vst.msk [vmem:[#allocation2 + $0xb] sm:$0xff] %vm143_vm6, %v134_v18 }
  0x97   :  { %v185_v29 = vpop.permute.xlu1 %184  ;;  %v217_v9 = vld [vmem:[#allocation4 + $0x18] sm:$0xff] }
  0x98   :  { %v2489_v19 = vld [vmem:[#allocation2 + $0x20] sm:$0xff]  ;;  %v207_v20 = vld [vmem:[#allocation2 + $0x28] sm:$0x3f]  ;;  %196 = vst.msk [vmem:[#allocation3 + $0x3] sm:$0xff] %vm143_vm6, %v185_v29  ;;  %v2597_v29 = vstv %s2179_s7  ;;  %s2887_s7 = sld [smem:[#allocation6 + $0x12]] }
  0x99   :  { %v318_v21 = vld [vmem:[#allocation2 + $0x28] sm:$0x3f]  ;;  %213 = vst.msk [vmem:[#allocation4 + $0x20] sm:$0xff] %vm98_vm0, %v2489_v19  ;;  %333 = vrot.lane.b32.xlu1 %v2489_v19, %s2373_s2  ;;  %v189_v30 = vpop.permute.xlu0 %188  ;;  %v215_v37 = vld [vmem:[#allocation4] sm:$0xff] }
  0x9a   :  { %335 = vrot.lane.b32.xlu0 %v318_v21, %s2373_s2  ;;  %214 = vst.msk [vmem:[#allocation4 + $0x28] sm:$0x3f] %vm210_vm7, %v207_v20  ;;  %v203_v22 = vld [vmem:[#allocation2 + $0x8] sm:$0xff]  ;;  %v204_v23 = vld [vmem:[#allocation2 + $0x10] sm:$0x3f]  ;;  %v221_v40 = vmul.f32 %v220_v39, %v215_v37 }
  0x9b   :  { %209 = vst.msk [vmem:[#allocation4 + $0x8] sm:$0xff] %vm98_vm0, %v203_v22  ;;  %327 = vrot.lane.b32.xlu2 %v203_v22, %s2373_s2  ;;  %v315_v24 = vld [vmem:[#allocation2 + $0x10] sm:$0x3f]  ;;  %v452_v25 = vld [vmem:[#allocation2 + $0x28] sm:$0x3f] }
  0x9c   :  { %211 = vst.msk [vmem:[#allocation4 + $0x10] sm:$0x3f] %vm210_vm7, %v204_v23  ;;  %v449_v26 = vld [vmem:[#allocation2 + $0x10] sm:$0x3f]  ;;  %v586_v27 = vld [vmem:[#allocation2 + $0x28] sm:$0x3f]  ;;  %v225_v50 = vadd.f32 %v221_v40, %v2551_v47 }
  0x9d   :  { %v583_v28 = vld [vmem:[#allocation2 + $0x10] sm:$0x3f]  ;;  %198 = vst.msk [vmem:[#allocation3 + $0x1b] sm:$0xff] %vm143_vm6, %v189_v30  ;;  %v720_v32 = vld [vmem:[#allocation2 + $0x28] sm:$0x3f] }
  0x9e   :  { %v717_v34 = vld [vmem:[#allocation2 + $0x10] sm:$0x3f]  ;;  %v854_v36 = vld [vmem:[#allocation2 + $0x28] sm:$0x3f]  ;;  %v1229_v21 = vld [vmem:[#allocation3 + $0x10] sm:$0x3f] }
  0x9f   :  { %v191_v33 = vpop.permute.xlu1 %190  ;;  %v851_v35 = vld [vmem:[#allocation2 + $0x10] sm:$0x3f]  ;;  %v988_v43 = vld [vmem:[#allocation2 + $0x28] sm:$0x3f]  ;;  %v2562_v59 = vld [vmem:[#allocation3 + $0x8] sm:$0xff] }
  0xa0   :  { %199 = vst.msk [vmem:[#allocation3 + $0x23] sm:$0xff] %vm143_vm6, %v191_v33  ;;  %v985_v42 = vld [vmem:[#allocation2 + $0x10] sm:$0x3f]  ;;  %v218_v12 = vld [vmem:[#allocation4 + $0x20] sm:$0xff] }
  0xa1   :  { %459 = vrot.lane.b32.xlu1 %v2481_v17, %s2374_s23  ;;  %v231_v16 = vld [vmem:[#allocation4 + $0x19] sm:$0xff]  ;;  %v2590_v23 = vld [vmem:[#allocation3] sm:$0xff]  ;;  %v246_v40 = vld [vmem:[#allocation4 + $0x22] sm:$0xff] }
  0xa2   :  { %465 = vrot.lane.b32.xlu0 %v2475_v15, %s2374_s23  ;;  %v216_v38 = vld [vmem:[#allocation4 + $0x8] sm:$0xff] }
  0xa3   :  { %329 = vrot.lane.b32.xlu2 %v315_v24, %s2373_s2  ;;  %v229_v41 = vld [vmem:[#allocation4 + $0x1] sm:$0xff]  ;;  %v222_v45 = vmul.f32 %v220_v39, %v216_v38  ;;  %v230_v46 = vld [vmem:[#allocation4 + $0x9] sm:$0xff] }
  0xa4   :  { %v243_v48 = vld [vmem:[#allocation4 + $0x2] sm:$0xff]  ;;  %v235_v51 = vmul.f32 %v2544_v44, %v229_v41  ;;  %v236_v57 = vmul.f32 %v2544_v44, %v230_v46  ;;  %v244_v58 = vld [vmem:[#allocation4 + $0xa] sm:$0xff]  ;;  %v2609_v41 = vstv %s2583_s9  ;;  %s2918_s9 = sld [smem:[#allocation6 + $0x27]] }
  0xa5   :  { %v257_v49 = vld [vmem:[#allocation4 + $0x3] sm:$0xff]  ;;  %v226_v56 = vadd.f32 %v222_v45, %v2551_v47  ;;  %v249_v63 = vmul.f32 %v2566_v61, %v243_v48  ;;  %v250_v1 = vmul.f32 %v2566_v61, %v244_v58  ;;  %v258_v2 = vld [vmem:[#allocation4 + $0xb] sm:$0xff] }
  0xa6   :  { %v271_v52 = vld [vmem:[#allocation4 + $0x4] sm:$0xff]  ;;  %v239_v62 = vadd.f32 %v235_v51, %v225_v50  ;;  %v263_v5 = vmul.f32 %v2574_v3, %v257_v49  ;;  %v272_v6 = vld [vmem:[#allocation4 + $0xc] sm:$0xff]  ;;  %v264_v8 = vmul.f32 %v2574_v3, %v258_v2  ;;  %v2613_v49 = vstv %s2586_s10  ;;  %v273_v50 = vld [vmem:[#allocation4 + $0x1c] sm:$0xff]  ;;  %s2928_s10 = sld [smem:[#allocation6 + $0x2e]] }
  0xa7   :  { %v285_v53 = vld [vmem:[#allocation4 + $0x5] sm:$0xff]  ;;  %v240_v0 = vadd.f32 %v236_v57, %v226_v56  ;;  %v286_v10 = vld [vmem:[#allocation4 + $0xd] sm:$0xff]  ;;  %v277_v18 = vmul.f32 %v2580_v14, %v271_v52  ;;  %v278_v24 = vmul.f32 %v2580_v14, %v272_v6  ;;  %v252_v57 = vmul.f32 %v2566_v61, %v246_v40 }
  0xa8   :  { %v2557_v54 = vld [vmem:[#allocation4 + $0x6] sm:$0xff]  ;;  %v253_v4 = vadd.f32 %v249_v63, %v239_v62  ;;  %v300_v11 = vld [vmem:[#allocation4 + $0xe] sm:$0xff]  ;;  %v291_v33 = vmul.f32 %v2597_v29, %v285_v53  ;;  %v292_v37 = vmul.f32 %v2597_v29, %v286_v10  ;;  %v2624_v53 = vld [vmem:[#allocation4 + $0x1d] sm:$0xff] }
  0xa9   :  { %467 = vrot.lane.b32.xlu1 %v2489_v19, %s2374_s23  ;;  %v2564_v60 = vld [vmem:[#allocation3 + $0x18] sm:$0xff]  ;;  %v254_v7 = vadd.f32 %v250_v1, %v240_v0  ;;  %v305_v51 = vmul.f32 %v2609_v41, %v2557_v54  ;;  %v2628_v56 = vld [vmem:[#allocation3 + $0x20] sm:$0xff]  ;;  %v306_v58 = vmul.f32 %v2609_v41, %v300_v11  ;;  %v2647_v11 = vstv %s2600_s11  ;;  %s2934_s11 = sld [smem:[#allocation6 + $0x5]] }
  0xaa   :  { %469 = vrot.lane.b32.xlu0 %v452_v25, %s2374_s23  ;;  %v237_v25 = vmul.f32 %v2544_v44, %v231_v16  ;;  %v260_v0 = vld [vmem:[#allocation4 + $0x23] sm:$0xff] }
  0xab   :  { %461 = vrot.lane.b32.xlu2 %v203_v22, %s2374_s23  ;;  %v268_v20 = vadd.f32 %v264_v8, %v254_v7 }
  0xad   :  { %v282_v30 = vadd.f32 %v278_v24, %v268_v20 }
  0xaf   :  { %v296_v46 = vadd.f32 %v292_v37, %v282_v30 }
  0xb1   :  { %593 = vrot.lane.b32.xlu1 %v2481_v17, %s2375_s24 }
  0xb2   :  { %599 = vrot.lane.b32.xlu0 %v2475_v15, %s2375_s24 }
  0xb3   :  { %463 = vrot.lane.b32.xlu2 %v449_v26, %s2374_s23  ;;  %v232_v26 = vld [vmem:[#allocation4 + $0x21] sm:$0xff] }
  0xb9   :  { %601 = vrot.lane.b32.xlu1 %v2489_v19, %s2375_s24 }
  0xba   :  { %603 = vrot.lane.b32.xlu0 %v586_v27, %s2375_s24 }
  0xbb   :  { %595 = vrot.lane.b32.xlu2 %v203_v22, %s2375_s24 }
  0xc1   :  { %727 = vrot.lane.b32.xlu1 %v2481_v17, %s2376_s25 }
  0xc2   :  { %733 = vrot.lane.b32.xlu0 %v2475_v15, %s2376_s25 }
  0xc3   :  { %597 = vrot.lane.b32.xlu2 %v583_v28, %s2375_s24 }
  0xc9   :  { %735 = vrot.lane.b32.xlu1 %v2489_v19, %s2376_s25 }
  0xca   :  { %737 = vrot.lane.b32.xlu0 %v720_v32, %s2376_s25  ;;  %v245_v32 = vld [vmem:[#allocation4 + $0x1a] sm:$0xff] }
  0xcb   :  { %729 = vrot.lane.b32.xlu2 %v203_v22, %s2376_s25  ;;  %v251_v48 = vmul.f32 %v2566_v61, %v245_v32  ;;  %v1363_v32 = vld [vmem:[#allocation3 + $0x10] sm:$0x3f] }
  0xd1   :  { %867 = vrot.lane.b32.xlu1 %v2475_v15, %s2377_s26 }
  0xd2   :  { %863 = vrot.lane.b32.xlu0 %v203_v22, %s2377_s26 }
  0xd3   :  { %731 = vrot.lane.b32.xlu2 %v717_v34, %s2376_s25 }
  0xd9   :  { %871 = vrot.lane.b32.xlu1 %v854_v36, %s2377_s26  ;;  %v2604_v36 = vstv %s2181_s8  ;;  %s2911_s8 = sld [smem:[#allocation6 + $0x20]] }
  0xda   :  { %865 = vrot.lane.b32.xlu0 %v851_v35, %s2377_s26  ;;  %v238_v35 = vmul.f32 %v2544_v44, %v232_v26  ;;  %v259_v44 = vld [vmem:[#allocation4 + $0x1b] sm:$0xff]  ;;  %v274_v26 = vld [vmem:[#allocation4 + $0x24] sm:$0xff] }
  0xdb   :  { %861 = vrot.lane.b32.xlu2 %v2481_v17, %s2377_s26  ;;  %v265_v10 = vmul.f32 %v2574_v3, %v259_v44  ;;  %v280_v37 = vmul.f32 %v2580_v14, %v274_v26 }
  0xe1   :  { %1001 = vrot.lane.b32.xlu1 %v2475_v15, %s2378_s29  ;;  %v1232_v15 = vld [vmem:[#allocation3 + $0x28] sm:$0x3f] }
  0xe2   :  { %997 = vrot.lane.b32.xlu0 %v203_v22, %s2378_s29  ;;  %v223_v22 = vmul.f32 %v220_v39, %v217_v9 }
  0xe3   :  { %869 = vrot.lane.b32.xlu2 %v2489_v19, %s2377_s26 }
  0xe4   :  { %v227_v31 = vadd.f32 %v223_v22, %v2551_v47 }
  0xe9   :  { %1005 = vrot.lane.b32.xlu1 %v988_v43, %s2378_s29 }
  0xea   :  { %999 = vrot.lane.b32.xlu0 %v985_v42, %s2378_s29 }
  0xeb   :  { %995 = vrot.lane.b32.xlu2 %v2481_v17, %s2378_s29  ;;  %v267_v17 = vadd.f32 %v263_v5, %v253_v4  ;;  %v310_v5 = vadd.f32 %v306_v58, %v296_v46 }
  0xec   :  { %v326_v55 = vpop.permute.xlu2 %325 }
  0xed   :  { %343 = vst.msk [vmem:[#allocation4] sm:$0xff] %vm98_vm0, %v326_v55  ;;  %v281_v27 = vadd.f32 %v277_v18, %v267_v17  ;;  %v2626_v55 = vld [vmem:[#allocation4 + $0x1e] sm:$0xff]  ;;  %v266_v18 = vmul.f32 %v2574_v3, %v260_v0 }
  0xef   :  { %v295_v42 = vadd.f32 %v291_v33, %v281_v27  ;;  %v279_v27 = vmul.f32 %v2580_v14, %v273_v50  ;;  %v1366_v33 = vld [vmem:[#allocation3 + $0x28] sm:$0x3f]  ;;  %v293_v50 = vmul.f32 %v2597_v29, %v2624_v53 }
  0xf1   :  { %1245 = vrot.lane.b32.xlu1 %v2564_v60, %s2373_s2  ;;  %v309_v1 = vadd.f32 %v305_v51, %v295_v42  ;;  %v288_v42 = vld [vmem:[#allocation4 + $0x25] sm:$0xff] }
  0xf2   :  { %1241 = vrot.lane.b32.xlu0 %v2562_v59, %s2373_s2 }
  0xf3   :  { %1003 = vrot.lane.b32.xlu2 %v2489_v19, %s2378_s29  ;;  %v224_v19 = vmul.f32 %v220_v39, %v218_v12  ;;  %v241_v39 = vadd.f32 %v237_v25, %v227_v31 }
  0xf4   :  { %v349_v38 = vld [vmem:[#allocation4] sm:$0xff] }
  0xf5   :  { %v328_v13 = vpop.permute.xlu2 %327  ;;  %v228_v28 = vadd.f32 %v224_v19, %v2551_v47  ;;  %v355_v52 = vmul.f32 %v2604_v36, %v349_v38  ;;  %v255_v63 = vadd.f32 %v251_v48, %v241_v39 }
  0xf6   :  { %344 = vst.msk [vmem:[#allocation4 + $0x8] sm:$0xff] %vm98_vm0, %v328_v13 }
  0xf7   :  { %v242_v45 = vadd.f32 %v238_v35, %v228_v28  ;;  %v359_v12 = vadd.f32 %v355_v52, %v309_v1  ;;  %v269_v24 = vadd.f32 %v265_v10, %v255_v63  ;;  %v307_v1 = vmul.f32 %v2609_v41, %v2626_v55 }
  0xf9   :  { %1249 = vrot.lane.b32.xlu1 %v1232_v15, %s2373_s2  ;;  %v256_v61 = vadd.f32 %v252_v57, %v242_v45  ;;  %v283_v38 = vadd.f32 %v279_v27, %v269_v24 }
  0xfa   :  { %1243 = vrot.lane.b32.xlu0 %v1229_v21, %s2373_s2 }
  0xfb   :  { %1239 = vrot.lane.b32.xlu2 %v2590_v23, %s2373_s2  ;;  %v270_v31 = vadd.f32 %v266_v18, %v256_v61  ;;  %v297_v63 = vadd.f32 %v293_v50, %v283_v38 }
  0xfd   :  { %v330_v34 = vpop.permute.xlu2 %329  ;;  %v350_v43 = vld [vmem:[#allocation4 + $0x8] sm:$0xff]  ;;  %v284_v14 = vadd.f32 %v280_v37, %v270_v31 }
  0xfe   :  { %345 = vst.msk [vmem:[#allocation4 + $0x10] sm:$0x3f] %vm210_vm7, %v330_v34  ;;  %v363_v47 = vld [vmem:[#allocation4 + $0x1] sm:$0xff]  ;;  %v356_v54 = vmul.f32 %v2604_v36, %v350_v43  ;;  %v2657_v34 = vstv %s2615_s12  ;;  %s2962_s12 = sld [smem:[#allocation6 + $0xc]] }
  0xff   :  { %v377_v2 = vld [vmem:[#allocation4 + $0x2] sm:$0xff]  ;;  %v369_v4 = vmul.f32 %v2613_v49, %v363_v47  ;;  %v2671_v47 = vstv %s2636_s13  ;;  %s2976_s13 = sld [smem:[#allocation6 + $0x13]] }
 0x100   :  { %v391_v6 = vld [vmem:[#allocation4 + $0x3] sm:$0xff]  ;;  %v360_v19 = vadd.f32 %v356_v54, %v310_v5  ;;  %v383_v30 = vmul.f32 %v2647_v11, %v377_v2  ;;  %v2680_v54 = vstv %s2649_s14  ;;  %s2983_s14 = sld [smem:[#allocation6 + $0x1a]] }
 0x101   :  { %1379 = vrot.lane.b32.xlu1 %v2564_v60, %s2374_s23  ;;  %v2639_v7 = vld [vmem:[#allocation4 + $0x4] sm:$0xff]  ;;  %v373_v28 = vadd.f32 %v369_v4, %v359_v12  ;;  %v397_v44 = vmul.f32 %v2657_v34, %v391_v6  ;;  %v311_v12 = vadd.f32 %v307_v1, %v297_v63 }
 0x102   :  { %1375 = vrot.lane.b32.xlu0 %v2562_v59, %s2374_s23  ;;  %v332_v62 = vpop.permute.xlu0 %331  ;;  %v2641_v8 = vld [vmem:[#allocation4 + $0x5] sm:$0xff]  ;;  %v411_v4 = vmul.f32 %v2671_v47, %v2639_v7  ;;  %v2706_v7 = vstv %s2665_s16  ;;  %s3013_s16 = sld [smem:[#allocation6 + $0x2f]] }
 0x103   :  { %1247 = vrot.lane.b32.xlu2 %v2628_v56, %s2373_s2  ;;  %346 = vst.msk [vmem:[#allocation4 + $0x18] sm:$0xff] %vm98_vm0, %v332_v62  ;;  %v2643_v9 = vld [vmem:[#allocation4 + $0x6] sm:$0xff]  ;;  %v387_v48 = vadd.f32 %v383_v30, %v373_v28  ;;  %v294_v62 = vmul.f32 %v2597_v29, %v288_v42  ;;  %v2695_v29 = vstv %s2659_s15  ;;  %s2746_s2 = sld [smem:[#allocation6 + $0x2c]] }
 0x104   :  { %v302_v43 = vld [vmem:[#allocation4 + $0x26] sm:$0xff]  ;;  %v439_v63 = vmul.f32 %v2695_v29, %v2643_v9  ;;  %s3009_s15 = sld [smem:[#allocation6 + $0x28]] }
 0x105   :  { %v364_v13 = vld [vmem:[#allocation4 + $0x9] sm:$0xff]  ;;  %v462_v17 = vpop.permute.xlu2 %461  ;;  %v401_v2 = vadd.f32 %v397_v44, %v387_v48  ;;  %v298_v61 = vadd.f32 %v294_v62, %v284_v14  ;;  %v308_v10 = vmul.f32 %v2609_v41, %v302_v43  ;;  %v2730_v48 = vstv %s2689_s18  ;;  %s3033_s18 = sld [smem:[#allocation6 + $0xd]] }
 0x106   :  { %v378_v15 = vld [vmem:[#allocation4 + $0xa] sm:$0xff]  ;;  %v370_v25 = vmul.f32 %v2613_v49, %v364_v13  ;;  %v2736_v62 = vstv %s2702_s19  ;;  %s3042_s19 = sld [smem:[#allocation6 + $0x14]] }
 0x107   :  { %v392_v16 = vld [vmem:[#allocation4 + $0xb] sm:$0xff]  ;;  %v384_v35 = vmul.f32 %v2647_v11, %v378_v15 }
 0x108   :  { %v406_v20 = vld [vmem:[#allocation4 + $0xc] sm:$0xff]  ;;  %v374_v3 = vadd.f32 %v370_v25, %v360_v19  ;;  %v398_v40 = vmul.f32 %v2657_v34, %v392_v16 }
 0x109   :  { %v420_v21 = vld [vmem:[#allocation4 + $0xd] sm:$0xff]  ;;  %1383 = vrot.lane.b32.xlu1 %v1366_v33, %s2374_s23  ;;  %v412_v52 = vmul.f32 %v2671_v47, %v406_v20 }
 0x10a   :  { %v434_v22 = vld [vmem:[#allocation4 + $0xe] sm:$0xff]  ;;  %1377 = vrot.lane.b32.xlu0 %v1363_v32, %s2374_s23  ;;  %v388_v39 = vadd.f32 %v384_v35, %v374_v3  ;;  %v351_v57 = vld [vmem:[#allocation4 + $0x18] sm:$0xff]  ;;  %v426_v0 = vmul.f32 %v2680_v54, %v420_v21  ;;  %v415_v21 = vadd.f32 %v411_v4, %v401_v2  ;;  %v2717_v3 = vstv %s2682_s17  ;;  %s3025_s17 = sld [smem:[#allocation6 + $0x6]] }
 0x10b   :  { %478 = vst.msk [vmem:[#allocation4 + $0x8] sm:$0xff] %vm98_vm0, %v462_v17  ;;  %1373 = vrot.lane.b32.xlu2 %v2590_v23, %s2374_s23  ;;  %v334_v45 = vpop.permute.xlu1 %333  ;;  %v357_v5 = vmul.f32 %v2604_v36, %v351_v57  ;;  %v440_v55 = vmul.f32 %v2695_v29, %v434_v22  ;;  %v312_v22 = vadd.f32 %v308_v10, %v298_v61 }
 0x10c   :  { %v336_v46 = vpop.permute.xlu0 %335  ;;  %347 = vst.msk [vmem:[#allocation4 + $0x20] sm:$0xff] %vm98_vm0, %v334_v45  ;;  %v402_v51 = vadd.f32 %v398_v40, %v388_v39 }
 0x10d   :  { %348 = vst.msk [vmem:[#allocation4 + $0x28] sm:$0x3f] %vm210_vm7, %v336_v46  ;;  %v464_v58 = vpop.permute.xlu2 %463  ;;  %v361_v24 = vadd.f32 %v357_v5, %v311_v12 }
 0x10e   :  { %479 = vst.msk [vmem:[#allocation4 + $0x10] sm:$0x3f] %vm210_vm7, %v464_v58  ;;  %v416_v53 = vadd.f32 %v412_v52, %v402_v51  ;;  %v1497_v52 = vld [vmem:[#allocation3 + $0x10] sm:$0x3f] }
 0x110   :  { %v430_v6 = vadd.f32 %v426_v0, %v416_v53  ;;  %v1500_v53 = vld [vmem:[#allocation3 + $0x28] sm:$0x3f] }
 0x111   :  { %1513 = vrot.lane.b32.xlu1 %v2564_v60, %s2375_s24 }
 0x112   :  { %1509 = vrot.lane.b32.xlu0 %v2562_v59, %s2375_s24  ;;  %v484_v13 = vld [vmem:[#allocation4 + $0x8] sm:$0xff]  ;;  %v444_v19 = vadd.f32 %v440_v55, %v430_v6 }
 0x113   :  { %v352_v15 = vld [vmem:[#allocation4 + $0x20] sm:$0xff]  ;;  %1381 = vrot.lane.b32.xlu2 %v2628_v56, %s2374_s23  ;;  %v460_v20 = vpop.permute.xlu1 %459  ;;  %v490_v33 = vmul.f32 %v2706_v7, %v484_v13  ;;  %s2772_s23 = sld [smem:[#allocation6 + $0x3]] }
 0x114   :  { %v365_v16 = vld [vmem:[#allocation4 + $0x19] sm:$0xff]  ;;  %v466_v18 = vpop.permute.xlu0 %465  ;;  %v358_v25 = vmul.f32 %v2604_v36, %v352_v15  ;;  %477 = vst.msk [vmem:[#allocation4] sm:$0xff] %vm98_vm0, %v460_v20  ;;  %v366_v31 = vld [vmem:[#allocation4 + $0x21] sm:$0xff]  ;;  %v425_v36 = vmul.f32 %v2680_v54, %v2641_v8 }
 0x115   :  { %v379_v17 = vld [vmem:[#allocation4 + $0x1a] sm:$0xff]  ;;  %v371_v28 = vmul.f32 %v2613_v49, %v365_v16  ;;  %v380_v32 = vld [vmem:[#allocation4 + $0x22] sm:$0xff]  ;;  %v2723_v35 = vpop.permute.xlu2 %595  ;;  %v372_v38 = vmul.f32 %v2613_v49, %v366_v31  ;;  %v494_v46 = vadd.f32 %v490_v33, %v444_v19  ;;  %v512_v8 = vld [vmem:[#allocation4 + $0xa] sm:$0xff] }
 0x116   :  { %v393_v41 = vld [vmem:[#allocation4 + $0x1b] sm:$0xff]  ;;  %v362_v37 = vadd.f32 %v358_v25, %v312_v22  ;;  %v385_v40 = vmul.f32 %v2647_v11, %v379_v17  ;;  %v394_v42 = vld [vmem:[#allocation4 + $0x23] sm:$0xff]  ;;  %v429_v44 = vadd.f32 %v425_v36, %v415_v21  ;;  %v386_v50 = vmul.f32 %v2647_v11, %v380_v32  ;;  %v526_v11 = vld [vmem:[#allocation4 + $0xb] sm:$0xff] }
 0x117   :  { %v407_v26 = vld [vmem:[#allocation4 + $0x1c] sm:$0xff]  ;;  %v375_v39 = vadd.f32 %v371_v28, %v361_v24  ;;  %v498_v43 = vld [vmem:[#allocation4 + $0x9] sm:$0xff]  ;;  %v399_v45 = vmul.f32 %v2657_v34, %v393_v41  ;;  %v400_v4 = vmul.f32 %v2657_v34, %v394_v42  ;;  %v518_v15 = vmul.f32 %v2730_v48, %v512_v8 }
 0x118   :  { %v421_v27 = vld [vmem:[#allocation4 + $0x1d] sm:$0xff]  ;;  %v376_v14 = vadd.f32 %v372_v38, %v362_v37  ;;  %v504_v49 = vmul.f32 %v2717_v3, %v498_v43  ;;  %v413_v58 = vmul.f32 %v2671_v47, %v407_v26  ;;  %v422_v0 = vld [vmem:[#allocation4 + $0x25] sm:$0xff]  ;;  %v443_v10 = vadd.f32 %v439_v63, %v429_v44  ;;  %v554_v25 = vld [vmem:[#allocation4 + $0xd] sm:$0xff] }
 0x119   :  { %v2713_v30 = vld [vmem:[#allocation4 + $0x1e] sm:$0xff]  ;;  %v389_v51 = vadd.f32 %v385_v40, %v375_v39  ;;  %v436_v1 = vld [vmem:[#allocation4 + $0x26] sm:$0xff]  ;;  %1517 = vrot.lane.b32.xlu1 %v1500_v53, %s2375_s24  ;;  %v427_v55 = vmul.f32 %v2680_v54, %v421_v27  ;;  %v2754_v41 = vld [vmem:[#allocation4 + $0xe] sm:$0xff]  ;;  %v2757_v26 = vstv %s2719_s20  ;;  %v532_v28 = vmul.f32 %v2736_v62, %v526_v11  ;;  %s3062_s20 = sld [smem:[#allocation6 + $0x1b]] }
 0x11a   :  { %480 = vst.msk [vmem:[#allocation4 + $0x18] sm:$0xff] %vm98_vm0, %v466_v18  ;;  %v408_v57 = vld [vmem:[#allocation4 + $0x24] sm:$0xff]  ;;  %1511 = vrot.lane.b32.xlu0 %v1497_v52, %s2375_s24  ;;  %v390_v2 = vadd.f32 %v386_v50, %v376_v14  ;;  %v508_v5 = vadd.f32 %v504_v49, %v494_v46  ;;  %v540_v6 = vld [vmem:[#allocation4 + $0xc] sm:$0xff]  ;;  %v428_v38 = vmul.f32 %v2680_v54, %v422_v0 }
 0x11b   :  { %v403_v61 = vadd.f32 %v399_v45, %v389_v51  ;;  %v483_v9 = vld [vmem:[#allocation4] sm:$0xff]  ;;  %1507 = vrot.lane.b32.xlu2 %v2590_v23, %s2375_s24  ;;  %v468_v16 = vpop.permute.xlu1 %467  ;;  %v414_v18 = vmul.f32 %v2671_v47, %v408_v57  ;;  %v441_v39 = vmul.f32 %v2695_v29, %v2713_v30  ;;  %v546_v46 = vmul.f32 %v2757_v26, %v540_v6 }
 0x11c   :  { %v497_v12 = vld [vmem:[#allocation4 + $0x1] sm:$0xff]  ;;  %v470_v34 = vpop.permute.xlu0 %469  ;;  %v404_v17 = vadd.f32 %v400_v4, %v390_v2  ;;  %v489_v20 = vmul.f32 %v2706_v7, %v483_v9  ;;  %v522_v27 = vadd.f32 %v518_v15, %v508_v5  ;;  %481 = vst.msk [vmem:[#allocation4 + $0x20] sm:$0xff] %vm98_vm0, %v468_v16  ;;  %v442_v50 = vmul.f32 %v2695_v29, %v436_v1 }
 0x11d   :  { %v511_v13 = vld [vmem:[#allocation4 + $0x2] sm:$0xff]  ;;  %v417_v19 = vadd.f32 %v413_v58, %v403_v61  ;;  %482 = vst.msk [vmem:[#allocation4 + $0x28] sm:$0x3f] %vm210_vm7, %v470_v34  ;;  %v598_v47 = vpop.permute.xlu2 %597  ;;  %v503_v37 = vmul.f32 %v2717_v3, %v497_v12  ;;  %v2789_v57 = vstv %s2746_s2  ;;  %s3111_s2 = sld [smem:[#allocation6 + $0x30]] }
 0x11e   :  { %v525_v21 = vld [vmem:[#allocation4 + $0x3] sm:$0xff]  ;;  %v418_v32 = vadd.f32 %v414_v18, %v404_v17  ;;  %v493_v36 = vadd.f32 %v489_v20, %v443_v10  ;;  %v536_v40 = vadd.f32 %v532_v28, %v522_v27  ;;  %613 = vst.msk [vmem:[#allocation4 + $0x10] sm:$0x3f] %vm210_vm7, %v598_v47  ;;  %v517_v45 = vmul.f32 %v2730_v48, %v511_v13 }
 0x11f   :  { %v539_v22 = vld [vmem:[#allocation4 + $0x4] sm:$0xff]  ;;  %v431_v33 = vadd.f32 %v427_v55, %v417_v19  ;;  %v531_v30 = vmul.f32 %v2736_v62, %v525_v21  ;;  %v574_v21 = vmul.f32 %v2789_v57, %v2754_v41 }
 0x120   :  { %v553_v24 = vld [vmem:[#allocation4 + $0x5] sm:$0xff]  ;;  %v507_v43 = vadd.f32 %v503_v37, %v493_v36  ;;  %v432_v44 = vadd.f32 %v428_v38, %v418_v32  ;;  %v550_v14 = vadd.f32 %v546_v46, %v536_v40  ;;  %v545_v63 = vmul.f32 %v2757_v26, %v539_v22 }
 0x121   :  { %v2760_v31 = vld [vmem:[#allocation4 + $0x6] sm:$0xff]  ;;  %v485_v42 = vld [vmem:[#allocation4 + $0x18] sm:$0xff]  ;;  %v445_v8 = vadd.f32 %v441_v39, %v431_v33  ;;  %1647 = vrot.lane.b32.xlu1 %v2564_v60, %s2376_s25 }
 0x122   :  { %612 = vst.msk [vmem:[#allocation4 + $0x8] sm:$0xff] %vm98_vm0, %v2723_v35  ;;  %v2775_v35 = vstv %s2738_s0  ;;  %1643 = vrot.lane.b32.xlu0 %v2562_v59, %s2376_s25  ;;  %v521_v54 = vadd.f32 %v517_v45, %v507_v43  ;;  %v491_v51 = vmul.f32 %v2706_v7, %v485_v42  ;;  %v446_v29 = vadd.f32 %v442_v50, %v432_v44  ;;  %s3090_s0 = sld [smem:[#allocation6 + $0x22]] }
 0x123   :  { %1515 = vrot.lane.b32.xlu2 %v2628_v56, %s2375_s24  ;;  %v594_v52 = vpop.permute.xlu1 %593  ;;  %v560_v53 = vmul.f32 %v2775_v35, %v554_v25  ;;  %v486_v0 = vld [vmem:[#allocation4 + $0x20] sm:$0xff]  ;;  %v559_v9 = vmul.f32 %v2775_v35, %v553_v24  ;;  %s2801_s24 = sld [smem:[#allocation6 + $0x18]]  ;;  %v2812_v24 = vstv %s2772_s23  ;;  %v573_v41 = vmul.f32 %v2789_v57, %v2760_v31 }
 0x124   :  { %v600_v49 = vpop.permute.xlu0 %599  ;;  %v535_v58 = vadd.f32 %v531_v30, %v521_v54  ;;  %v499_v11 = vld [vmem:[#allocation4 + $0x19] sm:$0xff]  ;;  %v500_v2 = vld [vmem:[#allocation4 + $0x21] sm:$0xff]  ;;  %611 = vst.msk [vmem:[#allocation4] sm:$0xff] %vm98_vm0, %v594_v52  ;;  %v495_v1 = vadd.f32 %v491_v51, %v445_v8  ;;  %v492_v4 = vmul.f32 %v2706_v7, %v486_v0  ;;  %v2825_v43 = vstv %s2782_s27  ;;  %s3119_s23 = sld [smem:[#allocation6 + $0x31]] }
 0x125   :  { %v513_v61 = vld [vmem:[#allocation4 + $0x1a] sm:$0xff]  ;;  %v505_v6 = vmul.f32 %v2717_v3, %v499_v11  ;;  %v2798_v55 = vpop.permute.xlu2 %729  ;;  %v564_v12 = vadd.f32 %v560_v53, %v550_v14  ;;  %v514_v13 = vld [vmem:[#allocation4 + $0x22] sm:$0xff]  ;;  %v506_v16 = vmul.f32 %v2717_v3, %v500_v2  ;;  %s3150_s27 = sld [smem:[#allocation6 + $0x38]] }
 0x126   :  { %v527_v5 = vld [vmem:[#allocation4 + $0x1b] sm:$0xff]  ;;  %v549_v10 = vadd.f32 %v545_v63, %v535_v58  ;;  %v496_v34 = vadd.f32 %v492_v4, %v446_v29  ;;  %v519_v19 = vmul.f32 %v2730_v48, %v513_v61  ;;  %v528_v22 = vld [vmem:[#allocation4 + $0x23] sm:$0xff]  ;;  %v520_v28 = vmul.f32 %v2730_v48, %v514_v13 }
 0x127   :  { %v541_v15 = vld [vmem:[#allocation4 + $0x1c] sm:$0xff]  ;;  %v509_v18 = vadd.f32 %v505_v6, %v495_v1  ;;  %v542_v47 = vld [vmem:[#allocation4 + $0x24] sm:$0xff]  ;;  %v533_v37 = vmul.f32 %v2736_v62, %v527_v5  ;;  %v578_v38 = vadd.f32 %v574_v21, %v564_v12  ;;  %v534_v52 = vmul.f32 %v2736_v62, %v528_v22 }
 0x128   :  { %v555_v17 = vld [vmem:[#allocation4 + $0x1d] sm:$0xff]  ;;  %v563_v20 = vadd.f32 %v559_v9, %v549_v10  ;;  %v510_v27 = vadd.f32 %v506_v16, %v496_v34  ;;  %v2816_v32 = vld [vmem:[#allocation4 + $0x25] sm:$0xff]  ;;  %v547_v8 = vmul.f32 %v2757_v26, %v541_v15  ;;  %v2838_v58 = vstv %s2793_s28  ;;  %s3167_s28 = sld [smem:[#allocation6 + $0x3f]] }
 0x129   :  { %v2804_v7 = vld [vmem:[#allocation4 + $0x1e] sm:$0xff]  ;;  %v1634_v3 = vld [vmem:[#allocation3 + $0x28] sm:$0x3f]  ;;  %v2818_v33 = vld [vmem:[#allocation4 + $0x26] sm:$0xff]  ;;  %v523_v36 = vadd.f32 %v519_v19, %v509_v18  ;;  %v561_v4 = vmul.f32 %v2775_v35, %v555_v17  ;;  %v2850_v9 = vstv %s2801_s24  ;;  %v548_v18 = vmul.f32 %v2757_v26, %v542_v47  ;;  %s3171_s24 = sld [smem:[#allocation6 + $0x46]] }
 0x12a   :  { %614 = vst.msk [vmem:[#allocation4 + $0x18] sm:$0xff] %vm98_vm0, %v600_v49  ;;  %v1631_v25 = vld [vmem:[#allocation3 + $0x10] sm:$0x3f]  ;;  %v632_v39 = vld [vmem:[#allocation4 + $0x9] sm:$0xff]  ;;  %1651 = vrot.lane.b32.xlu1 %v1634_v3, %s2376_s25  ;;  %v524_v48 = vadd.f32 %v520_v28, %v510_v27  ;;  %v577_v49 = vadd.f32 %v573_v41, %v563_v20  ;;  %v575_v34 = vmul.f32 %v2789_v57, %v2804_v7  ;;  %v2863_v20 = vstv %s2807_s30  ;;  %s3179_s30 = sld [smem:[#allocation6 + $0x4d]] }
 0x12b   :  { %1645 = vrot.lane.b32.xlu0 %v1631_v25, %s2376_s25  ;;  %v646_v40 = vld [vmem:[#allocation4 + $0xa] sm:$0xff]  ;;  %v537_v44 = vadd.f32 %v533_v37, %v523_v36  ;;  %v617_v31 = vld [vmem:[#allocation4] sm:$0xff]  ;;  %1641 = vrot.lane.b32.xlu2 %v2590_v23, %s2376_s25  ;;  %v602_v51 = vpop.permute.xlu1 %601  ;;  %v638_v5 = vmul.f32 %v2825_v43, %v632_v39  ;;  %v2872_v27 = vstv %s2827_s4  ;;  %v562_v39 = vmul.f32 %v2775_v35, %v2816_v32  ;;  %s3187_s4 = sld [smem:[#allocation6 + $0x54]] }
 0x12c   :  { %v618_v42 = vld [vmem:[#allocation4 + $0x8] sm:$0xff]  ;;  %v604_v50 = vpop.permute.xlu0 %603  ;;  %v623_v63 = vmul.f32 %v2812_v24, %v617_v31  ;;  %615 = vst.msk [vmem:[#allocation4 + $0x20] sm:$0xff] %vm98_vm0, %v602_v51  ;;  %v538_v10 = vadd.f32 %v534_v52, %v524_v48  ;;  %v652_v17 = vmul.f32 %v2838_v58, %v646_v40  ;;  %v2884_v40 = vstv %s2832_s5  ;;  %s3196_s5 = sld [smem:[#allocation6 + $0x5b]] }
 0x12d   :  { %v660_v45 = vld [vmem:[#allocation4 + $0xb] sm:$0xff]  ;;  %v624_v54 = vmul.f32 %v2812_v24, %v618_v42  ;;  %v631_v30 = vld [vmem:[#allocation4 + $0x1] sm:$0xff]  ;;  %616 = vst.msk [vmem:[#allocation4 + $0x28] sm:$0x3f] %vm210_vm7, %v604_v50  ;;  %v551_v1 = vadd.f32 %v547_v8, %v537_v44  ;;  %v732_v6 = vpop.permute.xlu2 %731 }
 0x12e   :  { %v674_v46 = vld [vmem:[#allocation4 + $0xc] sm:$0xff]  ;;  %v645_v14 = vld [vmem:[#allocation4 + $0x2] sm:$0xff]  ;;  %v627_v12 = vadd.f32 %v623_v63, %v577_v49  ;;  %v637_v13 = vmul.f32 %v2825_v43, %v631_v30  ;;  %v666_v7 = vmul.f32 %v2850_v9, %v660_v45  ;;  %v552_v3 = vadd.f32 %v548_v18, %v538_v10 }
 0x12f   :  { %v659_v53 = vld [vmem:[#allocation4 + $0x3] sm:$0xff]  ;;  %v688_v2 = vld [vmem:[#allocation4 + $0xd] sm:$0xff]  ;;  %v628_v61 = vadd.f32 %v624_v54, %v578_v38  ;;  %v565_v15 = vadd.f32 %v561_v4, %v551_v1  ;;  %v680_v37 = vmul.f32 %v2863_v20, %v674_v46  ;;  %v2898_v63 = vstv %s2855_s6  ;;  %s3202_s6 = sld [smem:[#allocation6 + $0x32]] }
 0x130   :  { %v673_v0 = vld [vmem:[#allocation4 + $0x4] sm:$0xff]  ;;  %v2842_v29 = vld [vmem:[#allocation4 + $0xe] sm:$0xff]  ;;  %v641_v21 = vadd.f32 %v637_v13, %v627_v12  ;;  %v665_v28 = vmul.f32 %v2850_v9, %v659_v53  ;;  %v694_v31 = vmul.f32 %v2872_v27, %v688_v2  ;;  %v566_v51 = vadd.f32 %v562_v39, %v552_v3 }
 0x131   :  { %v687_v11 = vld [vmem:[#allocation4 + $0x5] sm:$0xff]  ;;  %v642_v16 = vadd.f32 %v638_v5, %v628_v61  ;;  %747 = vst.msk [vmem:[#allocation4 + $0x10] sm:$0x3f] %vm210_vm7, %v732_v6  ;;  %v619_v19 = vld [vmem:[#allocation4 + $0x18] sm:$0xff]  ;;  %v579_v22 = vadd.f32 %v575_v34, %v565_v15  ;;  %v679_v48 = vmul.f32 %v2863_v20, %v673_v0  ;;  %v708_v0 = vmul.f32 %v2884_v40, %v2842_v29 }
 0x132   :  { %v2846_v62 = vld [vmem:[#allocation4 + $0x6] sm:$0xff]  ;;  %1781 = vrot.lane.b32.xlu1 %v2564_v60, %s2377_s26  ;;  %v625_v47 = vmul.f32 %v2812_v24, %v619_v19  ;;  %v693_v52 = vmul.f32 %v2872_v27, %v687_v11  ;;  %v1765_v4 = vld [vmem:[#allocation3 + $0x10] sm:$0x3f]  ;;  %v1768_v61 = vld [vmem:[#allocation3 + $0x28] sm:$0x3f]  ;;  %v576_v5 = vmul.f32 %v2789_v57, %v2818_v33  ;;  %v2909_v12 = vstv %s2866_s1  ;;  %s3254_s1 = sld [smem:[#allocation6 + $0x39]] }
 0x133   :  { %746 = vst.msk [vmem:[#allocation4 + $0x8] sm:$0xff] %vm98_vm0, %v2798_v55  ;;  %v651_v55 = vmul.f32 %v2838_v58, %v645_v14  ;;  %v656_v25 = vadd.f32 %v652_v17, %v642_v16  ;;  %1777 = vrot.lane.b32.xlu0 %v2562_v59, %s2377_s26  ;;  %1649 = vrot.lane.b32.xlu2 %v2628_v56, %s2376_s25  ;;  %v728_v38 = vpop.permute.xlu1 %727  ;;  %v633_v45 = vld [vmem:[#allocation4 + $0x19] sm:$0xff]  ;;  %s2904_s25 = sld [smem:[#allocation6 + $0x19]] }
 0x134   :  { %v734_v41 = vpop.permute.xlu0 %733  ;;  %v647_v44 = vld [vmem:[#allocation4 + $0x1a] sm:$0xff]  ;;  %745 = vst.msk [vmem:[#allocation4] sm:$0xff] %vm98_vm0, %v728_v38  ;;  %v629_v46 = vadd.f32 %v625_v47, %v579_v22  ;;  %v639_v30 = vmul.f32 %v2825_v43, %v633_v45  ;;  %v648_v17 = vld [vmem:[#allocation4 + $0x22] sm:$0xff]  ;;  %v580_v57 = vadd.f32 %v576_v5, %v566_v51  ;;  %v707_v33 = vmul.f32 %v2884_v40, %v2846_v62 }
 0x135   :  { %v655_v26 = vadd.f32 %v651_v55, %v641_v21  ;;  %v670_v36 = vadd.f32 %v666_v7, %v656_v25  ;;  %v661_v8 = vld [vmem:[#allocation4 + $0x1b] sm:$0xff]  ;;  %v2894_v50 = vpop.permute.xlu2 %861  ;;  %v653_v1 = vmul.f32 %v2838_v58, %v647_v44  ;;  %v662_v18 = vld [vmem:[#allocation4 + $0x23] sm:$0xff] }
 0x136   :  { %v675_v35 = vld [vmem:[#allocation4 + $0x1c] sm:$0xff]  ;;  %v643_v2 = vadd.f32 %v639_v30, %v629_v46  ;;  %v667_v34 = vmul.f32 %v2850_v9, %v661_v8  ;;  %v2916_v19 = vld [vmem:[#allocation4 + $0x24] sm:$0xff] }
 0x137   :  { %v669_v42 = vadd.f32 %v665_v28, %v655_v26  ;;  %v684_v54 = vadd.f32 %v680_v37, %v670_v36  ;;  %v689_v32 = vld [vmem:[#allocation4 + $0x1d] sm:$0xff]  ;;  %v681_v55 = vmul.f32 %v2863_v20, %v675_v35  ;;  %v2924_v22 = vld [vmem:[#allocation4 + $0x25] sm:$0xff] }
 0x138   :  { %v2892_v14 = vld [vmem:[#allocation4 + $0x1e] sm:$0xff]  ;;  %v657_v29 = vadd.f32 %v653_v1, %v643_v2  ;;  %v2926_v25 = vld [vmem:[#allocation4 + $0x26] sm:$0xff] }
 0x139   :  { %v683_v49 = vadd.f32 %v679_v48, %v669_v42  ;;  %748 = vst.msk [vmem:[#allocation4 + $0x18] sm:$0xff] %vm98_vm0, %v734_v41  ;;  %v698_v53 = vadd.f32 %v694_v31, %v684_v54  ;;  %v634_v13 = vld [vmem:[#allocation4 + $0x21] sm:$0xff]  ;;  %v695_v42 = vmul.f32 %v2872_v27, %v689_v32  ;;  %v2938_v48 = vstv %s2887_s7  ;;  %v1898_v5 = vld [vmem:[#allocation3 + $0x8] sm:$0xff]  ;;  %s3258_s7 = sld [smem:[#allocation6 + $0x40]] }
 0x13a   :  { %v766_v11 = vld [vmem:[#allocation4 + $0x9] sm:$0xff]  ;;  %1785 = vrot.lane.b32.xlu1 %v1768_v61, %s2377_s26  ;;  %v620_v7 = vld [vmem:[#allocation4 + $0x20] sm:$0xff]  ;;  %v671_v3 = vadd.f32 %v667_v34, %v657_v29  ;;  %v640_v30 = vmul.f32 %v2825_v43, %v634_v13  ;;  %v668_v13 = vmul.f32 %v2850_v9, %v662_v18 }
 0x13b   :  { %v697_v6 = vadd.f32 %v693_v52, %v683_v49  ;;  %v752_v10 = vld [vmem:[#allocation4 + $0x8] sm:$0xff]  ;;  %v712_v15 = vadd.f32 %v708_v0, %v698_v53  ;;  %1779 = vrot.lane.b32.xlu0 %v1765_v4, %s2377_s26  ;;  %v751_v28 = vld [vmem:[#allocation4] sm:$0xff]  ;;  %v772_v36 = vmul.f32 %v2909_v12, %v766_v11  ;;  %1775 = vrot.lane.b32.xlu2 %v2590_v23, %s2377_s26  ;;  %v736_v41 = vpop.permute.xlu1 %735  ;;  %v2956_v4 = vstv %s2904_s25  ;;  %s3264_s25 = sld [smem:[#allocation6 + $0x47]] }
 0x13c   :  { %v758_v16 = vmul.f32 %v2898_v63, %v752_v10  ;;  %v780_v21 = vld [vmem:[#allocation4 + $0xa] sm:$0xff]  ;;  %v765_v47 = vld [vmem:[#allocation4 + $0x1] sm:$0xff]  ;;  %v738_v37 = vpop.permute.xlu0 %737  ;;  %v626_v38 = vmul.f32 %v2812_v24, %v620_v7  ;;  %v757_v45 = vmul.f32 %v2898_v63, %v751_v28  ;;  %v685_v54 = vadd.f32 %v681_v55, %v671_v3  ;;  %749 = vst.msk [vmem:[#allocation4 + $0x20] sm:$0xff] %vm98_vm0, %v736_v41 }
 0x13d   :  { %v779_v62 = vld [vmem:[#allocation4 + $0x2] sm:$0xff]  ;;  %v711_v39 = vadd.f32 %v707_v33, %v697_v6  ;;  %750 = vst.msk [vmem:[#allocation4 + $0x28] sm:$0x3f] %vm210_vm7, %v738_v37  ;;  %v771_v51 = vmul.f32 %v2909_v12, %v765_v47  ;;  %v2951_v49 = vpop.permute.xlu2 %869  ;;  %v654_v0 = vmul.f32 %v2838_v58, %v648_v17  ;;  %v786_v2 = vmul.f32 %v2938_v48, %v780_v21  ;;  %v794_v1 = vld [vmem:[#allocation4 + $0xb] sm:$0xff] }
 0x13e   :  { %v762_v26 = vadd.f32 %v758_v16, %v712_v15  ;;  %v793_v44 = vld [vmem:[#allocation4 + $0x3] sm:$0xff]  ;;  %v630_v24 = vadd.f32 %v626_v38, %v580_v57  ;;  %v699_v52 = vadd.f32 %v695_v42, %v685_v54  ;;  %v785_v43 = vmul.f32 %v2938_v48, %v779_v62  ;;  %v836_v33 = vld [vmem:[#allocation4 + $0xe] sm:$0xff] }
 0x13f   :  { %v807_v8 = vld [vmem:[#allocation4 + $0x4] sm:$0xff]  ;;  %v761_v32 = vadd.f32 %v757_v45, %v711_v39  ;;  %v2960_v6 = vstv %s2911_s8  ;;  %v709_v11 = vmul.f32 %v2884_v40, %v2892_v14  ;;  %v799_v16 = vmul.f32 %v2956_v4, %v793_v44  ;;  %v822_v14 = vld [vmem:[#allocation4 + $0xd] sm:$0xff]  ;;  %s3270_s8 = sld [smem:[#allocation6 + $0x4e]] }
 0x140   :  { %v2941_v46 = vld [vmem:[#allocation4 + $0x5] sm:$0xff]  ;;  %v776_v35 = vadd.f32 %v772_v36, %v762_v26  ;;  %v644_v53 = vadd.f32 %v640_v30, %v630_v24  ;;  %v753_v29 = vld [vmem:[#allocation4 + $0x18] sm:$0xff]  ;;  %v2971_v17 = vstv %s2918_s9  ;;  %v2974_v57 = vstv %s2928_s10  ;;  %s3276_s9 = sld [smem:[#allocation6 + $0x55]] }
 0x141   :  { %v2944_v31 = vld [vmem:[#allocation4 + $0x6] sm:$0xff]  ;;  %v775_v61 = vadd.f32 %v771_v51, %v761_v32  ;;  %v713_v21 = vadd.f32 %v709_v11, %v699_v52  ;;  %v682_v7 = vmul.f32 %v2863_v20, %v2916_v19  ;;  %v800_v3 = vmul.f32 %v2956_v4, %v794_v1  ;;  %v1899_v38 = vld [vmem:[#allocation3 + $0x10] sm:$0x3f]  ;;  %v1902_v11 = vld [vmem:[#allocation3 + $0x28] sm:$0x3f]  ;;  %s3284_s10 = sld [smem:[#allocation6 + $0x5c]] }
 0x142   :  { %879 = vst.msk [vmem:[#allocation4] sm:$0xff] %vm98_vm0, %v2894_v50  ;;  %v808_v50 = vld [vmem:[#allocation4 + $0xc] sm:$0xff]  ;;  %v658_v10 = vadd.f32 %v654_v0, %v644_v53  ;;  %v790_v15 = vadd.f32 %v786_v2, %v776_v35  ;;  %v813_v28 = vmul.f32 %v2960_v6, %v807_v8  ;;  %v2989_v36 = vstv %s2934_s11  ;;  %s3294_s11 = sld [smem:[#allocation6 + $0x33]] }
 0x143   :  { %1911 = vrot.lane.b32.xlu0 %v1898_v5, %s2378_s29  ;;  %v1900_v58 = vld [vmem:[#allocation3 + $0x18] sm:$0xff]  ;;  %v789_v34 = vadd.f32 %v785_v43, %v775_v61  ;;  %1783 = vrot.lane.b32.xlu2 %v2628_v56, %s2377_s26  ;;  %v868_v18 = vpop.permute.xlu1 %867  ;;  %v814_v47 = vmul.f32 %v2960_v6, %v808_v50  ;;  %s2991_s26 = sld [smem:[#allocation6 + $0x21]]  ;;  %v759_v62 = vmul.f32 %v2898_v63, %v753_v29  ;;  %v754_v54 = vld [vmem:[#allocation4 + $0x20] sm:$0xff] }
 0x144   :  { %1915 = vrot.lane.b32.xlu1 %v1900_v58, %s2378_s29  ;;  %v864_v9 = vpop.permute.xlu0 %863  ;;  %v672_v55 = vadd.f32 %v668_v13, %v658_v10  ;;  %v768_v37 = vld [vmem:[#allocation4 + $0x21] sm:$0xff]  ;;  %v696_v20 = vmul.f32 %v2872_v27, %v2924_v22  ;;  %v804_v19 = vadd.f32 %v800_v3, %v790_v15  ;;  %v710_v8 = vmul.f32 %v2884_v40, %v2926_v25  ;;  %v767_v24 = vld [vmem:[#allocation4 + $0x19] sm:$0xff] }
 0x145   :  { %v803_v26 = vadd.f32 %v799_v16, %v789_v34  ;;  %880 = vst.msk [vmem:[#allocation4 + $0x8] sm:$0xff] %vm98_vm0, %v864_v9  ;;  %v2996_v39 = vld [vmem:[#allocation4 + $0x22] sm:$0xff]  ;;  %v781_v30 = vld [vmem:[#allocation4 + $0x1a] sm:$0xff]  ;;  %v827_v27 = vmul.f32 %v2971_v17, %v2941_v46  ;;  %v828_v22 = vmul.f32 %v2971_v17, %v822_v14  ;;  %v763_v32 = vadd.f32 %v759_v62, %v713_v21  ;;  %v996_v2 = vpop.permute.xlu2 %995 }
 0x146   :  { %v686_v41 = vadd.f32 %v682_v7, %v672_v55  ;;  %v2998_v42 = vld [vmem:[#allocation4 + $0x23] sm:$0xff]  ;;  %v760_v52 = vmul.f32 %v2898_v63, %v754_v54  ;;  %v773_v53 = vmul.f32 %v2909_v12, %v767_v24  ;;  %v795_v0 = vld [vmem:[#allocation4 + $0x1b] sm:$0xff]  ;;  %v841_v43 = vmul.f32 %v2974_v57, %v2944_v31  ;;  %v1897_v31 = vld [vmem:[#allocation3] sm:$0xff] }
 0x147   :  { %v3000_v45 = vld [vmem:[#allocation4 + $0x24] sm:$0xff]  ;;  %v817_v35 = vadd.f32 %v813_v28, %v803_v26  ;;  %v809_v40 = vld [vmem:[#allocation4 + $0x1c] sm:$0xff]  ;;  %v3020_v5 = vmul.f32 %v2974_v57, %v836_v33  ;;  %v3023_v63 = vstv %s2962_s12  ;;  %v787_v13 = vmul.f32 %v2938_v48, %v781_v30  ;;  %s3331_s12 = sld [smem:[#allocation6 + $0x3a]] }
 0x148   :  { %v3002_v44 = vld [vmem:[#allocation4 + $0x25] sm:$0xff]  ;;  %v700_v51 = vadd.f32 %v696_v20, %v686_v41  ;;  %v823_v25 = vld [vmem:[#allocation4 + $0x1d] sm:$0xff]  ;;  %v777_v10 = vadd.f32 %v773_v53, %v763_v32  ;;  %v818_v15 = vadd.f32 %v814_v47, %v804_v19  ;;  %v774_v29 = vmul.f32 %v2909_v12, %v768_v37 }
 0x149   :  { %v3015_v1 = vld [vmem:[#allocation4 + $0x26] sm:$0xff]  ;;  %v831_v46 = vadd.f32 %v827_v27, %v817_v35  ;;  %v837_v61 = vld [vmem:[#allocation4 + $0x1e] sm:$0xff]  ;;  %v801_v55 = vmul.f32 %v2956_v4, %v795_v0  ;;  %v3047_v47 = vstv %s2983_s14  ;;  %v3052_v37 = vstv %s2991_s26  ;;  %s3339_s14 = sld [smem:[#allocation6 + $0x48]] }
 0x14a   :  { %v885_v50 = vld [vmem:[#allocation4] sm:$0xff]  ;;  %v714_v58 = vadd.f32 %v710_v8, %v700_v51  ;;  %882 = vst.msk [vmem:[#allocation4 + $0x18] sm:$0xff] %vm98_vm0, %v868_v18  ;;  %v791_v9 = vadd.f32 %v787_v13, %v777_v10  ;;  %v3040_v18 = vstv %s2976_s13  ;;  %v788_v20 = vmul.f32 %v2938_v48, %v2996_v39  ;;  %s3334_s13 = sld [smem:[#allocation6 + $0x41]] }
 0x14b   :  { %1913 = vrot.lane.b32.xlu0 %v1899_v38, %s2378_s29  ;;  %v845_v34 = vadd.f32 %v841_v43, %v831_v46  ;;  %v891_v16 = vmul.f32 %v2989_v36, %v885_v50  ;;  %1909 = vrot.lane.b32.xlu2 %v1897_v31, %s2378_s29  ;;  %v872_v33 = vpop.permute.xlu1 %871  ;;  %883 = vst.msk [vmem:[#allocation4 + $0x20] sm:$0xff] %vm98_vm0, %v2951_v49  ;;  %v3066_v27 = vstv %s3009_s15  ;;  %v3074_v0 = vstv %s3013_s16  ;;  %s3345_s26 = sld [smem:[#allocation6 + $0x4f]] }
 0x14c   :  { %1919 = vrot.lane.b32.xlu1 %v1902_v11, %s2378_s29  ;;  %v866_v14 = vpop.permute.xlu0 %865  ;;  %v764_v21 = vadd.f32 %v760_v52, %v714_v58  ;;  %v899_v12 = vld [vmem:[#allocation4 + $0x1] sm:$0xff]  ;;  %884 = vst.msk [vmem:[#allocation4 + $0x28] sm:$0x3f] %vm210_vm7, %v872_v33  ;;  %v805_v19 = vadd.f32 %v801_v55, %v791_v9  ;;  %v815_v38 = vmul.f32 %v2960_v6, %v809_v40  ;;  %s3351_s15 = sld [smem:[#allocation6 + $0x56]] }
 0x14d   :  { %v913_v7 = vld [vmem:[#allocation4 + $0x2] sm:$0xff]  ;;  %881 = vst.msk [vmem:[#allocation4 + $0x10] sm:$0x3f] %vm210_vm7, %v866_v14  ;;  %v895_v3 = vadd.f32 %v891_v16, %v845_v34  ;;  %v905_v26 = vmul.f32 %v3023_v63, %v899_v12  ;;  %v832_v24 = vadd.f32 %v828_v22, %v818_v15  ;;  %v802_v48 = vmul.f32 %v2956_v4, %v2998_v42  ;;  %v3082_v11 = vpop.permute.xlu2 %1003  ;;  %v1901_v4 = vld [vmem:[#allocation3 + $0x20] sm:$0xff]  ;;  %s3357_s16 = sld [smem:[#allocation6 + $0x5d]] }
 0x14e   :  { %v927_v28 = vld [vmem:[#allocation4 + $0x3] sm:$0xff]  ;;  %v778_v41 = vadd.f32 %v774_v29, %v764_v21  ;;  %v919_v35 = vmul.f32 %v3040_v18, %v913_v7  ;;  %v819_v39 = vadd.f32 %v815_v38, %v805_v19  ;;  %v829_v51 = vmul.f32 %v2971_v17, %v823_v25 }
 0x14f   :  { %v3049_v62 = vld [vmem:[#allocation4 + $0x4] sm:$0xff]  ;;  %v909_v30 = vadd.f32 %v905_v26, %v895_v3  ;;  %v3077_v22 = vstv %s3025_s17  ;;  %v816_v46 = vmul.f32 %v2960_v6, %v3000_v45  ;;  %v830_v42 = vmul.f32 %v2971_v17, %v3002_v44  ;;  %s3365_s17 = sld [smem:[#allocation6 + $0x34]] }
 0x150   :  { %v3054_v49 = vld [vmem:[#allocation4 + $0x5] sm:$0xff]  ;;  %v792_v32 = vadd.f32 %v788_v20, %v778_v41  ;;  %v833_v43 = vadd.f32 %v829_v51, %v819_v39  ;;  %v844_v25 = vmul.f32 %v2974_v57, %v3015_v1  ;;  %v846_v58 = vadd.f32 %v3020_v5, %v832_v24 }
 0x151   :  { %v886_v8 = vld [vmem:[#allocation4 + $0x8] sm:$0xff]  ;;  %v923_v53 = vadd.f32 %v919_v35, %v909_v30  ;;  %v887_v50 = vld [vmem:[#allocation4 + $0x18] sm:$0xff]  ;;  %v933_v13 = vmul.f32 %v3047_v47, %v927_v28  ;;  %v3099_v21 = vstv %s3042_s19  ;;  %v3105_v28 = vstv %s3062_s20  ;;  %s3405_s19 = sld [smem:[#allocation6 + $0x42]] }
 0x152   :  { %v3060_v54 = vld [vmem:[#allocation4 + $0x6] sm:$0xff]  ;;  %v892_v52 = vmul.f32 %v2989_v36, %v886_v8  ;;  %v806_v40 = vadd.f32 %v802_v48, %v792_v32  ;;  %v901_v10 = vld [vmem:[#allocation4 + $0x19] sm:$0xff]  ;;  %v893_v17 = vmul.f32 %v2989_v36, %v887_v50  ;;  %v947_v24 = vmul.f32 %v3052_v37, %v3049_v62  ;;  %s3412_s20 = sld [smem:[#allocation6 + $0x49]] }
 0x153   :  { %1013 = vst.msk [vmem:[#allocation4] sm:$0xff] %vm98_vm0, %v996_v2  ;;  %v843_v2 = vmul.f32 %v2974_v57, %v837_v61  ;;  %1917 = vrot.lane.b32.xlu2 %v1901_v4, %s2378_s29  ;;  %v1002_v45 = vpop.permute.xlu1 %1001  ;;  %v888_v31 = vld [vmem:[#allocation4 + $0x20] sm:$0xff]  ;;  %v3095_v57 = vstv %s3033_s18  ;;  %v937_v33 = vadd.f32 %v933_v13, %v923_v53  ;;  %s3101_s29 = sld [smem:[#allocation6 + $0x29]]  ;;  %v907_v12 = vmul.f32 %v3023_v63, %v901_v10 }
 0x154   :  { %v998_v6 = vpop.permute.xlu0 %997  ;;  %v820_v61 = vadd.f32 %v816_v46, %v806_v40  ;;  %v900_v44 = vld [vmem:[#allocation4 + $0x9] sm:$0xff]  ;;  %v896_v1 = vadd.f32 %v892_v52, %v846_v58  ;;  %v902_v5 = vld [vmem:[#allocation4 + $0x21] sm:$0xff]  ;;  %v894_v41 = vmul.f32 %v2989_v36, %v888_v31  ;;  %v961_v62 = vmul.f32 %v3066_v27, %v3054_v49  ;;  %s3402_s18 = sld [smem:[#allocation6 + $0x3b]] }
 0x155   :  { %v847_v15 = vadd.f32 %v843_v2, %v833_v43  ;;  %v914_v29 = vld [vmem:[#allocation4 + $0xa] sm:$0xff]  ;;  %v906_v34 = vmul.f32 %v3023_v63, %v900_v44  ;;  %v915_v16 = vld [vmem:[#allocation4 + $0x1a] sm:$0xff]  ;;  %v916_v7 = vld [vmem:[#allocation4 + $0x22] sm:$0xff]  ;;  %v908_v32 = vmul.f32 %v3023_v63, %v902_v5  ;;  %v951_v46 = vadd.f32 %v947_v24, %v937_v33  ;;  %v3133_v44 = vpop.permute.xlu2 %1239 }
 0x156   :  { %v928_v14 = vld [vmem:[#allocation4 + $0xb] sm:$0xff]  ;;  %v834_v9 = vadd.f32 %v830_v42, %v820_v61  ;;  %v929_v3 = vld [vmem:[#allocation4 + $0x1b] sm:$0xff]  ;;  %v920_v19 = vmul.f32 %v3040_v18, %v914_v29  ;;  %v930_v38 = vld [vmem:[#allocation4 + $0x23] sm:$0xff]  ;;  %v921_v39 = vmul.f32 %v3040_v18, %v915_v16  ;;  %v3129_v13 = vstv %s3090_s0  ;;  %s3420_s0 = sld [smem:[#allocation6 + $0x50]] }
 0x157   :  { %v897_v55 = vadd.f32 %v893_v17, %v847_v15  ;;  %v942_v26 = vld [vmem:[#allocation4 + $0xc] sm:$0xff]  ;;  %v910_v20 = vadd.f32 %v906_v34, %v896_v1  ;;  %v943_v8 = vld [vmem:[#allocation4 + $0x1c] sm:$0xff]  ;;  %v944_v51 = vld [vmem:[#allocation4 + $0x24] sm:$0xff]  ;;  %v934_v40 = vmul.f32 %v3047_v47, %v928_v14  ;;  %v935_v42 = vmul.f32 %v3047_v47, %v929_v3 }
 0x158   :  { %v956_v30 = vld [vmem:[#allocation4 + $0xd] sm:$0xff]  ;;  %v848_v35 = vadd.f32 %v844_v25, %v834_v9  ;;  %v958_v52 = vld [vmem:[#allocation4 + $0x25] sm:$0xff]  ;;  %v957_v43 = vld [vmem:[#allocation4 + $0x1d] sm:$0xff]  ;;  %v975_v25 = vmul.f32 %v3074_v0, %v3060_v54  ;;  %v948_v10 = vmul.f32 %v3052_v37, %v942_v26  ;;  %v965_v49 = vadd.f32 %v961_v62, %v951_v46 }
 0x159   :  { %v911_v48 = vadd.f32 %v907_v12, %v897_v55  ;;  %v970_v36 = vld [vmem:[#allocation4 + $0xe] sm:$0xff]  ;;  %v924_v53 = vadd.f32 %v920_v19, %v910_v20  ;;  %v971_v2 = vld [vmem:[#allocation4 + $0x1e] sm:$0xff]  ;;  %v972_v50 = vld [vmem:[#allocation4 + $0x26] sm:$0xff]  ;;  %v922_v31 = vmul.f32 %v3040_v18, %v916_v7  ;;  %v949_v54 = vmul.f32 %v3052_v37, %v943_v8 }
 0x15a   :  { %1014 = vst.msk [vmem:[#allocation4 + $0x8] sm:$0xff] %vm98_vm0, %v998_v6  ;;  %v898_v63 = vadd.f32 %v894_v41, %v848_v35  ;;  %v962_v1 = vmul.f32 %v3066_v27, %v956_v30  ;;  %v979_v5 = vadd.f32 %v975_v25, %v965_v49  ;;  %v936_v16 = vmul.f32 %v3047_v47, %v930_v38 }
 0x15b   :  { %v925_v4 = vadd.f32 %v921_v39, %v911_v48  ;;  %1016 = vst.msk [vmem:[#allocation4 + $0x18] sm:$0xff] %vm98_vm0, %v1002_v45  ;;  %v938_v58 = vadd.f32 %v934_v40, %v924_v53  ;;  %v1006_v61 = vpop.permute.xlu1 %1005  ;;  %v1019_v45 = vld [vmem:[#allocation4] sm:$0xff]  ;;  %v963_v18 = vmul.f32 %v3066_v27, %v957_v43  ;;  %v976_v9 = vmul.f32 %v3074_v0, %v970_v36 }
 0x15c   :  { %1017 = vst.msk [vmem:[#allocation4 + $0x20] sm:$0xff] %vm98_vm0, %v3082_v11  ;;  %v1000_v6 = vpop.permute.xlu0 %999  ;;  %v912_v15 = vadd.f32 %v908_v32, %v898_v63  ;;  %v3138_v11 = vstv %s3101_s29  ;;  %v1025_v55 = vmul.f32 %v3077_v22, %v1019_v45  ;;  %v3146_v12 = vstv %s3111_s2  ;;  %s3426_s29 = sld [smem:[#allocation6 + $0x57]] }
 0x15d   :  { %v939_v17 = vadd.f32 %v935_v42, %v925_v4  ;;  %v952_v29 = vadd.f32 %v948_v10, %v938_v58  ;;  %1015 = vst.msk [vmem:[#allocation4 + $0x10] sm:$0x3f] %vm210_vm7, %v1000_v6  ;;  %v950_v3 = vmul.f32 %v3052_v37, %v944_v51  ;;  %v977_v41 = vmul.f32 %v3074_v0, %v971_v2  ;;  %s3432_s2 = sld [smem:[#allocation6 + $0x5e]] }
 0x15e   :  { %v926_v34 = vadd.f32 %v922_v31, %v912_v15  ;;  %1018 = vst.msk [vmem:[#allocation4 + $0x28] sm:$0x3f] %vm210_vm7, %v1006_v61  ;;  %v1029_v24 = vadd.f32 %v1025_v55, %v979_v5  ;;  %v3154_v32 = vstv %s3119_s23  ;;  %v964_v39 = vmul.f32 %v3066_v27, %v958_v52  ;;  %s3438_s23 = sld [smem:[#allocation6 + $0x35]] }
 0x15f   :  { %v953_v14 = vadd.f32 %v949_v54, %v939_v17  ;;  %v966_v33 = vadd.f32 %v962_v1, %v952_v29  ;;  %v978_v40 = vmul.f32 %v3074_v0, %v972_v50 }
 0x160   :  { %v940_v7 = vadd.f32 %v936_v16, %v926_v34 }
 0x161   :  { %v967_v26 = vadd.f32 %v963_v18, %v953_v14  ;;  %v1020_v47 = vld [vmem:[#allocation4 + $0x8] sm:$0xff]  ;;  %v980_v38 = vadd.f32 %v976_v9, %v966_v33  ;;  %v1119_v18 = vld [vmem:[#allocation3 + $0x10] sm:$0x3f] }
 0x162   :  { %v1033_v20 = vld [vmem:[#allocation4 + $0x1] sm:$0xff]  ;;  %v1021_v8 = vld [vmem:[#allocation4 + $0x18] sm:$0xff]  ;;  %v954_v48 = vadd.f32 %v950_v3, %v940_v7  ;;  %v1026_v46 = vmul.f32 %v3077_v22, %v1020_v47 }
 0x163   :  { %v1047_v19 = vld [vmem:[#allocation4 + $0x2] sm:$0xff]  ;;  %v1039_v30 = vmul.f32 %v3095_v57, %v1033_v20  ;;  %v981_v37 = vadd.f32 %v977_v41, %v967_v26  ;;  %v1027_v36 = vmul.f32 %v3077_v22, %v1021_v8  ;;  %v1035_v53 = vld [vmem:[#allocation4 + $0x19] sm:$0xff]  ;;  %v3163_v42 = vpop.permute.xlu1 %1245 }
 0x164   :  { %v1061_v35 = vld [vmem:[#allocation4 + $0x3] sm:$0xff]  ;;  %v1049_v62 = vld [vmem:[#allocation4 + $0x1a] sm:$0xff]  ;;  %v1053_v2 = vmul.f32 %v3099_v21, %v1047_v19  ;;  %v3161_v4 = vpop.permute.xlu0 %1241  ;;  %v968_v25 = vadd.f32 %v964_v39, %v954_v48  ;;  %v1041_v58 = vmul.f32 %v3095_v57, %v1035_v53  ;;  %v1030_v6 = vadd.f32 %v1026_v46, %v980_v38  ;;  %v1062_v34 = vld [vmem:[#allocation4 + $0xb] sm:$0xff] }
 0x165   :  { %v1022_v51 = vld [vmem:[#allocation4 + $0x20] sm:$0xff]  ;;  %v1043_v43 = vadd.f32 %v1039_v30, %v1029_v24  ;;  %v1031_v27 = vadd.f32 %v1027_v36, %v981_v37  ;;  %v1034_v52 = vld [vmem:[#allocation4 + $0x9] sm:$0xff]  ;;  %v1067_v0 = vmul.f32 %v3105_v28, %v1061_v35  ;;  %v1055_v5 = vmul.f32 %v3099_v21, %v1049_v62 }
 0x166   :  { %v1075_v63 = vld [vmem:[#allocation4 + $0x4] sm:$0xff]  ;;  %v1063_v49 = vld [vmem:[#allocation4 + $0x1b] sm:$0xff]  ;;  %v1028_v50 = vmul.f32 %v3077_v22, %v1022_v51  ;;  %v1040_v15 = vmul.f32 %v3095_v57, %v1034_v52  ;;  %v982_v45 = vadd.f32 %v978_v40, %v968_v25  ;;  %v1076_v16 = vld [vmem:[#allocation4 + $0xc] sm:$0xff]  ;;  %v3175_v22 = vpop.permute.xlu2 %1247  ;;  %v3185_v24 = vstv %s3150_s27  ;;  %s3475_s27 = sld [smem:[#allocation6 + $0x3c]] }
 0x167   :  { %v1048_v10 = vld [vmem:[#allocation4 + $0xa] sm:$0xff]  ;;  %v1036_v61 = vld [vmem:[#allocation4 + $0x21] sm:$0xff]  ;;  %v1057_v31 = vadd.f32 %v1053_v2, %v1043_v43  ;;  %v1045_v1 = vadd.f32 %v1041_v58, %v1031_v27  ;;  %v1081_v26 = vmul.f32 %v3129_v13, %v1075_v63  ;;  %v1069_v20 = vmul.f32 %v3105_v28, %v1063_v49 }
 0x168   :  { %v1077_v17 = vld [vmem:[#allocation4 + $0x1c] sm:$0xff]  ;;  %v1089_v54 = vld [vmem:[#allocation4 + $0x5] sm:$0xff]  ;;  %v1042_v29 = vmul.f32 %v3095_v57, %v1036_v61  ;;  %v1090_v14 = vld [vmem:[#allocation4 + $0xd] sm:$0xff]  ;;  %v1044_v33 = vadd.f32 %v1040_v15, %v1030_v6  ;;  %v1054_v55 = vmul.f32 %v3099_v21, %v1048_v10  ;;  %v1032_v57 = vadd.f32 %v1028_v50, %v982_v45 }
 0x169   :  { %v1050_v9 = vld [vmem:[#allocation4 + $0x22] sm:$0xff]  ;;  %v1071_v3 = vadd.f32 %v1067_v0, %v1057_v31  ;;  %v1059_v47 = vadd.f32 %v1055_v5, %v1045_v1  ;;  %v1104_v38 = vld [vmem:[#allocation4 + $0xe] sm:$0xff]  ;;  %v1068_v35 = vmul.f32 %v3105_v28, %v1062_v34  ;;  %v1095_v51 = vmul.f32 %v3138_v11, %v1089_v54 }
 0x16a   :  { %v1064_v7 = vld [vmem:[#allocation4 + $0x23] sm:$0xff]  ;;  %v1058_v30 = vadd.f32 %v1054_v55, %v1044_v33  ;;  %v1046_v53 = vadd.f32 %v1042_v29, %v1032_v57  ;;  %v1056_v40 = vmul.f32 %v3099_v21, %v1050_v9  ;;  %v1083_v46 = vmul.f32 %v3129_v13, %v1077_v17  ;;  %1125 = vst.msk [vmem:[#allocation4 + $0x10] sm:$0x3f] %vm210_vm7, %v1119_v18 }
 0x16b   :  { %v1103_v41 = vld [vmem:[#allocation4 + $0x6] sm:$0xff]  ;;  %v1091_v19 = vld [vmem:[#allocation4 + $0x1d] sm:$0xff]  ;;  %v1085_v39 = vadd.f32 %v1081_v26, %v1071_v3  ;;  %v1070_v43 = vmul.f32 %v3105_v28, %v1064_v7  ;;  %v1082_v2 = vmul.f32 %v3129_v13, %v1076_v16  ;;  %v3206_v25 = vpop.permute.xlu1 %1249  ;;  %v3215_v49 = vstv %s3167_s28  ;;  %s3478_s28 = sld [smem:[#allocation6 + $0x43]] }
 0x16c   :  { %v1105_v8 = vld [vmem:[#allocation4 + $0x1e] sm:$0xff]  ;;  %1123 = vst.msk [vmem:[#allocation4] sm:$0xff] %vm98_vm0, %v2590_v23  ;;  %v1106_v36 = vld [vmem:[#allocation4 + $0x26] sm:$0xff]  ;;  %v1073_v23 = vadd.f32 %v1069_v20, %v1059_v47  ;;  %v1072_v62 = vadd.f32 %v1068_v35, %v1058_v30  ;;  %v3204_v21 = vpop.permute.xlu0 %1243  ;;  %v1060_v27 = vadd.f32 %v1056_v40, %v1046_v53  ;;  %v1097_v28 = vmul.f32 %v3138_v11, %v1091_v19 }
 0x16d   :  { %v1078_v48 = vld [vmem:[#allocation4 + $0x24] sm:$0xff]  ;;  %1124 = vst.msk [vmem:[#allocation4 + $0x8] sm:$0xff] %vm98_vm0, %v2562_v59  ;;  %v1099_v63 = vadd.f32 %v1095_v51, %v1085_v39  ;;  %v1122_v59 = vld [vmem:[#allocation3 + $0x28] sm:$0x3f]  ;;  %v1109_v58 = vmul.f32 %v3146_v12, %v1103_v41  ;;  %v3218_v0 = vstv %s3171_s24  ;;  %v1110_v17 = vmul.f32 %v3146_v12, %v1104_v38  ;;  %s3483_s24 = sld [smem:[#allocation6 + $0x4a]] }
 0x16e   :  { %v1092_v37 = vld [vmem:[#allocation4 + $0x25] sm:$0xff]  ;;  %1126 = vst.msk [vmem:[#allocation4 + $0x18] sm:$0xff] %vm98_vm0, %v2564_v60  ;;  %v1087_v52 = vadd.f32 %v1083_v46, %v1073_v23  ;;  %v1086_v10 = vadd.f32 %v1082_v2, %v1072_v62  ;;  %v1096_v60 = vmul.f32 %v3138_v11, %v1090_v14  ;;  %v1074_v50 = vadd.f32 %v1070_v43, %v1060_v27 }
 0x16f   :  { %1127 = vst.msk [vmem:[#allocation4 + $0x20] sm:$0xff] %vm98_vm0, %v2628_v56  ;;  %v1084_v6 = vmul.f32 %v3129_v13, %v1078_v48  ;;  %v1113_v15 = vadd.f32 %v1109_v58, %v1099_v63  ;;  %v1111_v56 = vmul.f32 %v3146_v12, %v1105_v8  ;;  %v3224_v45 = vstv %s3179_s30  ;;  %v3231_v13 = vpop.permute.xlu2 %1373  ;;  %s3491_s30 = sld [smem:[#allocation6 + $0x51]] }
 0x170   :  { %1128 = vst.msk [vmem:[#allocation4 + $0x28] sm:$0x3f] %vm210_vm7, %v1122_v59  ;;  %v1101_v61 = vadd.f32 %v1097_v28, %v1087_v52  ;;  %v1100_v31 = vadd.f32 %v1096_v60, %v1086_v10  ;;  %v1098_v1 = vmul.f32 %v3138_v11, %v1092_v37  ;;  %v3229_v14 = vstv %s3187_s4  ;;  %s3497_s4 = sld [smem:[#allocation6 + $0x58]] }
 0x171   :  { %v1088_v29 = vadd.f32 %v1084_v6, %v1074_v50  ;;  %v1112_v11 = vmul.f32 %v3146_v12, %v1106_v36  ;;  %v3237_v20 = vstv %s3196_s5  ;;  %v3242_v39 = vstv %s3202_s6  ;;  %s3503_s5 = sld [smem:[#allocation6 + $0x5f]] }
 0x172   :  { %v1114_v18 = vadd.f32 %v1110_v17, %v1100_v31  ;;  %v1115_v33 = vadd.f32 %v1111_v56, %v1101_v61  ;;  %s3511_s6 = sld [smem:[#allocation6 + $0x36]] }
 0x173   :  { %v1129_v54 = vld [vmem:[#allocation4] sm:$0xff]  ;;  %v1102_v26 = vadd.f32 %v1098_v1, %v1088_v29  ;;  %v3246_v51 = vpop.permute.xlu1 %1379 }
 0x174   :  { %v1130_v5 = vld [vmem:[#allocation4 + $0x8] sm:$0xff]  ;;  %v1135_v34 = vmul.f32 %v3154_v32, %v1129_v54  ;;  %v3244_v37 = vpop.permute.xlu0 %1375 }
 0x175   :  { %v1143_v16 = vld [vmem:[#allocation4 + $0x1] sm:$0xff]  ;;  %v1136_v9 = vmul.f32 %v3154_v32, %v1130_v5  ;;  %v1144_v55 = vld [vmem:[#allocation4 + $0x9] sm:$0xff]  ;;  %v1131_v41 = vld [vmem:[#allocation4 + $0x18] sm:$0xff]  ;;  %v1116_v12 = vadd.f32 %v1112_v11, %v1102_v26 }
 0x176   :  { %v1149_v7 = vmul.f32 %v3185_v24, %v1143_v16  ;;  %v1157_v3 = vld [vmem:[#allocation4 + $0x2] sm:$0xff]  ;;  %v1139_v57 = vadd.f32 %v1135_v34, %v1113_v15  ;;  %v1158_v47 = vld [vmem:[#allocation4 + $0xa] sm:$0xff]  ;;  %v1137_v38 = vmul.f32 %v3154_v32, %v1131_v41  ;;  %v1145_v30 = vld [vmem:[#allocation4 + $0x19] sm:$0xff]  ;;  %v1150_v35 = vmul.f32 %v3185_v24, %v1144_v55 }
 0x177   :  { %v1132_v19 = vld [vmem:[#allocation4 + $0x20] sm:$0xff]  ;;  %v1140_v8 = vadd.f32 %v1136_v9, %v1114_v18  ;;  %v1163_v46 = vmul.f32 %v3215_v49, %v1157_v3  ;;  %v1172_v43 = vld [vmem:[#allocation4 + $0xb] sm:$0xff]  ;;  %v1151_v2 = vmul.f32 %v3185_v24, %v1145_v30  ;;  %v1164_v27 = vmul.f32 %v3215_v49, %v1158_v47 }
 0x178   :  { %v1171_v48 = vld [vmem:[#allocation4 + $0x3] sm:$0xff]  ;;  %v1138_v36 = vmul.f32 %v3154_v32, %v1132_v19  ;;  %v1153_v40 = vadd.f32 %v1149_v7, %v1139_v57  ;;  %v1159_v23 = vld [vmem:[#allocation4 + $0x1a] sm:$0xff]  ;;  %v1141_v62 = vadd.f32 %v1137_v38, %v1115_v33  ;;  %v1186_v50 = vld [vmem:[#allocation4 + $0xc] sm:$0xff]  ;;  %v1178_v54 = vmul.f32 %v3218_v0, %v1172_v43  ;;  %v3278_v38 = vpop.permute.xlu2 %1381 }
 0x179   :  { %v1146_v53 = vld [vmem:[#allocation4 + $0x21] sm:$0xff]  ;;  %v1154_v63 = vadd.f32 %v1150_v35, %v1140_v8  ;;  %v1177_v32 = vmul.f32 %v3218_v0, %v1171_v48  ;;  %v1200_v61 = vld [vmem:[#allocation4 + $0xd] sm:$0xff]  ;;  %v1165_v31 = vmul.f32 %v3215_v49, %v1159_v23  ;;  %v1192_v11 = vmul.f32 %v3224_v45, %v1186_v50 }
 0x17a   :  { %v1160_v59 = vld [vmem:[#allocation4 + $0x22] sm:$0xff]  ;;  %v1142_v58 = vadd.f32 %v1138_v36, %v1116_v12  ;;  %v1152_v10 = vmul.f32 %v3185_v24, %v1146_v53  ;;  %v1167_v60 = vadd.f32 %v1163_v46, %v1153_v40  ;;  %v1155_v15 = vadd.f32 %v1151_v2, %v1141_v62  ;;  %v1214_v33 = vld [vmem:[#allocation4 + $0xe] sm:$0xff] }
 0x17b   :  { %v1173_v52 = vld [vmem:[#allocation4 + $0x1b] sm:$0xff]  ;;  %v1185_v28 = vld [vmem:[#allocation4 + $0x4] sm:$0xff]  ;;  %v1168_v17 = vadd.f32 %v1164_v27, %v1154_v63  ;;  %v1166_v5 = vmul.f32 %v3215_v49, %v1160_v59  ;;  %1259 = vst.msk [vmem:[#allocation4 + $0x10] sm:$0x3f] %vm210_vm7, %v3204_v21  ;;  %v3288_v48 = vpop.permute.xlu1 %1383  ;;  %v1220_v46 = vmul.f32 %v3237_v20, %v1214_v33  ;;  %v1282_v27 = vstv %s3254_s1  ;;  %s3544_s1 = sld [smem:[#allocation6 + $0x3d]] }
 0x17c   :  { %v1199_v6 = vld [vmem:[#allocation4 + $0x5] sm:$0xff]  ;;  %v1187_v29 = vld [vmem:[#allocation4 + $0x1c] sm:$0xff]  ;;  %v1156_v24 = vadd.f32 %v1152_v10, %v1142_v58  ;;  %v1181_v34 = vadd.f32 %v1177_v32, %v1167_v60  ;;  %v1191_v16 = vmul.f32 %v3224_v45, %v1185_v28  ;;  %v1169_v55 = vadd.f32 %v1165_v31, %v1155_v15 }
 0x17d   :  { %v1174_v56 = vld [vmem:[#allocation4 + $0x23] sm:$0xff]  ;;  %v1179_v7 = vmul.f32 %v3218_v0, %v1173_v52  ;;  %v1182_v3 = vadd.f32 %v1178_v54, %v1168_v17  ;;  %v1205_v19 = vmul.f32 %v3229_v14, %v1199_v6  ;;  %v1193_v30 = vmul.f32 %v3224_v45, %v1187_v29 }
 0x17e   :  { %v1213_v1 = vld [vmem:[#allocation4 + $0x6] sm:$0xff]  ;;  %v1201_v18 = vld [vmem:[#allocation4 + $0x1d] sm:$0xff]  ;;  %v1170_v57 = vadd.f32 %v1166_v5, %v1156_v24  ;;  %v1180_v47 = vmul.f32 %v3218_v0, %v1174_v56  ;;  %v3286_v0 = vpop.permute.xlu0 %1377  ;;  %v1296_v60 = vstv %s3258_s7  ;;  %v3311_v15 = vstv %s3270_s8  ;;  %s3547_s7 = sld [smem:[#allocation6 + $0x44]] }
 0x17f   :  { %v1215_v9 = vld [vmem:[#allocation4 + $0x1e] sm:$0xff]  ;;  %1257 = vst.msk [vmem:[#allocation4] sm:$0xff] %vm98_vm0, %v3133_v44  ;;  %v1216_v49 = vld [vmem:[#allocation4 + $0x26] sm:$0xff]  ;;  %v1195_v44 = vadd.f32 %v1191_v16, %v1181_v34  ;;  %v1183_v8 = vadd.f32 %v1179_v7, %v1169_v55  ;;  %v1196_v35 = vadd.f32 %v1192_v11, %v1182_v3  ;;  %v1219_v53 = vmul.f32 %v3237_v20, %v1213_v1  ;;  %s3558_s8 = sld [smem:[#allocation6 + $0x52]] }
 0x180   :  { %v1188_v26 = vld [vmem:[#allocation4 + $0x24] sm:$0xff]  ;;  %1258 = vst.msk [vmem:[#allocation4 + $0x8] sm:$0xff] %vm98_vm0, %v3161_v4  ;;  %v1206_v4 = vmul.f32 %v3229_v14, %v1200_v61  ;;  %v1184_v21 = vadd.f32 %v1180_v47, %v1170_v57  ;;  %v1222_v28 = vmul.f32 %v3237_v20, %v1216_v49  ;;  %v3308_v61 = vstv %s3264_s25  ;;  %v3328_v47 = vpop.permute.xlu2 %1507  ;;  %s3552_s25 = sld [smem:[#allocation6 + $0x4b]] }
 0x181   :  { %v1202_v41 = vld [vmem:[#allocation4 + $0x25] sm:$0xff]  ;;  %1260 = vst.msk [vmem:[#allocation4 + $0x18] sm:$0xff] %vm98_vm0, %v3163_v42  ;;  %v1194_v12 = vmul.f32 %v3224_v45, %v1188_v26  ;;  %v1209_v36 = vadd.f32 %v1205_v19, %v1195_v44  ;;  %v1197_v40 = vadd.f32 %v1193_v30, %v1183_v8  ;;  %v1207_v42 = vmul.f32 %v3229_v14, %v1201_v18 }
 0x182   :  { %1261 = vst.msk [vmem:[#allocation4 + $0x20] sm:$0xff] %vm98_vm0, %v3175_v22  ;;  %v1210_v23 = vadd.f32 %v1206_v4, %v1196_v35  ;;  %v1208_v43 = vmul.f32 %v3229_v14, %v1202_v41  ;;  %v1221_v22 = vmul.f32 %v3237_v20, %v1215_v9  ;;  %v3314_v29 = vstv %s3276_s9  ;;  %s3563_s9 = sld [smem:[#allocation6 + $0x59]] }
 0x183   :  { %1262 = vst.msk [vmem:[#allocation4 + $0x28] sm:$0x3f] %vm210_vm7, %v3206_v25  ;;  %v1198_v45 = vadd.f32 %v1194_v12, %v1184_v21  ;;  %v1223_v62 = vadd.f32 %v1219_v53, %v1209_v36  ;;  %v1211_v2 = vadd.f32 %v1207_v42, %v1197_v40  ;;  %v3318_v33 = vstv %s3284_s10  ;;  %v3322_v55 = vpop.permute.xlu1 %1513  ;;  %s3569_s10 = sld [smem:[#allocation6 + $0x60]] }
 0x184   :  { %v1224_v63 = vadd.f32 %v1220_v46, %v1210_v23  ;;  %v3326_v57 = vstv %s3294_s11  ;;  %s3574_s11 = sld [smem:[#allocation6 + $0x37]] }
 0x185   :  { %v1212_v52 = vadd.f32 %v1208_v43, %v1198_v45  ;;  %v1225_v32 = vadd.f32 %v1221_v22, %v1211_v2 }
 0x186   :  { %v1263_v59 = vld [vmem:[#allocation4] sm:$0xff]  ;;  %v3320_v9 = vpop.permute.xlu0 %1509 }
 0x187   :  { %v1264_v58 = vld [vmem:[#allocation4 + $0x8] sm:$0xff]  ;;  %v1269_v10 = vmul.f32 %v3242_v39, %v1263_v59  ;;  %v1226_v31 = vadd.f32 %v1222_v28, %v1212_v52 }
 0x188   :  { %v1277_v25 = vld [vmem:[#allocation4 + $0x1] sm:$0xff]  ;;  %v1270_v14 = vmul.f32 %v3242_v39, %v1264_v58  ;;  %v1278_v50 = vld [vmem:[#allocation4 + $0x9] sm:$0xff]  ;;  %v1265_v17 = vld [vmem:[#allocation4 + $0x18] sm:$0xff] }
 0x189   :  { %v1291_v6 = vld [vmem:[#allocation4 + $0x2] sm:$0xff]  ;;  %v1273_v56 = vadd.f32 %v1269_v10, %v1223_v62  ;;  %v1283_v20 = vmul.f32 %v1282_v27, %v1277_v25  ;;  %v1292_v54 = vld [vmem:[#allocation4 + $0xa] sm:$0xff]  ;;  %v1271_v24 = vmul.f32 %v3242_v39, %v1265_v17  ;;  %v1279_v34 = vld [vmem:[#allocation4 + $0x19] sm:$0xff]  ;;  %v1284_v16 = vmul.f32 %v1282_v27, %v1278_v50 }
 0x18a   :  { %v1266_v1 = vld [vmem:[#allocation4 + $0x20] sm:$0xff]  ;;  %v1274_v5 = vadd.f32 %v1270_v14, %v1224_v63  ;;  %v1297_v41 = vmul.f32 %v1296_v60, %v1291_v6  ;;  %v1306_v49 = vld [vmem:[#allocation4 + $0xb] sm:$0xff]  ;;  %v1285_v19 = vmul.f32 %v1282_v27, %v1279_v34  ;;  %v1298_v35 = vmul.f32 %v1296_v60, %v1292_v54 }
 0x18b   :  { %v1305_v18 = vld [vmem:[#allocation4 + $0x3] sm:$0xff]  ;;  %v1272_v7 = vmul.f32 %v3242_v39, %v1266_v1  ;;  %v1287_v26 = vadd.f32 %v1283_v20, %v1273_v56  ;;  %v1293_v11 = vld [vmem:[#allocation4 + $0x1a] sm:$0xff]  ;;  %v1275_v44 = vadd.f32 %v1271_v24, %v1225_v32  ;;  %v1320_v40 = vld [vmem:[#allocation4 + $0xc] sm:$0xff]  ;;  %v1312_v2 = vmul.f32 %v3308_v61, %v1306_v49 }
 0x18c   :  { %v1280_v3 = vld [vmem:[#allocation4 + $0x21] sm:$0xff]  ;;  %v1288_v8 = vadd.f32 %v1284_v16, %v1274_v5  ;;  %v1311_v39 = vmul.f32 %v3308_v61, %v1305_v18  ;;  %v1334_v23 = vld [vmem:[#allocation4 + $0xd] sm:$0xff]  ;;  %v1299_v45 = vmul.f32 %v1296_v60, %v1293_v11 }
 0x18d   :  { %v1294_v30 = vld [vmem:[#allocation4 + $0x22] sm:$0xff]  ;;  %v1276_v12 = vadd.f32 %v1272_v7, %v1226_v31  ;;  %v1286_v36 = vmul.f32 %v1282_v27, %v1280_v3  ;;  %v1301_v53 = vadd.f32 %v1297_v41, %v1287_v26  ;;  %v1289_v46 = vadd.f32 %v1285_v19, %v1275_v44  ;;  %v1348_v10 = vld [vmem:[#allocation4 + $0xe] sm:$0xff] }
 0x18e   :  { %v1307_v4 = vld [vmem:[#allocation4 + $0x1b] sm:$0xff]  ;;  %v1319_v21 = vld [vmem:[#allocation4 + $0x4] sm:$0xff]  ;;  %v1302_v43 = vadd.f32 %v1298_v35, %v1288_v8  ;;  %v1300_v27 = vmul.f32 %v1296_v60, %v1294_v30  ;;  %v1326_v31 = vmul.f32 %v3311_v15, %v1320_v40  ;;  %1393 = vst.msk [vmem:[#allocation4 + $0x10] sm:$0x3f] %vm210_vm7, %v3286_v0  ;;  %v1340_v34 = vmul.f32 %v3314_v29, %v1334_v23 }
 0x18f   :  { %v1333_v42 = vld [vmem:[#allocation4 + $0x5] sm:$0xff]  ;;  %v1321_v22 = vld [vmem:[#allocation4 + $0x1c] sm:$0xff]  ;;  %v1290_v59 = vadd.f32 %v1286_v36, %v1276_v12  ;;  %v1315_v52 = vadd.f32 %v1311_v39, %v1301_v53  ;;  %v1325_v28 = vmul.f32 %v3311_v15, %v1319_v21  ;;  %v1303_v32 = vadd.f32 %v1299_v45, %v1289_v46 }
 0x190   :  { %v1308_v62 = vld [vmem:[#allocation4 + $0x23] sm:$0xff]  ;;  %v1313_v14 = vmul.f32 %v3308_v61, %v1307_v4  ;;  %v1316_v50 = vadd.f32 %v1312_v2, %v1302_v43  ;;  %v1339_v54 = vmul.f32 %v3314_v29, %v1333_v42  ;;  %v1327_v24 = vmul.f32 %v3311_v15, %v1321_v22 }
 0x191   :  { %v1347_v63 = vld [vmem:[#allocation4 + $0x6] sm:$0xff]  ;;  %v1335_v58 = vld [vmem:[#allocation4 + $0x1d] sm:$0xff]  ;;  %v1304_v56 = vadd.f32 %v1300_v27, %v1290_v59  ;;  %v1314_v20 = vmul.f32 %v3308_v61, %v1308_v62  ;;  %v1354_v26 = vmul.f32 %v3318_v33, %v1348_v10  ;;  %v1416_v35 = vstv %s3331_s12  ;;  %s3609_s12 = sld [smem:[#allocation6 + $0x3e]] }
 0x192   :  { %v1349_v25 = vld [vmem:[#allocation4 + $0x1e] sm:$0xff]  ;;  %1391 = vst.msk [vmem:[#allocation4] sm:$0xff] %vm98_vm0, %v3231_v13  ;;  %v1350_v60 = vld [vmem:[#allocation4 + $0x26] sm:$0xff]  ;;  %v1329_v13 = vadd.f32 %v1325_v28, %v1315_v52  ;;  %v1317_v1 = vadd.f32 %v1313_v14, %v1303_v32  ;;  %v1330_v5 = vadd.f32 %v1326_v31, %v1316_v50  ;;  %v1353_v0 = vmul.f32 %v3318_v33, %v1347_v63 }
 0x193   :  { %v1322_v6 = vld [vmem:[#allocation4 + $0x24] sm:$0xff]  ;;  %1392 = vst.msk [vmem:[#allocation4 + $0x8] sm:$0xff] %vm98_vm0, %v3244_v37  ;;  %v3359_v37 = vpop.permute.xlu0 %1511  ;;  %v1318_v61 = vadd.f32 %v1314_v20, %v1304_v56  ;;  %v1341_v3 = vmul.f32 %v3314_v29, %v1335_v58  ;;  %v1355_v19 = vmul.f32 %v3318_v33, %v1349_v25  ;;  %v3383_v23 = vstv %s3339_s14  ;;  %s3619_s14 = sld [smem:[#allocation6 + $0x4c]] }
 0x194   :  { %v1336_v17 = vld [vmem:[#allocation4 + $0x25] sm:$0xff]  ;;  %1394 = vst.msk [vmem:[#allocation4 + $0x18] sm:$0xff] %vm98_vm0, %v3246_v51  ;;  %v1328_v16 = vmul.f32 %v3311_v15, %v1322_v6  ;;  %v1343_v18 = vadd.f32 %v1339_v54, %v1329_v13  ;;  %v1331_v7 = vadd.f32 %v1327_v24, %v1317_v1  ;;  %v1344_v51 = vadd.f32 %v1340_v34, %v1330_v5  ;;  %v3371_v15 = vpop.permute.xlu1 %1517 }
 0x195   :  { %1395 = vst.msk [vmem:[#allocation4 + $0x20] sm:$0xff] %vm98_vm0, %v3278_v38  ;;  %v1342_v41 = vmul.f32 %v3314_v29, %v1336_v17  ;;  %v3374_v38 = vpop.permute.xlu2 %1515  ;;  %v1430_v29 = vstv %s3334_s13  ;;  %v3386_v46 = vstv %s3345_s26  ;;  %v3389_v22 = vstv %s3351_s15  ;;  %s3613_s13 = sld [smem:[#allocation6 + $0x45]] }
 0x196   :  { %1396 = vst.msk [vmem:[#allocation4 + $0x28] sm:$0x3f] %vm210_vm7, %v3288_v48  ;;  %v1332_v11 = vadd.f32 %v1328_v16, %v1318_v61  ;;  %v1357_v49 = vadd.f32 %v1353_v0, %v1343_v18  ;;  %v1345_v44 = vadd.f32 %v1341_v3, %v1331_v7  ;;  %v1358_v8 = vadd.f32 %v1354_v26, %v1344_v51  ;;  %s3624_s26 = sld [smem:[#allocation6 + $0x53]] }
 0x197   :  { %v1356_v48 = vmul.f32 %v3318_v33, %v1350_v60  ;;  %v3393_v10 = vstv %s3357_s16  ;;  %v3397_v17 = vstv %s3365_s17  ;;  %s3630_s15 = sld [smem:[#allocation6 + $0x5a]]  ;;  %s2379_s17 = smov [#allocation11]  }
 0x198   :  { %v1346_v4 = vadd.f32 %v1342_v41, %v1332_v11  ;;  %v1359_v53 = vadd.f32 %v1355_v19, %v1345_v44  ;;  %s3635_s16 = sld [smem:[#allocation6 + $0x61]] }
 0x199   :  { %v1397_v30 = vld [vmem:[#allocation4] sm:$0xff] }
 0x19a   :  { %v1398_v21 = vld [vmem:[#allocation4 + $0x8] sm:$0xff]  ;;  %v1403_v12 = vmul.f32 %v3326_v57, %v1397_v30  ;;  %v1360_v45 = vadd.f32 %v1356_v48, %v1346_v4 }
 0x19b   :  { %v1411_v36 = vld [vmem:[#allocation4 + $0x1] sm:$0xff]  ;;  %v1404_v39 = vmul.f32 %v3326_v57, %v1398_v21  ;;  %v1412_v40 = vld [vmem:[#allocation4 + $0x9] sm:$0xff]  ;;  %v1399_v43 = vld [vmem:[#allocation4 + $0x18] sm:$0xff]  ;;  %v3399_v60 = vpop.permute.xlu0 %1643 }
 0x19c   :  { %v1425_v42 = vld [vmem:[#allocation4 + $0x2] sm:$0xff]  ;;  %v1407_v62 = vadd.f32 %v1403_v12, %v1357_v49  ;;  %v1417_v33 = vmul.f32 %v1416_v35, %v1411_v36  ;;  %v1426_v2 = vld [vmem:[#allocation4 + $0xa] sm:$0xff]  ;;  %v1405_v59 = vmul.f32 %v3326_v57, %v1399_v43  ;;  %v1413_v52 = vld [vmem:[#allocation4 + $0x19] sm:$0xff]  ;;  %v1418_v28 = vmul.f32 %v1416_v35, %v1412_v40  ;;  %v3407_v44 = vpop.permute.xlu1 %1647 }
 0x19d   :  { %v1400_v63 = vld [vmem:[#allocation4 + $0x20] sm:$0xff]  ;;  %v1408_v27 = vadd.f32 %v1404_v39, %v1358_v8  ;;  %v1431_v6 = vmul.f32 %v1430_v29, %v1425_v42  ;;  %v1440_v31 = vld [vmem:[#allocation4 + $0xb] sm:$0xff]  ;;  %v1419_v20 = vmul.f32 %v1416_v35, %v1413_v52  ;;  %v1432_v1 = vmul.f32 %v1430_v29, %v1426_v2  ;;  %v3414_v21 = vpop.permute.xlu2 %1641 }
 0x19e   :  { %v1439_v58 = vld [vmem:[#allocation4 + $0x3] sm:$0xff]  ;;  %v1406_v25 = vmul.f32 %v3326_v57, %v1400_v63  ;;  %v1421_v14 = vadd.f32 %v1417_v33, %v1407_v62  ;;  %v1427_v50 = vld [vmem:[#allocation4 + $0x1a] sm:$0xff]  ;;  %v1409_v56 = vadd.f32 %v1405_v59, %v1359_v53  ;;  %v1454_v18 = vld [vmem:[#allocation4 + $0xc] sm:$0xff]  ;;  %v1446_v41 = vmul.f32 %v3383_v23, %v1440_v31 }
 0x19f   :  { %v1414_v32 = vld [vmem:[#allocation4 + $0x21] sm:$0xff]  ;;  %v1422_v13 = vadd.f32 %v1418_v28, %v1408_v27  ;;  %v1445_v57 = vmul.f32 %v3383_v23, %v1439_v58  ;;  %v1468_v7 = vld [vmem:[#allocation4 + $0xd] sm:$0xff]  ;;  %v1433_v51 = vmul.f32 %v1430_v29, %v1427_v50  ;;  %v1460_v40 = vmul.f32 %v3386_v46, %v1454_v18 }
 0x1a0   :  { %v1428_v54 = vld [vmem:[#allocation4 + $0x22] sm:$0xff]  ;;  %v1410_v34 = vadd.f32 %v1406_v25, %v1360_v45  ;;  %v1420_v61 = vmul.f32 %v1416_v35, %v1414_v32  ;;  %v1435_v16 = vadd.f32 %v1431_v6, %v1421_v14  ;;  %v1423_v3 = vadd.f32 %v1419_v20, %v1409_v56  ;;  %v1482_v48 = vld [vmem:[#allocation4 + $0xe] sm:$0xff] }
 0x1a1   :  { %v1441_v24 = vld [vmem:[#allocation4 + $0x1b] sm:$0xff]  ;;  %v1453_v5 = vld [vmem:[#allocation4 + $0x4] sm:$0xff]  ;;  %v1436_v26 = vadd.f32 %v1432_v1, %v1422_v13  ;;  %v1434_v8 = vmul.f32 %v1430_v29, %v1428_v54  ;;  %1527 = vst.msk [vmem:[#allocation4 + $0x10] sm:$0x3f] %vm210_vm7, %v3359_v37  ;;  %v1550_v13 = vstv %s3402_s18  ;;  %v3454_v18 = vstv %s3412_s20  ;;  %s2159_s18 = sshll.u32 %s2379_s17, 4  ;;  %s2160_s18 = int_to_ptr.vmem [resolvable:$true] %s2159_s18 }
 0x1a2   :  { %v1467_v0 = vld [vmem:[#allocation4 + $0x5] sm:$0xff]  ;;  %v1424_v19 = vadd.f32 %v1420_v61, %v1410_v34  ;;  %v1449_v30 = vadd.f32 %v1445_v57, %v1435_v16  ;;  %v1455_v35 = vld [vmem:[#allocation4 + $0x1c] sm:$0xff]  ;;  %v1459_v4 = vmul.f32 %v3386_v46, %v1453_v5  ;;  %v1437_v12 = vadd.f32 %v1433_v51, %v1423_v3 }
 0x1a3   :  { %v1442_v11 = vld [vmem:[#allocation4 + $0x23] sm:$0xff]  ;;  %v1447_v36 = vmul.f32 %v3383_v23, %v1441_v24  ;;  %v1450_v53 = vadd.f32 %v1446_v41, %v1436_v26  ;;  %v1473_v33 = vmul.f32 %v3389_v22, %v1467_v0  ;;  %v1461_v59 = vmul.f32 %v3386_v46, %v1455_v35  ;;  %v3445_v6 = vpop.permute.xlu0 %1645 }
 0x1a4   :  { %v1481_v49 = vld [vmem:[#allocation4 + $0x6] sm:$0xff]  ;;  %v1438_v45 = vadd.f32 %v1434_v8, %v1424_v19  ;;  %v1463_v43 = vadd.f32 %v1459_v4, %v1449_v30  ;;  %v1469_v62 = vld [vmem:[#allocation4 + $0x1d] sm:$0xff]  ;;  %v3457_v0 = vstv %s3420_s0  ;;  %v3462_v41 = vstv %s3426_s29  ;;  %s2161_s0 = sshll.u32 %s3725_s3, 4  ;;  %s2162_s0 = int_to_ptr.hbm [resolvable:$true] %s2161_s0 }
 0x1a5   :  { %1525 = vst.msk [vmem:[#allocation4] sm:$0xff] %vm98_vm0, %v3328_v47  ;;  %v1456_v39 = vld [vmem:[#allocation4 + $0x24] sm:$0xff]  ;;  %v1448_v47 = vmul.f32 %v3383_v23, %v1442_v11  ;;  %v1451_v63 = vadd.f32 %v1447_v36, %v1437_v12  ;;  %v1464_v27 = vadd.f32 %v1460_v40, %v1450_v53  ;;  %v1487_v58 = vmul.f32 %v3393_v10, %v1481_v49  ;;  %v3464_v49 = vpop.permute.xlu2 %1649 }
 0x1a6   :  { %v1470_v29 = vld [vmem:[#allocation4 + $0x25] sm:$0xff]  ;;  %1526 = vst.msk [vmem:[#allocation4 + $0x8] sm:$0xff] %vm98_vm0, %v3320_v9  ;;  %v1474_v9 = vmul.f32 %v3389_v22, %v1468_v7  ;;  %v1462_v52 = vmul.f32 %v3386_v46, %v1456_v39  ;;  %v1477_v28 = vadd.f32 %v1473_v33, %v1463_v43  ;;  %v1475_v25 = vmul.f32 %v3389_v22, %v1469_v62  ;;  %v3459_v7 = vpop.permute.xlu1 %1651 }
 0x1a7   :  { %v1484_v42 = vld [vmem:[#allocation4 + $0x26] sm:$0xff]  ;;  %v1483_v2 = vld [vmem:[#allocation4 + $0x1e] sm:$0xff]  ;;  %v1452_v23 = vadd.f32 %v1448_v47, %v1438_v45  ;;  %v1465_v37 = vadd.f32 %v1461_v59, %v1451_v63  ;;  %v1476_v14 = vmul.f32 %v3389_v22, %v1470_v29  ;;  %v1564_v22 = vstv %s3405_s19 }
 0x1a8   :  { %1528 = vst.msk [vmem:[#allocation4 + $0x18] sm:$0xff] %vm98_vm0, %v3322_v55  ;;  %v1478_v32 = vadd.f32 %v1474_v9, %v1464_v27  ;;  %v1488_v55 = vmul.f32 %v3393_v10, %v1482_v48  ;;  %v1491_v50 = vadd.f32 %v1487_v58, %v1477_v28  ;;  %v1489_v31 = vmul.f32 %v3393_v10, %v1483_v2 }
 0x1a9   :  { %1529 = vst.msk [vmem:[#allocation4 + $0x20] sm:$0xff] %vm98_vm0, %v3374_v38  ;;  %v1466_v46 = vadd.f32 %v1462_v52, %v1452_v23  ;;  %v1479_v38 = vadd.f32 %v1475_v25, %v1465_v37  ;;  %v1490_v1 = vmul.f32 %v3393_v10, %v1484_v42  ;;  %v3468_v12 = vstv %s3432_s2 }
 0x1aa   :  { %1530 = vst.msk [vmem:[#allocation4 + $0x28] sm:$0x3f] %vm210_vm7, %v3371_v15  ;;  %v1492_v56 = vadd.f32 %v1488_v55, %v1478_v32  ;;  %v3472_v45 = vstv %s3438_s23 }
 0x1ab   :  { %v1480_v54 = vadd.f32 %v1476_v14, %v1466_v46  ;;  %v1493_v34 = vadd.f32 %v1489_v31, %v1479_v38 }
 0x1ac   :  { %v1531_v20 = vld [vmem:[#allocation4] sm:$0xff] }
 0x1ad   :  { %v1532_v24 = vld [vmem:[#allocation4 + $0x8] sm:$0xff]  ;;  %v1537_v15 = vmul.f32 %v3397_v17, %v1531_v20  ;;  %v1494_v3 = vadd.f32 %v1490_v1, %v1480_v54  ;;  %v3485_v54 = vpop.permute.xlu0 %1777 }
 0x1ae   :  { %v1545_v5 = vld [vmem:[#allocation4 + $0x1] sm:$0xff]  ;;  %v1538_v61 = vmul.f32 %v3397_v17, %v1532_v24  ;;  %v1546_v16 = vld [vmem:[#allocation4 + $0x9] sm:$0xff] }
 0x1af   :  { %v1559_v57 = vld [vmem:[#allocation4 + $0x2] sm:$0xff]  ;;  %v1533_v10 = vld [vmem:[#allocation4 + $0x18] sm:$0xff]  ;;  %v1541_v51 = vadd.f32 %v1537_v15, %v1491_v50  ;;  %v1551_v26 = vmul.f32 %v1550_v13, %v1545_v5  ;;  %v1560_v11 = vld [vmem:[#allocation4 + $0xa] sm:$0xff]  ;;  %v1552_v4 = vmul.f32 %v1550_v13, %v1546_v16 }
 0x1b0   :  { %v1534_v19 = vld [vmem:[#allocation4 + $0x20] sm:$0xff]  ;;  %v1539_v8 = vmul.f32 %v3397_v17, %v1533_v10  ;;  %v1542_v30 = vadd.f32 %v1538_v61, %v1492_v56  ;;  %v1565_v29 = vmul.f32 %v1564_v22, %v1559_v57  ;;  %v1574_v42 = vld [vmem:[#allocation4 + $0xb] sm:$0xff]  ;;  %v1566_v2 = vmul.f32 %v1564_v22, %v1560_v11 }
 0x1b1   :  { %v1547_v35 = vld [vmem:[#allocation4 + $0x19] sm:$0xff]  ;;  %v1573_v48 = vld [vmem:[#allocation4 + $0x3] sm:$0xff]  ;;  %v1540_v36 = vmul.f32 %v3397_v17, %v1534_v19  ;;  %v1555_v39 = vadd.f32 %v1551_v26, %v1541_v51  ;;  %v1588_v17 = vld [vmem:[#allocation4 + $0xc] sm:$0xff]  ;;  %v1580_v46 = vmul.f32 %v3454_v18, %v1574_v42 }
 0x1b2   :  { %v1548_v53 = vld [vmem:[#allocation4 + $0x21] sm:$0xff]  ;;  %v1543_v47 = vadd.f32 %v1539_v8, %v1493_v34  ;;  %v1553_v43 = vmul.f32 %v1550_v13, %v1547_v35  ;;  %v1556_v62 = vadd.f32 %v1552_v4, %v1542_v30  ;;  %v1579_v52 = vmul.f32 %v3454_v18, %v1573_v48  ;;  %v1602_v58 = vld [vmem:[#allocation4 + $0xd] sm:$0xff]  ;;  %v3513_v4 = vpop.permute.xlu2 %1775 }
 0x1b3   :  { %v1561_v40 = vld [vmem:[#allocation4 + $0x1a] sm:$0xff]  ;;  %v1562_v33 = vld [vmem:[#allocation4 + $0x22] sm:$0xff]  ;;  %v1544_v27 = vadd.f32 %v1540_v36, %v1494_v3  ;;  %v1554_v9 = vmul.f32 %v1550_v13, %v1548_v53  ;;  %v1569_v23 = vadd.f32 %v1565_v29, %v1555_v39  ;;  %v1616_v13 = vld [vmem:[#allocation4 + $0xe] sm:$0xff]  ;;  %v1594_v34 = vmul.f32 %v3457_v0, %v1588_v17 }
 0x1b4   :  { %v1575_v63 = vld [vmem:[#allocation4 + $0x1b] sm:$0xff]  ;;  %v1587_v59 = vld [vmem:[#allocation4 + $0x4] sm:$0xff]  ;;  %v1557_v37 = vadd.f32 %v1553_v43, %v1543_v47  ;;  %v1567_v25 = vmul.f32 %v1564_v22, %v1561_v40  ;;  %v1570_v32 = vadd.f32 %v1566_v2, %v1556_v62  ;;  %v1568_v38 = vmul.f32 %v1564_v22, %v1562_v33  ;;  %1661 = vst.msk [vmem:[#allocation4 + $0x10] sm:$0x3f] %vm210_vm7, %v3445_v6 }
 0x1b5   :  { %v1601_v28 = vld [vmem:[#allocation4 + $0x5] sm:$0xff]  ;;  %v1558_v50 = vadd.f32 %v1554_v9, %v1544_v27  ;;  %v1583_v31 = vadd.f32 %v1579_v52, %v1569_v23  ;;  %v1589_v56 = vld [vmem:[#allocation4 + $0x1c] sm:$0xff]  ;;  %v1593_v20 = vmul.f32 %v3457_v0, %v1587_v59  ;;  %v1581_v24 = vmul.f32 %v3454_v18, %v1575_v63 }
 0x1b6   :  { %v1576_v55 = vld [vmem:[#allocation4 + $0x23] sm:$0xff]  ;;  %v1571_v1 = vadd.f32 %v1567_v25, %v1557_v37  ;;  %v1584_v15 = vadd.f32 %v1580_v46, %v1570_v32  ;;  %v1607_v10 = vmul.f32 %v3462_v41, %v1601_v28  ;;  %v1595_v11 = vmul.f32 %v3457_v0, %v1589_v56 }
 0x1b7   :  { %v1615_v14 = vld [vmem:[#allocation4 + $0x6] sm:$0xff]  ;;  %v1572_v16 = vadd.f32 %v1568_v38, %v1558_v50  ;;  %v1597_v57 = vadd.f32 %v1593_v20, %v1583_v31  ;;  %v1603_v3 = vld [vmem:[#allocation4 + $0x1d] sm:$0xff]  ;;  %v1622_v53 = vmul.f32 %v3468_v12, %v1616_v13  ;;  %v1684_v43 = vstv %s3475_s27 }
 0x1b8   :  { %1659 = vst.msk [vmem:[#allocation4] sm:$0xff] %vm98_vm0, %v3414_v21  ;;  %v1590_v5 = vld [vmem:[#allocation4 + $0x24] sm:$0xff]  ;;  %v1582_v21 = vmul.f32 %v3454_v18, %v1576_v55  ;;  %v1585_v26 = vadd.f32 %v1581_v24, %v1571_v1  ;;  %v1598_v19 = vadd.f32 %v1594_v34, %v1584_v15  ;;  %v3505_v18 = vpop.permute.xlu1 %1781  ;;  %v1621_v6 = vmul.f32 %v3468_v12, %v1615_v14  ;;  %v1780_v55 = vpop.permute.xlu0 %1779 }
 0x1b9   :  { %v1604_v22 = vld [vmem:[#allocation4 + $0x25] sm:$0xff]  ;;  %1660 = vst.msk [vmem:[#allocation4 + $0x8] sm:$0xff] %vm98_vm0, %v3399_v60  ;;  %v1608_v60 = vmul.f32 %v3462_v41, %v1602_v58  ;;  %v1596_v30 = vmul.f32 %v3457_v0, %v1590_v5  ;;  %v1611_v35 = vadd.f32 %v1607_v10, %v1597_v57  ;;  %v1698_v59 = vstv %s3478_s28 }
 0x1ba   :  { %v1618_v61 = vld [vmem:[#allocation4 + $0x26] sm:$0xff]  ;;  %v1617_v51 = vld [vmem:[#allocation4 + $0x1e] sm:$0xff]  ;;  %v1586_v8 = vadd.f32 %v1582_v21, %v1572_v16  ;;  %v1599_v48 = vadd.f32 %v1595_v11, %v1585_v26  ;;  %v1610_v39 = vmul.f32 %v3462_v41, %v1604_v22  ;;  %v3527_v52 = vstv %s3483_s24 }
 0x1bb   :  { %1662 = vst.msk [vmem:[#allocation4 + $0x18] sm:$0xff] %vm98_vm0, %v3407_v44  ;;  %v1609_v44 = vmul.f32 %v3462_v41, %v1603_v3  ;;  %v1612_v36 = vadd.f32 %v1608_v60, %v1598_v19  ;;  %v1625_v40 = vadd.f32 %v1621_v6, %v1611_v35  ;;  %v1623_v29 = vmul.f32 %v3468_v12, %v1617_v51  ;;  %v1784_v6 = vpop.permute.xlu2 %1783 }
 0x1bc   :  { %1663 = vst.msk [vmem:[#allocation4 + $0x20] sm:$0xff] %vm98_vm0, %v3464_v49  ;;  %v1600_v0 = vadd.f32 %v1596_v30, %v1586_v8  ;;  %v1624_v33 = vmul.f32 %v3468_v12, %v1618_v61  ;;  %v3530_v17 = vstv %s3491_s30  ;;  %v3533_v32 = vstv %s3497_s4 }
 0x1bd   :  { %1664 = vst.msk [vmem:[#allocation4 + $0x28] sm:$0x3f] %vm210_vm7, %v3459_v7  ;;  %v1613_v49 = vadd.f32 %v1609_v44, %v1599_v48  ;;  %v1626_v42 = vadd.f32 %v1622_v53, %v1612_v36  ;;  %v3537_v20 = vstv %s3503_s5  ;;  %v3541_v22 = vstv %s3511_s6 }
 0x1be   :  { %v1614_v62 = vadd.f32 %v1610_v39, %v1600_v0 }
 0x1bf   :  { %v1665_v47 = vld [vmem:[#allocation4] sm:$0xff]  ;;  %v1627_v27 = vadd.f32 %v1623_v29, %v1613_v49 }
 0x1c0   :  { %v1666_v2 = vld [vmem:[#allocation4 + $0x8] sm:$0xff]  ;;  %v1671_v63 = vmul.f32 %v3472_v45, %v1665_v47  ;;  %v1628_v28 = vadd.f32 %v1624_v33, %v1614_v62  ;;  %v1786_v26 = vpop.permute.xlu1 %1785 }
 0x1c1   :  { %v1679_v7 = vld [vmem:[#allocation4 + $0x1] sm:$0xff]  ;;  %v1672_v41 = vmul.f32 %v3472_v45, %v1666_v2  ;;  %v1680_v9 = vld [vmem:[#allocation4 + $0x9] sm:$0xff] }
 0x1c2   :  { %v1693_v23 = vld [vmem:[#allocation4 + $0x2] sm:$0xff]  ;;  %v1667_v58 = vld [vmem:[#allocation4 + $0x18] sm:$0xff]  ;;  %v1675_v37 = vadd.f32 %v1671_v63, %v1625_v40  ;;  %v1685_v12 = vmul.f32 %v1684_v43, %v1679_v7  ;;  %v1694_v25 = vld [vmem:[#allocation4 + $0xa] sm:$0xff]  ;;  %v1686_v31 = vmul.f32 %v1684_v43, %v1680_v9 }
 0x1c3   :  { %v1668_v46 = vld [vmem:[#allocation4 + $0x20] sm:$0xff]  ;;  %v1673_v14 = vmul.f32 %v3472_v45, %v1667_v58  ;;  %v1676_v50 = vadd.f32 %v1672_v41, %v1626_v42  ;;  %v1699_v5 = vmul.f32 %v1698_v59, %v1693_v23  ;;  %v1708_v34 = vld [vmem:[#allocation4 + $0xb] sm:$0xff]  ;;  %v1700_v3 = vmul.f32 %v1698_v59, %v1694_v25 }
 0x1c4   :  { %v1681_v38 = vld [vmem:[#allocation4 + $0x19] sm:$0xff]  ;;  %v1707_v56 = vld [vmem:[#allocation4 + $0x3] sm:$0xff]  ;;  %v1674_v13 = vmul.f32 %v3472_v45, %v1668_v46  ;;  %v1689_v24 = vadd.f32 %v1685_v12, %v1675_v37  ;;  %v1722_v8 = vld [vmem:[#allocation4 + $0xc] sm:$0xff]  ;;  %v1714_v0 = vmul.f32 %v3527_v52, %v1708_v34 }
 0x1c5   :  { %v1682_v1 = vld [vmem:[#allocation4 + $0x21] sm:$0xff]  ;;  %v1677_v61 = vadd.f32 %v1673_v14, %v1627_v27  ;;  %v1687_v16 = vmul.f32 %v1684_v43, %v1681_v38  ;;  %v1690_v21 = vadd.f32 %v1686_v31, %v1676_v50  ;;  %v1713_v45 = vmul.f32 %v3527_v52, %v1707_v56  ;;  %v1736_v35 = vld [vmem:[#allocation4 + $0xd] sm:$0xff] }
 0x1c6   :  { %v1695_v15 = vld [vmem:[#allocation4 + $0x1a] sm:$0xff]  ;;  %v1696_v57 = vld [vmem:[#allocation4 + $0x22] sm:$0xff]  ;;  %v1678_v11 = vadd.f32 %v1674_v13, %v1628_v28  ;;  %v1688_v19 = vmul.f32 %v1684_v43, %v1682_v1  ;;  %v1703_v60 = vadd.f32 %v1699_v5, %v1689_v24  ;;  %v1750_v43 = vld [vmem:[#allocation4 + $0xe] sm:$0xff]  ;;  %v1728_v7 = vmul.f32 %v3530_v17, %v1722_v8 }
 0x1c7   :  { %v1709_v10 = vld [vmem:[#allocation4 + $0x1b] sm:$0xff]  ;;  %v1721_v51 = vld [vmem:[#allocation4 + $0x4] sm:$0xff]  ;;  %v1691_v48 = vadd.f32 %v1687_v16, %v1677_v61  ;;  %v1701_v44 = vmul.f32 %v1698_v59, %v1695_v15  ;;  %v1704_v36 = vadd.f32 %v1700_v3, %v1690_v21  ;;  %v1702_v49 = vmul.f32 %v1698_v59, %v1696_v57  ;;  %1795 = vst.msk [vmem:[#allocation4 + $0x10] sm:$0x3f] %vm210_vm7, %v1780_v55  ;;  %v3576_v55 = vpop.permute.xlu0 %1911 }
 0x1c8   :  { %v1735_v30 = vld [vmem:[#allocation4 + $0x5] sm:$0xff]  ;;  %v1692_v40 = vadd.f32 %v1688_v19, %v1678_v11  ;;  %v1717_v29 = vadd.f32 %v1713_v45, %v1703_v60  ;;  %v1723_v42 = vld [vmem:[#allocation4 + $0x1c] sm:$0xff]  ;;  %v1727_v47 = vmul.f32 %v3530_v17, %v1721_v51  ;;  %v1715_v33 = vmul.f32 %v3527_v52, %v1709_v10  ;;  %v3584_v16 = vpop.permute.xlu1 %1915 }
 0x1c9   :  { %v1710_v53 = vld [vmem:[#allocation4 + $0x23] sm:$0xff]  ;;  %v1705_v62 = vadd.f32 %v1701_v44, %v1691_v48  ;;  %v1718_v2 = vadd.f32 %v1714_v0, %v1704_v36  ;;  %v1741_v28 = vmul.f32 %v3533_v32, %v1735_v30  ;;  %v1729_v12 = vmul.f32 %v3530_v17, %v1723_v42 }
 0x1ca   :  { %v1749_v39 = vld [vmem:[#allocation4 + $0x6] sm:$0xff]  ;;  %v1706_v59 = vadd.f32 %v1702_v49, %v1692_v40  ;;  %v1716_v9 = vmul.f32 %v3527_v52, %v1710_v53  ;;  %v1737_v23 = vld [vmem:[#allocation4 + $0x1d] sm:$0xff]  ;;  %v1818_v61 = vstv %s3544_s1  ;;  %v3591_v8 = vstv %s3552_s25 }
 0x1cb   :  { %1793 = vst.msk [vmem:[#allocation4] sm:$0xff] %vm98_vm0, %v3513_v4  ;;  %v1724_v63 = vld [vmem:[#allocation4 + $0x24] sm:$0xff]  ;;  %v1731_v4 = vadd.f32 %v1727_v47, %v1717_v29  ;;  %v1719_v37 = vadd.f32 %v1715_v33, %v1705_v62  ;;  %v1732_v25 = vadd.f32 %v1728_v7, %v1718_v2  ;;  %v1755_v50 = vmul.f32 %v3537_v20, %v1749_v39 }
 0x1cc   :  { %v1738_v27 = vld [vmem:[#allocation4 + $0x25] sm:$0xff]  ;;  %1794 = vst.msk [vmem:[#allocation4 + $0x8] sm:$0xff] %vm98_vm0, %v3485_v54  ;;  %v1742_v54 = vmul.f32 %v3533_v32, %v1736_v35  ;;  %v1720_v52 = vadd.f32 %v1716_v9, %v1706_v59  ;;  %v1730_v46 = vmul.f32 %v3530_v17, %v1724_v63  ;;  %v1743_v31 = vmul.f32 %v3533_v32, %v1737_v23 }
 0x1cd   :  { %v1752_v41 = vld [vmem:[#allocation4 + $0x26] sm:$0xff]  ;;  %v1751_v58 = vld [vmem:[#allocation4 + $0x1e] sm:$0xff]  ;;  %v1745_v14 = vadd.f32 %v1741_v28, %v1731_v4  ;;  %v1733_v38 = vadd.f32 %v1729_v12, %v1719_v37  ;;  %v1744_v13 = vmul.f32 %v3533_v32, %v1738_v27  ;;  %v1832_v32 = vstv %s3547_s7 }
 0x1ce   :  { %1796 = vst.msk [vmem:[#allocation4 + $0x18] sm:$0xff] %vm98_vm0, %v3505_v18  ;;  %v1746_v56 = vadd.f32 %v1742_v54, %v1732_v25  ;;  %v1756_v18 = vmul.f32 %v3537_v20, %v1750_v43  ;;  %v1734_v17 = vadd.f32 %v1730_v46, %v1720_v52  ;;  %v1757_v15 = vmul.f32 %v3537_v20, %v1751_v58 }
 0x1cf   :  { %1797 = vst.msk [vmem:[#allocation4 + $0x20] sm:$0xff] %vm98_vm0, %v1784_v6  ;;  %v1759_v1 = vadd.f32 %v1755_v50, %v1745_v14  ;;  %v1747_v24 = vadd.f32 %v1743_v31, %v1733_v38  ;;  %v1758_v57 = vmul.f32 %v3537_v20, %v1752_v41  ;;  %v3594_v30 = vstv %s3558_s8  ;;  %v1914_v46 = vpop.permute.xlu0 %1913 }
 0x1d0   :  { %1798 = vst.msk [vmem:[#allocation4 + $0x28] sm:$0x3f] %vm210_vm7, %v1786_v26  ;;  %v1760_v5 = vadd.f32 %v1756_v18, %v1746_v56  ;;  %v1748_v21 = vadd.f32 %v1744_v13, %v1734_v17  ;;  %v1910_v26 = vpop.permute.xlu2 %1909  ;;  %v3597_v36 = vstv %s3563_s9  ;;  %v3601_v42 = vstv %s3569_s10 }
 0x1d1   :  { %v1761_v11 = vadd.f32 %v1757_v15, %v1747_v24  ;;  %v3605_v7 = vstv %s3574_s11 }
 0x1d2   :  { %v1799_v34 = vld [vmem:[#allocation4] sm:$0xff]  ;;  %v1762_v35 = vadd.f32 %v1758_v57, %v1748_v21 }
 0x1d3   :  { %v1800_v3 = vld [vmem:[#allocation4 + $0x8] sm:$0xff]  ;;  %v1805_v10 = vmul.f32 %v3541_v22, %v1799_v34 }
 0x1d4   :  { %v1813_v51 = vld [vmem:[#allocation4 + $0x1] sm:$0xff]  ;;  %v1806_v19 = vmul.f32 %v3541_v22, %v1800_v3  ;;  %v1814_v60 = vld [vmem:[#allocation4 + $0x9] sm:$0xff] }
 0x1d5   :  { %v1827_v45 = vld [vmem:[#allocation4 + $0x2] sm:$0xff]  ;;  %v1801_v6 = vld [vmem:[#allocation4 + $0x18] sm:$0xff]  ;;  %v1809_v20 = vadd.f32 %v1805_v10, %v1759_v1  ;;  %v1819_v48 = vmul.f32 %v1818_v61, %v1813_v51  ;;  %v1828_v44 = vld [vmem:[#allocation4 + $0xa] sm:$0xff]  ;;  %v1820_v49 = vmul.f32 %v1818_v61, %v1814_v60 }
 0x1d6   :  { %v1802_v53 = vld [vmem:[#allocation4 + $0x20] sm:$0xff]  ;;  %v1807_v0 = vmul.f32 %v3541_v22, %v1801_v6  ;;  %v1810_v39 = vadd.f32 %v1806_v19, %v1760_v5  ;;  %v1833_v2 = vmul.f32 %v1832_v32, %v1827_v45  ;;  %v1842_v63 = vld [vmem:[#allocation4 + $0xb] sm:$0xff]  ;;  %v1834_v4 = vmul.f32 %v1832_v32, %v1828_v44 }
 0x1d7   :  { %v1815_v40 = vld [vmem:[#allocation4 + $0x19] sm:$0xff]  ;;  %v1841_v29 = vld [vmem:[#allocation4 + $0x3] sm:$0xff]  ;;  %v1808_v47 = vmul.f32 %v3541_v22, %v1802_v53  ;;  %v1823_v62 = vadd.f32 %v1819_v48, %v1809_v20  ;;  %v1856_v22 = vld [vmem:[#allocation4 + $0xc] sm:$0xff]  ;;  %v1848_v56 = vmul.f32 %v3591_v8, %v1842_v63 }
 0x1d8   :  { %v1816_v43 = vld [vmem:[#allocation4 + $0x21] sm:$0xff]  ;;  %v1811_v27 = vadd.f32 %v1807_v0, %v1761_v11  ;;  %v1821_v41 = vmul.f32 %v1818_v61, %v1815_v40  ;;  %v1824_v59 = vadd.f32 %v1820_v49, %v1810_v39  ;;  %v1847_v25 = vmul.f32 %v3591_v8, %v1841_v29  ;;  %v1870_v52 = vld [vmem:[#allocation4 + $0xd] sm:$0xff]  ;;  %v1918_v6 = vpop.permute.xlu2 %1917 }
 0x1d9   :  { %v1829_v33 = vld [vmem:[#allocation4 + $0x1a] sm:$0xff]  ;;  %v1830_v9 = vld [vmem:[#allocation4 + $0x22] sm:$0xff]  ;;  %v1812_v58 = vadd.f32 %v1808_v47, %v1762_v35  ;;  %v1822_v37 = vmul.f32 %v1818_v61, %v1816_v43  ;;  %v1837_v12 = vadd.f32 %v1833_v2, %v1823_v62  ;;  %v1884_v5 = vld [vmem:[#allocation4 + $0xe] sm:$0xff]  ;;  %v1862_v3 = vmul.f32 %v3594_v30, %v1856_v22 }
 0x1da   :  { %v1843_v23 = vld [vmem:[#allocation4 + $0x1b] sm:$0xff]  ;;  %v1855_v28 = vld [vmem:[#allocation4 + $0x4] sm:$0xff]  ;;  %v1825_v14 = vadd.f32 %v1821_v41, %v1811_v27  ;;  %v1835_v50 = vmul.f32 %v1832_v32, %v1829_v33  ;;  %v1838_v38 = vadd.f32 %v1834_v4, %v1824_v59  ;;  %v1836_v13 = vmul.f32 %v1832_v32, %v1830_v9  ;;  %v1920_v32 = vpop.permute.xlu1 %1919  ;;  %1929 = vst.msk [vmem:[#allocation4 + $0x10] sm:$0x3f] %vm210_vm7, %v1914_v46 }
 0x1db   :  { %v1869_v54 = vld [vmem:[#allocation4 + $0x5] sm:$0xff]  ;;  %v1826_v17 = vadd.f32 %v1822_v37, %v1812_v58  ;;  %v1851_v1 = vadd.f32 %v1847_v25, %v1837_v12  ;;  %v1857_v24 = vld [vmem:[#allocation4 + $0x1c] sm:$0xff]  ;;  %v1861_v15 = vmul.f32 %v3594_v30, %v1855_v28  ;;  %v1849_v61 = vmul.f32 %v3591_v8, %v1843_v23 }
 0x1dc   :  { %v1844_v31 = vld [vmem:[#allocation4 + $0x23] sm:$0xff]  ;;  %v1839_v34 = vadd.f32 %v1835_v50, %v1825_v14  ;;  %v1852_v21 = vadd.f32 %v1848_v56, %v1838_v38  ;;  %v1875_v45 = vmul.f32 %v3597_v36, %v1869_v54  ;;  %v1863_v48 = vmul.f32 %v3594_v30, %v1857_v24 }
 0x1dd   :  { %v1883_v18 = vld [vmem:[#allocation4 + $0x6] sm:$0xff]  ;;  %v1840_v11 = vadd.f32 %v1836_v13, %v1826_v17  ;;  %v1865_v19 = vadd.f32 %v1861_v15, %v1851_v1  ;;  %v1871_v60 = vld [vmem:[#allocation4 + $0x1d] sm:$0xff]  ;;  %v1876_v44 = vmul.f32 %v3597_v36, %v1870_v52  ;;  %v1890_v47 = vmul.f32 %v3601_v42, %v1884_v5 }
 0x1de   :  { %1927 = vst.msk [vmem:[#allocation4] sm:$0xff] %vm98_vm0, %v1910_v26  ;;  %v1858_v57 = vld [vmem:[#allocation4 + $0x24] sm:$0xff]  ;;  %v1850_v26 = vmul.f32 %v3591_v8, %v1844_v31  ;;  %v1853_v20 = vadd.f32 %v1849_v61, %v1839_v34  ;;  %v1889_v39 = vmul.f32 %v3601_v42, %v1883_v18  ;;  %v1877_v49 = vmul.f32 %v3597_v36, %v1871_v60 }
 0x1df   :  { %v1872_v10 = vld [vmem:[#allocation4 + $0x25] sm:$0xff]  ;;  %1928 = vst.msk [vmem:[#allocation4 + $0x8] sm:$0xff] %vm98_vm0, %v3576_v55  ;;  %v1866_v55 = vadd.f32 %v1862_v3, %v1852_v21  ;;  %v1864_v53 = vmul.f32 %v3594_v30, %v1858_v57  ;;  %v1879_v0 = vadd.f32 %v1875_v45, %v1865_v19  ;;  %v1952_v27 = vstv %s3609_s12 }
 0x1e0   :  { %v1886_v51 = vld [vmem:[#allocation4 + $0x26] sm:$0xff]  ;;  %v1885_v35 = vld [vmem:[#allocation4 + $0x1e] sm:$0xff]  ;;  %v1854_v8 = vadd.f32 %v1850_v26, %v1840_v11  ;;  %v1867_v40 = vadd.f32 %v1863_v48, %v1853_v20  ;;  %v1878_v43 = vmul.f32 %v3597_v36, %v1872_v10  ;;  %v1966_v12 = vstv %s3613_s13 }
 0x1e1   :  { %1930 = vst.msk [vmem:[#allocation4 + $0x18] sm:$0xff] %vm98_vm0, %v3584_v16  ;;  %v1880_v29 = vadd.f32 %v1876_v44, %v1866_v55  ;;  %v1893_v30 = vadd.f32 %v1889_v39, %v1879_v0  ;;  %v1891_v33 = vmul.f32 %v3601_v42, %v1885_v35  ;;  %v1892_v59 = vmul.f32 %v3601_v42, %v1886_v51 }
 0x1e2   :  { %1931 = vst.msk [vmem:[#allocation4 + $0x20] sm:$0xff] %vm98_vm0, %v1918_v6  ;;  %v1868_v16 = vadd.f32 %v1864_v53, %v1854_v8  ;;  %v1881_v62 = vadd.f32 %v1877_v49, %v1867_v40  ;;  %v1980_v25 = vstv %s3619_s14  ;;  %v1994_v50 = vstv %s3624_s26 }
 0x1e3   :  { %1932 = vst.msk [vmem:[#allocation4 + $0x28] sm:$0x3f] %vm210_vm7, %v1920_v32  ;;  %v1894_v2 = vadd.f32 %v1890_v47, %v1880_v29  ;;  %v2008_v13 = vstv %s3630_s15  ;;  %v2022_v21 = vstv %s3635_s16 }
 0x1e4   :  { %v1882_v41 = vadd.f32 %v1878_v43, %v1868_v16  ;;  %v1895_v28 = vadd.f32 %v1891_v33, %v1881_v62 }
 0x1e5   :  { %v1933_v63 = vld [vmem:[#allocation4] sm:$0xff] }
 0x1e6   :  { %v1934_v9 = vld [vmem:[#allocation4 + $0x8] sm:$0xff]  ;;  %v1939_v4 = vmul.f32 %v3605_v7, %v1933_v63  ;;  %v1896_v22 = vadd.f32 %v1892_v59, %v1882_v41 }
 0x1e7   :  { %v1947_v23 = vld [vmem:[#allocation4 + $0x1] sm:$0xff]  ;;  %v1940_v36 = vmul.f32 %v3605_v7, %v1934_v9  ;;  %v1948_v58 = vld [vmem:[#allocation4 + $0x9] sm:$0xff] }
 0x1e8   :  { %v1961_v37 = vld [vmem:[#allocation4 + $0x2] sm:$0xff]  ;;  %v1935_v54 = vld [vmem:[#allocation4 + $0x18] sm:$0xff]  ;;  %v1943_v52 = vadd.f32 %v1939_v4, %v1893_v30  ;;  %v1953_v46 = vmul.f32 %v1952_v27, %v1947_v23  ;;  %v1962_v14 = vld [vmem:[#allocation4 + $0xa] sm:$0xff]  ;;  %v1954_v18 = vmul.f32 %v1952_v27, %v1948_v58 }
 0x1e9   :  { %v1936_v42 = vld [vmem:[#allocation4 + $0x20] sm:$0xff]  ;;  %v1941_v38 = vmul.f32 %v3605_v7, %v1935_v54  ;;  %v1944_v31 = vadd.f32 %v1940_v36, %v1894_v2  ;;  %v1967_v34 = vmul.f32 %v1966_v12, %v1961_v37  ;;  %v1976_v61 = vld [vmem:[#allocation4 + $0xb] sm:$0xff]  ;;  %v1968_v32 = vmul.f32 %v1966_v12, %v1962_v14 }
 0x1ea   :  { %v1949_v56 = vld [vmem:[#allocation4 + $0x19] sm:$0xff]  ;;  %v1975_v17 = vld [vmem:[#allocation4 + $0x3] sm:$0xff]  ;;  %v1942_v1 = vmul.f32 %v3605_v7, %v1936_v42  ;;  %v1957_v15 = vadd.f32 %v1953_v46, %v1943_v52  ;;  %v1990_v6 = vld [vmem:[#allocation4 + $0xc] sm:$0xff]  ;;  %v1982_v44 = vmul.f32 %v1980_v25, %v1976_v61 }
 0x1eb   :  { %v1950_v24 = vld [vmem:[#allocation4 + $0x21] sm:$0xff]  ;;  %v1945_v57 = vadd.f32 %v1941_v38, %v1895_v28  ;;  %v1955_v3 = vmul.f32 %v1952_v27, %v1949_v56  ;;  %v1958_v10 = vadd.f32 %v1954_v18, %v1944_v31  ;;  %v1981_v35 = vmul.f32 %v1980_v25, %v1975_v17  ;;  %v2004_v29 = vld [vmem:[#allocation4 + $0xd] sm:$0xff] }
 0x1ec   :  { %v1963_v5 = vld [vmem:[#allocation4 + $0x1a] sm:$0xff]  ;;  %v1964_v51 = vld [vmem:[#allocation4 + $0x22] sm:$0xff]  ;;  %v1946_v26 = vadd.f32 %v1942_v1, %v1896_v22  ;;  %v1956_v19 = vmul.f32 %v1952_v27, %v1950_v24  ;;  %v1971_v60 = vadd.f32 %v1967_v34, %v1957_v15  ;;  %v1996_v62 = vmul.f32 %v1994_v50, %v1990_v6  ;;  %v2018_v9 = vld [vmem:[#allocation4 + $0xe] sm:$0xff] }
 0x1ed   :  { %v1989_v11 = vld [vmem:[#allocation4 + $0x4] sm:$0xff]  ;;  %v1977_v45 = vld [vmem:[#allocation4 + $0x1b] sm:$0xff]  ;;  %v1959_v20 = vadd.f32 %v1955_v3, %v1945_v57  ;;  %v1969_v7 = vmul.f32 %v1966_v12, %v1963_v5  ;;  %v1972_v48 = vadd.f32 %v1968_v32, %v1958_v10  ;;  %v1970_v0 = vmul.f32 %v1966_v12, %v1964_v51 }
 0x1ee   :  { %v1978_v55 = vld [vmem:[#allocation4 + $0x23] sm:$0xff]  ;;  %v1960_v53 = vadd.f32 %v1956_v19, %v1946_v26  ;;  %v1985_v39 = vadd.f32 %v1981_v35, %v1971_v60  ;;  %v1995_v49 = vmul.f32 %v1994_v50, %v1989_v11  ;;  %v1983_v16 = vmul.f32 %v1980_v25, %v1977_v45 }
 0x1ef   :  { %v2003_v8 = vld [vmem:[#allocation4 + $0x5] sm:$0xff]  ;;  %v1991_v40 = vld [vmem:[#allocation4 + $0x1c] sm:$0xff]  ;;  %v1973_v47 = vadd.f32 %v1969_v7, %v1959_v20  ;;  %v1986_v43 = vadd.f32 %v1982_v44, %v1972_v48  ;;  %v1984_v63 = vmul.f32 %v1980_v25, %v1978_v55  ;;  %v2010_v58 = vmul.f32 %v2008_v13, %v2004_v29 }
 0x1f0   :  { %v1992_v30 = vld [vmem:[#allocation4 + $0x24] sm:$0xff]  ;;  %v1974_v2 = vadd.f32 %v1970_v0, %v1960_v53  ;;  %v1999_v27 = vadd.f32 %v1995_v49, %v1985_v39  ;;  %v2009_v59 = vmul.f32 %v2008_v13, %v2003_v8  ;;  %v1997_v23 = vmul.f32 %v1994_v50, %v1991_v40 }
 0x1f1   :  { %v2017_v33 = vld [vmem:[#allocation4 + $0x6] sm:$0xff]  ;;  %v2005_v41 = vld [vmem:[#allocation4 + $0x1d] sm:$0xff]  ;;  %v1987_v4 = vadd.f32 %v1983_v16, %v1973_v47  ;;  %v2000_v28 = vadd.f32 %v1996_v62, %v1986_v43  ;;  %v1998_v12 = vmul.f32 %v1994_v50, %v1992_v30  ;;  %v2024_v31 = vmul.f32 %v2022_v21, %v2018_v9 }
 0x1f2   :  { %v2006_v36 = vld [vmem:[#allocation4 + $0x25] sm:$0xff]  ;;  %v1988_v37 = vadd.f32 %v1984_v63, %v1974_v2  ;;  %v2013_v22 = vadd.f32 %v2009_v59, %v1999_v27  ;;  %v2023_v52 = vmul.f32 %v2022_v21, %v2017_v33  ;;  %v2011_v14 = vmul.f32 %v2008_v13, %v2005_v41 }
 0x1f3   :  { %v2019_v54 = vld [vmem:[#allocation4 + $0x1e] sm:$0xff]  ;;  %v2001_v46 = vadd.f32 %v1997_v23, %v1987_v4  ;;  %v2014_v42 = vadd.f32 %v2010_v58, %v2000_v28  ;;  %v2020_v38 = vld [vmem:[#allocation4 + $0x26] sm:$0xff]  ;;  %v2012_v56 = vmul.f32 %v2008_v13, %v2006_v36  ;;  %v2107_v58 = vld [vmem:[#allocation10] sm:$0xff] }
 0x1f4   :  { %v2002_v25 = vadd.f32 %v1998_v12, %v1988_v37  ;;  %v2027_v18 = vadd.f32 %v2023_v52, %v2013_v22  ;;  %v2025_v1 = vmul.f32 %v2022_v21, %v2019_v54  ;;  %v2026_v5 = vmul.f32 %v2022_v21, %v2020_v38  ;;  %v2109_v37 = vld [vmem:[#allocation10 + $0x10] sm:$0xff]  ;;  %v2108_v52 = vld [vmem:[#allocation10 + $0x8] sm:$0xff] }
 0x1f5   :  { %v2015_v17 = vadd.f32 %v2011_v14, %v2001_v46  ;;  %v2028_v24 = vadd.f32 %v2024_v31, %v2014_v42  ;;  %v2110_v46 = vld [vmem:[#allocation10 + $0x18] sm:$0xff] }
 0x1f6   :  { %v2016_v15 = vadd.f32 %v2012_v56, %v2002_v25  ;;  %v2031_v34 = vsub.f32 0.0, %v2027_v18  ;;  %v2111_v25 = vld [vmem:[#allocation10 + $0x20] sm:$0xff] }
 0x1f7   :  { %v2029_v61 = vadd.f32 %v2025_v1, %v2015_v17  ;;  %v2032_v57 = vsub.f32 0.0, %v2028_v24  ;;  %v2112_v1 = vld [vmem:[#allocation10 + $0x28] sm:$0xff] }
 0x1f8   :  { %v2030_v50 = vadd.f32 %v2026_v5, %v2016_v15  ;;  %v2035_v3 = vmul.f32 1.442695, %v2031_v34 }
 0x1f9   :  { %v2033_v10 = vsub.f32 0.0, %v2029_v61  ;;  %v2037_v51 = vmul.f32 1.442695, %v2032_v57  ;;  %v2113_v57 = vld [vmem:[#allocation10 + $0x30] sm:$0xff] }
 0x1fa   :  { %v2034_v32 = vsub.f32 0.0, %v2030_v50  ;;  %2285 = vpow2.f32 %v2035_v3 }
 0x1fb   :  { %2287 = vpow2.f32 %v2037_v51  ;;  %v2039_v11 = vmul.f32 1.442695, %v2033_v10 }
 0x1fc   :  { %v2041_v26 = vmul.f32 1.442695, %v2034_v32  ;;  %v2114_v32 = vld [vmem:[#allocation10 + $0x38] sm:$0xff] }
 0x1fd   :  { %2289 = vpow2.f32 %v2039_v11 }
 0x1fe   :  { %2291 = vpow2.f32 %v2041_v26 }
 0x200   :  { %v2286_v13 = vpop.eup %2285 }
 0x201   :  { %v2288_v19 = vpop.eup %2287  ;;  %v2043_v60 = vadd.f32 1.0, %v2286_v13  ;;  %v2115_v13 = vld [vmem:[#allocation10 + $0x40] sm:$0xff] }
 0x202   :  { %v2044_v45 = vadd.f32 1.0, %v2288_v19 }
 0x203   :  { %v2290_v35 = vpop.eup %2289  ;;  %2293 = vrcp.f32 %v2043_v60  ;;  %v2056_v7 = vand.u32 2147483647, %v2043_v60  ;;  %v2058_v55 = vand.u32 2147483648, %v2043_v60  ;;  %vm2052_vm8 = vweird.f32 %v2043_v60 }
 0x204   :  { %v2292_v21 = vpop.eup %2291  ;;  %v3653_v6 = vadd.f32 1.0, %v2290_v35  ;;  %2295 = vrcp.f32 %v2044_v45  ;;  %v2071_v44 = vand.u32 2147483647, %v2044_v45  ;;  %vm2067_vm10 = vweird.f32 %v2044_v45 }
 0x205   :  { %v3655_v20 = vadd.f32 1.0, %v2292_v21  ;;  %vm3659_vm9 = vcmp.eq.f32.partialorder %v2056_v7, 8.507059e+37  ;;  %v2073_v29 = vand.u32 2147483648, %v2044_v45  ;;  %v2059_v16 = vor.u32 1.1754944e-38, %v2058_v55  ;;  %v2117_v21 = vld [vmem:[#allocation10 + $0x50] sm:$0xff] }
 0x206   :  { %2297 = vrcp.f32 %v3653_v6  ;;  %vm3663_vm11 = vcmp.eq.f32.partialorder %v2071_v44, 8.507059e+37  ;;  %vm2082_vm13 = vweird.f32 %v3653_v6  ;;  %v2086_v41 = vand.u32 2147483647, %v3653_v6  ;;  %v2120_v44 = vld [vmem:[#allocation10 + $0x68] sm:$0xff] }
 0x207   :  { %2299 = vrcp.f32 %v3655_v20  ;;  %v2074_v9 = vor.u32 1.1754944e-38, %v2073_v29  ;;  %v2088_v4 = vand.u32 2147483648, %v3653_v6  ;;  %vm2097_vm2 = vweird.f32 %v3655_v20 }
 0x208   :  { %v2103_v54 = vand.u32 2147483648, %v3655_v20  ;;  %v2101_v31 = vand.u32 2147483647, %v3655_v20  ;;  %vm2087_vm7 = vcmp.eq.f32.partialorder %v2086_v41, 8.507059e+37 }
 0x209   :  { %v2294_v48 = vpop.eup %2293  ;;  %v2089_v34 = vor.u32 1.1754944e-38, %v2088_v4 }
 0x20a   :  { %v2296_v8 = vpop.eup %2295  ;;  %v2048_v53 = vmul.f32 %v2294_v48, %v2043_v60  ;;  %vm2053_vm12 = vweird.f32 %v2294_v48  ;;  %v2104_v51 = vor.u32 1.1754944e-38, %v2103_v54 }
 0x20b   :  { %v2063_v0 = vmul.f32 %v2296_v8, %v2044_v45  ;;  %vm2068_vm14 = vweird.f32 %v2296_v8  ;;  %vm2054_vm15 = vmor %vm2052_vm8, %vm2053_vm12  ;;  %vm2102_vm8 = vcmp.eq.f32.partialorder %v2101_v31, 8.507059e+37  ;;  %v2116_v45 = vld [vmem:[#allocation10 + $0x48] sm:$0xff] }
 0x20c   :  { %v2298_v39 = vpop.eup %2297  ;;  %v2049_v40 = vsub.f32 1.0, %v2048_v53  ;;  %vm2069_vm3 = vmor %vm2067_vm10, %vm2068_vm14  ;;  %v2121_v53 = vld [vmem:[#allocation10 + $0x70] sm:$0xff] }
 0x20d   :  { %v2300_v47 = vpop.eup %2299  ;;  %v2064_v43 = vsub.f32 1.0, %v2063_v0  ;;  %v2078_v62 = vmul.f32 %v2298_v39, %v3653_v6  ;;  %vm2083_vm1 = vweird.f32 %v2298_v39 }
 0x20e   :  { %v2050_v33 = vmul.f32 %v2294_v48, %v2049_v40  ;;  %v2093_v2 = vmul.f32 %v2300_v47, %v3655_v20  ;;  %vm2098_vm4 = vweird.f32 %v2300_v47  ;;  %vm3685_vm5 = vmor %vm2082_vm13, %vm2083_vm1  ;;  %v2118_v20 = vld [vmem:[#allocation10 + $0x58] sm:$0xff] }
 0x20f   :  { %v2065_v63 = vmul.f32 %v2296_v8, %v2064_v43  ;;  %v2079_v27 = vsub.f32 1.0, %v2078_v62  ;;  %vm3694_vm6 = vmor %vm2097_vm2, %vm2098_vm4 }
 0x210   :  { %v2051_v59 = vadd.f32 %v2294_v48, %v2050_v33  ;;  %v2094_v23 = vsub.f32 1.0, %v2093_v2 }
 0x211   :  { %v2066_v28 = vadd.f32 %v2296_v8, %v2065_v63  ;;  %v2080_v36 = vmul.f32 %v2298_v39, %v2079_v27 }
 0x212   :  { %v2055_v12 = vsel %vm2054_vm15, %v2294_v48, %v2051_v59  ;;  %v2095_v22 = vmul.f32 %v2300_v47, %v2094_v23  ;;  %v2119_v48 = vld [vmem:[#allocation10 + $0x60] sm:$0xff] }
 0x213   :  { %v2060_v14 = vsel %vm3659_vm9, %v2059_v16, %v2055_v12  ;;  %v2070_v42 = vsel %vm2069_vm3, %v2296_v8, %v2066_v28  ;;  %v2081_v38 = vadd.f32 %v2298_v39, %v2080_v36 }
 0x214   :  { %v2075_v56 = vsel %vm3663_vm11, %v2074_v9, %v2070_v42  ;;  %v2096_v17 = vadd.f32 %v2300_v47, %v2095_v22  ;;  %v2123_v24 = vmul.f32 %v2107_v58, %v2060_v14  ;;  %v2125_v15 = vmul.f32 %v2109_v37, %v2060_v14 }
 0x215   :  { %v2085_v5 = vsel %vm3685_vm5, %v2298_v39, %v2081_v38  ;;  %v2124_v50 = vmul.f32 %v2108_v52, %v2075_v56  ;;  %v2126_v3 = vmul.f32 %v2110_v46, %v2075_v56  ;;  %v2127_v11 = vmul.f32 %v2111_v25, %v2060_v14  ;;  %v2122_v39 = vld [vmem:[#allocation10 + $0x78] sm:$0xff] }
 0x216   :  { %v2100_v10 = vsel %vm3694_vm6, %v2300_v47, %v2096_v17  ;;  %2139 = vst.msk [vmem:[#allocation11] sm:$0xff] %vm98_vm0, %v2123_v24  ;;  %v2090_v26 = vsel %vm2087_vm7, %v2089_v34, %v2085_v5  ;;  %v2128_v19 = vmul.f32 %v2112_v1, %v2075_v56  ;;  %v2129_v35 = vmul.f32 %v2113_v57, %v2060_v14 }
 0x217   :  { %2140 = vst.msk [vmem:[#allocation11 + $0x8] sm:$0xff] %vm98_vm0, %v2124_v50  ;;  %v2105_v60 = vsel %vm2102_vm8, %v2104_v51, %v2100_v10  ;;  %v2130_v6 = vmul.f32 %v2114_v32, %v2075_v56  ;;  %v2131_v7 = vmul.f32 %v2115_v13, %v2090_v26  ;;  %v2133_v8 = vmul.f32 %v2117_v21, %v2090_v26 }
 0x218   :  { %2141 = vst.msk [vmem:[#allocation11 + $0x10] sm:$0xff] %vm98_vm0, %v2125_v15  ;;  %v2132_v55 = vmul.f32 %v2116_v45, %v2105_v60  ;;  %v2134_v0 = vmul.f32 %v2118_v20, %v2105_v60  ;;  %v2135_v40 = vmul.f32 %v2119_v48, %v2090_v26  ;;  %v2136_v49 = vmul.f32 %v2120_v44, %v2105_v60 }
 0x219   :  { %2142 = vst.msk [vmem:[#allocation11 + $0x18] sm:$0xff] %vm98_vm0, %v2126_v3  ;;  %v2137_v29 = vmul.f32 %v2121_v53, %v2090_v26  ;;  %v2138_v47 = vmul.f32 %v2122_v39, %v2105_v60 }
 0x21a   :  { %2143 = vst.msk [vmem:[#allocation11 + $0x20] sm:$0xff] %vm98_vm0, %v2127_v11 }
 0x21b   :  { %2144 = vst.msk [vmem:[#allocation11 + $0x28] sm:$0xff] %vm98_vm0, %v2128_v19 }
 0x21c   :  { %2145 = vst.msk [vmem:[#allocation11 + $0x30] sm:$0xff] %vm98_vm0, %v2129_v35 }
 0x21d   :  { %2146 = vst.msk [vmem:[#allocation11 + $0x38] sm:$0xff] %vm98_vm0, %v2130_v6 }
 0x21e   :  { %2147 = vst.msk [vmem:[#allocation11 + $0x40] sm:$0xff] %vm98_vm0, %v2131_v7 }
 0x21f   :  { %2148 = vst.msk [vmem:[#allocation11 + $0x48] sm:$0xff] %vm98_vm0, %v2132_v55 }
 0x220   :  { %2149 = vst.msk [vmem:[#allocation11 + $0x50] sm:$0xff] %vm98_vm0, %v2133_v8 }
 0x221   :  { %2150 = vst.msk [vmem:[#allocation11 + $0x58] sm:$0xff] %vm98_vm0, %v2134_v0 }
 0x222   :  { %2151 = vst.msk [vmem:[#allocation11 + $0x60] sm:$0xff] %vm98_vm0, %v2135_v40 }
 0x223   :  { %2152 = vst.msk [vmem:[#allocation11 + $0x68] sm:$0xff] %vm98_vm0, %v2136_v49 }
 0x224   :  { %2153 = vst.msk [vmem:[#allocation11 + $0x70] sm:$0xff] %vm98_vm0, %v2137_v29 }
 0x225   :  { %2154 = vst.msk [vmem:[#allocation11 + $0x78] sm:$0xff] %vm98_vm0, %v2138_v47 }
 0x226   :  { %2167 = dma.vmem_to_hbm [thread:$0]  %s2160_s18, 2048, %s2162_s0, [#allocation8], %s2369_s21, %s2369_s21, %s2370_s22  }
 0x227   :  { %2365 = dma.done.wait [#allocation8], 2048  }
 0x228   :  { %2366 = vsyncadd [#allocation8], 4294965248 }
 0x229   :  { %2172 = vsyncpa [#allocation7], 1 }
 0x22a   :  { %2173 = vsyncpa [#allocation8], 1 }
 0x22b   :  { %2174 = vsyncpa [#allocation9], 1 }

</bundles_post_ra>
